<compile_context>
chip_gen: v5e
topology: v5e:2x2
jax: 0.10.0
libtpu: 0.0.40
codegen_flags: <defaults>
</compile_context>

<pallas_src>
import functools

import jax
import jax.numpy as jnp
from jax import lax
from jax.experimental import pallas as pl
from jax.experimental.pallas import tpu as pltpu


# ---------------------------------------------------------------------------
# Fused kernel: maxpool(2x2x2) -> conv3x3x3 (+folded BN) +ReLU -> conv3x3x3 (+BN) +ReLU
# ---------------------------------------------------------------------------
def _fused_down_doubleconv_kernel(x_ref, w1_ref, w2_ref, b1_ref, b2_ref, m_ref,
                                  o_ref, x1_sc, y1_sc, *,
                                  Ci, Co, Np, PADF, offsets):
    # ---- MaxPool3d(2,2): the 8 pool taps are stacked along the sublane axis ----
    pooled = x_ref[0, 0:Ci, :]
    for t in range(1, 8):
        pooled = jnp.maximum(pooled, x_ref[0, t * Ci:(t + 1) * Ci, :])

    # ---- Stage pooled (zero-ring padded) volume with a flat halo on both ends ----
    x1_sc[:, 0:PADF] = jnp.zeros((Ci, PADF), x1_sc.dtype)
    x1_sc[:, PADF + Np:PADF + Np + PADF] = jnp.zeros((Ci, PADF), x1_sc.dtype)
    x1_sc[:, PADF:PADF + Np] = pooled

    # ---- Conv1 (BN scale folded into weights): 27 accumulating MXU dots, f32 acc ----
    acc = jnp.zeros((Co, Np), jnp.float32)
    for t, off in enumerate(offsets):
        acc = acc + jnp.dot(w1_ref[t], x1_sc[:, off:off + Np],
                            preferred_element_type=jnp.float32)
    # BN bias + ReLU; zero the padding ring -> becomes conv2's zero padding
    y1 = (jnp.maximum(acc + b1_ref[...], 0.0) * m_ref[...]).astype(y1_sc.dtype)

    y1_sc[:, 0:PADF] = jnp.zeros((Co, PADF), y1_sc.dtype)
    y1_sc[:, PADF + Np:PADF + Np + PADF] = jnp.zeros((Co, PADF), y1_sc.dtype)
    y1_sc[:, PADF:PADF + Np] = y1

    # ---- Conv2 + BN bias + ReLU ----
    acc2 = jnp.zeros((Co, Np), jnp.float32)
    for t, off in enumerate(offsets):
        acc2 = acc2 + jnp.dot(w2_ref[t], y1_sc[:, off:off + Np],
                              preferred_element_type=jnp.float32)
    o_ref[0] = jnp.maximum(acc2 + b2_ref[...], 0.0).astype(o_ref.dtype)


# ---------------------------------------------------------------------------
# Compiler params: generation-aware VMEM limit (v7x has 64 MiB, v5e/v6e 128 MiB)
# ---------------------------------------------------------------------------
def _compiler_params(block_bytes):
    try:
        cap = int(pltpu.get_tpu_info().vmem_capacity_bytes)
    except Exception:  # pragma: no cover - info query unavailable
        cap = 128 << 20
    limit = int(min(max(4 * block_bytes + (8 << 20), 32 << 20), (cap * 3) // 4))
    return pltpu.CompilerParams(
        dimension_semantics=("parallel",),
        vmem_limit_bytes=limit)


# ---------------------------------------------------------------------------
# Wrapper
# ---------------------------------------------------------------------------
@jax.jit
def down_doubleconv(x, params):
    """x: (B, Ci, D, H, W) -> (B, Co, D//2, H//2, W//2), matching the PyTorch module."""
    compute_dtype = jnp.bfloat16
    out_dtype = jnp.float32   # TODO(synk): emit bf16 if downstream accepts it (halves the output write)

    B, Ci, D, H, W = x.shape
    assert D % 2 == 0 and H % 2 == 0 and W % 2 == 0, \
        "MaxPool3d(2,2) fused kernel requires even D/H/W (PyTorch floors odd dims)"
    Co = params["w1"].shape[0]
    D2, H2, W2 = D // 2, H // 2, W // 2
    Dp, Hp, Wp = D2 + 2, H2 + 2, W2 + 2        # pooled grid + conv zero-padding ring
    Np = Dp * Hp * Wp                          # flattened padded pooled grid (lane axis)
    PADF = Hp * Wp + Wp + 1                    # flat halo so all 27 taps are flat slices
    NEXT = Np + 2 * PADF

    # ---- input prep: zero-pad by one pool window, pack the 8 pool taps on sublanes ----
    xb = x.astype(compute_dtype)
    xp = jnp.pad(xb, ((0, 0), (0, 0), (2, 2), (2, 2), (2, 2)))
    xt = xp.reshape(B, Ci, Dp, 2, Hp, 2, Wp, 2)
    xt = xt.transpose(0, 3, 5, 7, 1, 2, 4, 6).reshape(B, 8 * Ci, Np)

    # ---- weights: fold BN scale in f32, then cast to bf16; taps on the leading axis ----
    w1 = params["w1"].astype(jnp.float32) * params["scale1"].astype(jnp.float32)[:, None, None, None, None]
    w2 = params["w2"].astype(jnp.float32) * params["scale2"].astype(jnp.float32)[:, None, None, None, None]
    w1r = jnp.transpose(w1, (2, 3, 4, 0, 1)).reshape(27, Co, Ci).astype(compute_dtype)
    w2r = jnp.transpose(w2, (2, 3, 4, 0, 1)).reshape(27, Co, Co).astype(compute_dtype)
    b1 = params["bias1"].reshape(Co, 1).astype(jnp.float32)
    b2 = params["bias2"].reshape(Co, 1).astype(jnp.float32)

    # ---- interior mask of the padded pooled grid (doubles as conv2's zero padding) ----
    md = (jnp.arange(Dp) >= 1) & (jnp.arange(Dp) <= D2)
    mh = (jnp.arange(Hp) >= 1) & (jnp.arange(Hp) <= H2)
    mw = (jnp.arange(Wp) >= 1) & (jnp.arange(Wp) <= W2)
    mask = (md[:, None, None] & mh[None, :, None] & mw[None, None, :])
    mask = mask.reshape(1, Np).astype(jnp.float32)

    # tap (kd,kh,kw) -> contiguous slice at this offset inside the halo-extended buffer
    offsets = tuple(kd * Hp * Wp + kh * Wp + kw
                    for kd in range(3) for kh in range(3) for kw in range(3))

    kernel = functools.partial(_fused_down_doubleconv_kernel,
                               Ci=Ci, Co=Co, Np=Np, PADF=PADF, offsets=offsets)

    # double-buffered input/output blocks + persistent VMEM scratch + small params
    block_bytes = (2 * (8 * Ci * Np * 2 + Co * Np * 4)
                   + (Ci + Co) * NEXT * 2
                   + 27 * (Co * Ci + Co * Co) * 2 + Np * 4 + 2 * Co * 4)
    assert block_bytes < (40 << 20), (
        "fused DownDoubleconv working set too large for VMEM; "
        "TODO(synk): add depth-slab tiling with manual halo DMA for large volumes")

    out = pl.pallas_call(
        kernel,
        out_shape=jax.ShapeDtypeStruct((B, Co, Np), out_dtype),
        grid_spec=pltpu.PrefetchScalarGridSpec(
            num_scalar_prefetch=0,
            grid=(B,),
            in_specs=[
                pl.BlockSpec((1, 8 * Ci, Np), lambda b: (b, 0, 0)),   # pool-tap packed input
                pl.BlockSpec((27, Co, Ci), lambda b: (0, 0, 0)),      # conv1 weights (BN-folded)
                pl.BlockSpec((27, Co, Co), lambda b: (0, 0, 0)),      # conv2 weights (BN-folded)
                pl.BlockSpec((Co, 1), lambda b: (0, 0)),              # BN1 bias
                pl.BlockSpec((Co, 1), lambda b: (0, 0)),              # BN2 bias
                pl.BlockSpec((1, Np), lambda b: (0, 0)),              # interior mask
            ],
            out_specs=pl.BlockSpec((1, Co, Np), lambda b: (b, 0, 0)),
            scratch_shapes=[pltpu.VMEM((Ci, NEXT), compute_dtype),
                            pltpu.VMEM((Co, NEXT), compute_dtype)]),
        compiler_params=_compiler_params(block_bytes),
    )(xt, w1r, w2r, b1, b2, mask)

    out = out.reshape(B, Co, Dp, Hp, Wp)[:, :, 1:1 + D2, 1:1 + H2, 1:1 + W2]
    return out


# ---------------------------------------------------------------------------
# Deterministic parameter init (shapes from the module's __init__)
# ---------------------------------------------------------------------------
def init_params(key, in_ch, out_ch):
    k1, k2, k3, k4, k5, k6 = jax.random.split(key, 6)
    eps = 1e-5
    w1 = 0.1 * jax.random.normal(k1, (out_ch, in_ch, 3, 3, 3), jnp.float32)
    w2 = 0.1 * jax.random.normal(k2, (out_ch, out_ch, 3, 3, 3), jnp.float32)
    # BatchNorm affine params (gamma, beta); running stats at defaults (mean=0, var=1)
    gamma1 = 1.0 + 0.1 * jax.random.normal(k3, (out_ch,), jnp.float32)
    beta1 = 0.1 * jax.random.normal(k4, (out_ch,), jnp.float32)
    gamma2 = 1.0 + 0.1 * jax.random.normal(k5, (out_ch,), jnp.float32)
    beta2 = 0.1 * jax.random.normal(k6, (out_ch,), jnp.float32)
    rm, rv = jnp.zeros((out_ch,)), jnp.ones((out_ch,))
    scale1 = gamma1 / jnp.sqrt(rv + eps)
    bias1 = beta1 - rm * scale1
    scale2 = gamma2 / jnp.sqrt(rv + eps)
    bias2 = beta2 - rm * scale2
    return dict(w1=w1, w2=w2, scale1=scale1, bias1=bias1, scale2=scale2, bias2=bias2)


# ---------------------------------------------------------------------------
# Pure-JAX reference (for correctness check)
# ---------------------------------------------------------------------------
def reference(x, params):
    y = lax.reduce_window(x, -jnp.inf, lax.max,
                          (1, 1, 2, 2, 2), (1, 1, 2, 2, 2), "VALID")

    def conv_bn_relu(z, w, scale, bias):
        z = lax.conv_general_dilated(z, w, (1, 1, 1), [(1, 1)] * 3,
                                     dimension_numbers=("NCDHW", "OIDHW", "NCDHW"))
        z = z * scale.reshape(1, -1, 1, 1, 1) + bias.reshape(1, -1, 1, 1, 1)
        return jnp.maximum(z, 0.0)

    y = conv_bn_relu(y, params["w1"], params["scale1"], params["bias1"])
    y = conv_bn_relu(y, params["w2"], params["scale2"], params["bias2"])
    return y


if __name__ == "__main__":
    B, Ci, Co = 2, 4, 8
    D, H, W = 8, 16, 16

    key = jax.random.PRNGKey(0)
    kx, kp = jax.random.split(key)
    x = jax.random.normal(kx, (B, Ci, D, H, W), jnp.float32)
    params = init_params(kp, Ci, Co)

    out = jax.block_until_ready(down_doubleconv(x, params))
    ref = jax.block_until_ready(reference(x, params))

    assert out.shape == (B, Co, D // 2, H // 2, W // 2), out.shape
    err = float(jnp.max(jnp.abs(out - ref)))
    assert jnp.allclose(out, ref, atol=5e-2, rtol=5e-2), err

    print("KERNEL_OK")
</pallas_src>

<mosaic_0001>
module attributes {stable_mosaic.version = 11 : i64} {
  func.func @_fused_down_doubleconv_kernel(%arg0: i32, %arg1: memref<1x32x600xbf16, #tpu.memory_space<vmem>>, %arg2: memref<27x8x4xbf16, #tpu.memory_space<vmem>>, %arg3: memref<27x8x8xbf16, #tpu.memory_space<vmem>>, %arg4: memref<8x1xf32, #tpu.memory_space<vmem>>, %arg5: memref<8x1xf32, #tpu.memory_space<vmem>>, %arg6: memref<1x600xf32, #tpu.memory_space<vmem>>, %arg7: memref<1x8x600xf32, #tpu.memory_space<vmem>>, %arg8: memref<4x822xbf16, #tpu.memory_space<vmem>>, %arg9: memref<8x822xbf16, #tpu.memory_space<vmem>>) attributes {dimension_semantics = [#tpu.dimension_semantics<parallel>], iteration_bounds = array<i64: 2>, scalar_prefetch = 0 : i64, scratch_operands = 2 : i64, tpu.core_type = #tpu.core_type<tc>, window_params = [{transform_indices = @transform_0, window_bounds = array<i64: 1, 32, 600>}, {pipeline_mode = #tpu.pipeline_mode<synchronous>, transform_indices = @transform_1, window_bounds = array<i64: 27, 8, 4>}, {pipeline_mode = #tpu.pipeline_mode<synchronous>, transform_indices = @transform_2, window_bounds = array<i64: 27, 8, 8>}, {pipeline_mode = #tpu.pipeline_mode<synchronous>, transform_indices = @transform_3, window_bounds = array<i64: 8, 1>}, {pipeline_mode = #tpu.pipeline_mode<synchronous>, transform_indices = @transform_4, window_bounds = array<i64: 8, 1>}, {pipeline_mode = #tpu.pipeline_mode<synchronous>, transform_indices = @transform_5, window_bounds = array<i64: 1, 600>}, {transform_indices = @transform_6, window_bounds = array<i64: 1, 8, 600>}]} {
    %c0 = arith.constant 0 : index
    %c0_0 = arith.constant 0 : index
    %c0_1 = arith.constant 0 : index
    %0 = vector.load %arg1[%c0, %c0_0, %c0_1] : memref<1x32x600xbf16, #tpu.memory_space<vmem>>, vector<1x4x600xbf16>
    %1 = vector.shape_cast %0 : vector<1x4x600xbf16> to vector<4x600xbf16>
    %c0_2 = arith.constant 0 : index
    %c4 = arith.constant 4 : index
    %c0_3 = arith.constant 0 : index
    %2 = vector.load %arg1[%c0_2, %c4, %c0_3] : memref<1x32x600xbf16, #tpu.memory_space<vmem>>, vector<1x4x600xbf16>
    %3 = vector.shape_cast %2 : vector<1x4x600xbf16> to vector<4x600xbf16>
    %4 = arith.maximumf %1, %3 : vector<4x600xbf16>
    %c0_4 = arith.constant 0 : index
    %c8 = arith.constant 8 : index
    %c0_5 = arith.constant 0 : index
    %5 = vector.load %arg1[%c0_4, %c8, %c0_5] : memref<1x32x600xbf16, #tpu.memory_space<vmem>>, vector<1x4x600xbf16>
    %6 = vector.shape_cast %5 : vector<1x4x600xbf16> to vector<4x600xbf16>
    %7 = arith.maximumf %4, %6 : vector<4x600xbf16>
    %c0_6 = arith.constant 0 : index
    %c12 = arith.constant 12 : index
    %c0_7 = arith.constant 0 : index
    %8 = vector.load %arg1[%c0_6, %c12, %c0_7] : memref<1x32x600xbf16, #tpu.memory_space<vmem>>, vector<1x4x600xbf16>
    %9 = vector.shape_cast %8 : vector<1x4x600xbf16> to vector<4x600xbf16>
    %10 = arith.maximumf %7, %9 : vector<4x600xbf16>
    %c0_8 = arith.constant 0 : index
    %c16 = arith.constant 16 : index
    %c0_9 = arith.constant 0 : index
    %11 = vector.load %arg1[%c0_8, %c16, %c0_9] : memref<1x32x600xbf16, #tpu.memory_space<vmem>>, vector<1x4x600xbf16>
    %12 = vector.shape_cast %11 : vector<1x4x600xbf16> to vector<4x600xbf16>
    %13 = arith.maximumf %10, %12 : vector<4x600xbf16>
    %c0_10 = arith.constant 0 : index
    %c20 = arith.constant 20 : index
    %c0_11 = arith.constant 0 : index
    %14 = vector.load %arg1[%c0_10, %c20, %c0_11] : memref<1x32x600xbf16, #tpu.memory_space<vmem>>, vector<1x4x600xbf16>
    %15 = vector.shape_cast %14 : vector<1x4x600xbf16> to vector<4x600xbf16>
    %16 = arith.maximumf %13, %15 : vector<4x600xbf16>
    %c0_12 = arith.constant 0 : index
    %c24 = arith.constant 24 : index
    %c0_13 = arith.constant 0 : index
    %17 = vector.load %arg1[%c0_12, %c24, %c0_13] : memref<1x32x600xbf16, #tpu.memory_space<vmem>>, vector<1x4x600xbf16>
    %18 = vector.shape_cast %17 : vector<1x4x600xbf16> to vector<4x600xbf16>
    %19 = arith.maximumf %16, %18 : vector<4x600xbf16>
    %c0_14 = arith.constant 0 : index
    %c28 = arith.constant 28 : index
    %c0_15 = arith.constant 0 : index
    %20 = vector.load %arg1[%c0_14, %c28, %c0_15] : memref<1x32x600xbf16, #tpu.memory_space<vmem>>, vector<1x4x600xbf16>
    %21 = vector.shape_cast %20 : vector<1x4x600xbf16> to vector<4x600xbf16>
    %22 = arith.maximumf %19, %21 : vector<4x600xbf16>
    %cst = arith.constant 0.000000e+00 : bf16
    %23 = vector.broadcast %cst : bf16 to vector<4x111xbf16>
    %c0_16 = arith.constant 0 : index
    %c0_17 = arith.constant 0 : index
    %24 = vector.load %arg8[%c0_16, %c0_17] : memref<4x822xbf16, #tpu.memory_space<vmem>>, vector<4x111xbf16>
    tpu.vector_store %arg8[%c0_16, %c0_17], %23 {strides = array<i32>} : memref<4x822xbf16, #tpu.memory_space<vmem>>, vector<4x111xbf16>,
    %cst_18 = arith.constant 0.000000e+00 : bf16
    %25 = vector.broadcast %cst_18 : bf16 to vector<4x111xbf16>
    %c0_19 = arith.constant 0 : index
    %c711 = arith.constant 711 : index
    %26 = vector.load %arg8[%c0_19, %c711] : memref<4x822xbf16, #tpu.memory_space<vmem>>, vector<4x111xbf16>
    tpu.vector_store %arg8[%c0_19, %c711], %25 {strides = array<i32>} : memref<4x822xbf16, #tpu.memory_space<vmem>>, vector<4x111xbf16>,
    %c0_20 = arith.constant 0 : index
    %c111 = arith.constant 111 : index
    %27 = vector.load %arg8[%c0_20, %c111] : memref<4x822xbf16, #tpu.memory_space<vmem>>, vector<4x600xbf16>
    tpu.vector_store %arg8[%c0_20, %c111], %22 {strides = array<i32>} : memref<4x822xbf16, #tpu.memory_space<vmem>>, vector<4x600xbf16>,
    %cst_21 = arith.constant 0.000000e+00 : f32
    %28 = vector.broadcast %cst_21 : f32 to vector<8x600xf32>
    %c0_22 = arith.constant 0 : index
    %c0_23 = arith.constant 0 : index
    %c0_24 = arith.constant 0 : index
    %29 = vector.load %arg2[%c0_22, %c0_23, %c0_24] : memref<27x8x4xbf16, #tpu.memory_space<vmem>>, vector<1x8x4xbf16>
    %30 = vector.shape_cast %29 : vector<1x8x4xbf16> to vector<8x4xbf16>
    %c0_25 = arith.constant 0 : index
    %c0_26 = arith.constant 0 : index
    %31 = vector.load %arg8[%c0_25, %c0_26] : memref<4x822xbf16, #tpu.memory_space<vmem>>, vector<4x600xbf16>
    %cst_27 = arith.constant dense<0.000000e+00> : vector<8x600xf32>
    %32 = tpu.matmul %30, %31, %cst_27 {dimension_numbers = #tpu.dot_dimension_numbers<[1], [0], [0], [1], [0, 0, 1, 1], [], []>} : vector<8x4xbf16>, vector<4x600xbf16>, vector<8x600xf32> -> vector<8x600xf32>
    %33 = arith.addf %28, %32 : vector<8x600xf32>
    %c1 = arith.constant 1 : index
    %c0_28 = arith.constant 0 : index
    %c0_29 = arith.constant 0 : index
    %34 = vector.load %arg2[%c1, %c0_28, %c0_29] : memref<27x8x4xbf16, #tpu.memory_space<vmem>>, vector<1x8x4xbf16>
    %35 = vector.shape_cast %34 : vector<1x8x4xbf16> to vector<8x4xbf16>
    %c0_30 = arith.constant 0 : index
    %c1_31 = arith.constant 1 : index
    %36 = vector.load %arg8[%c0_30, %c1_31] : memref<4x822xbf16, #tpu.memory_space<vmem>>, vector<4x600xbf16>
    %cst_32 = arith.constant dense<0.000000e+00> : vector<8x600xf32>
    %37 = tpu.matmul %35, %36, %cst_32 {dimension_numbers = #tpu.dot_dimension_numbers<[1], [0], [0], [1], [0, 0, 1, 1], [], []>} : vector<8x4xbf16>, vector<4x600xbf16>, vector<8x600xf32> -> vector<8x600xf32>
    %38 = arith.addf %33, %37 : vector<8x600xf32>
    %c2 = arith.constant 2 : index
    %c0_33 = arith.constant 0 : index
    %c0_34 = arith.constant 0 : index
    %39 = vector.load %arg2[%c2, %c0_33, %c0_34] : memref<27x8x4xbf16, #tpu.memory_space<vmem>>, vector<1x8x4xbf16>
    %40 = vector.shape_cast %39 : vector<1x8x4xbf16> to vector<8x4xbf16>
    %c0_35 = arith.constant 0 : index
    %c2_36 = arith.constant 2 : index
    %41 = vector.load %arg8[%c0_35, %c2_36] : memref<4x822xbf16, #tpu.memory_space<vmem>>, vector<4x600xbf16>
    %cst_37 = arith.constant dense<0.000000e+00> : vector<8x600xf32>
    %42 = tpu.matmul %40, %41, %cst_37 {dimension_numbers = #tpu.dot_dimension_numbers<[1], [0], [0], [1], [0, 0, 1, 1], [], []>} : vector<8x4xbf16>, vector<4x600xbf16>, vector<8x600xf32> -> vector<8x600xf32>
    %43 = arith.addf %38, %42 : vector<8x600xf32>
    %c3 = arith.constant 3 : index
    %c0_38 = arith.constant 0 : index
    %c0_39 = arith.constant 0 : index
    %44 = vector.load %arg2[%c3, %c0_38, %c0_39] : memref<27x8x4xbf16, #tpu.memory_space<vmem>>, vector<1x8x4xbf16>
    %45 = vector.shape_cast %44 : vector<1x8x4xbf16> to vector<8x4xbf16>
    %c0_40 = arith.constant 0 : index
    %c10 = arith.constant 10 : index
    %46 = vector.load %arg8[%c0_40, %c10] : memref<4x822xbf16, #tpu.memory_space<vmem>>, vector<4x600xbf16>
    %cst_41 = arith.constant dense<0.000000e+00> : vector<8x600xf32>
    %47 = tpu.matmul %45, %46, %cst_41 {dimension_numbers = #tpu.dot_dimension_numbers<[1], [0], [0], [1], [0, 0, 1, 1], [], []>} : vector<8x4xbf16>, vector<4x600xbf16>, vector<8x600xf32> -> vector<8x600xf32>
    %48 = arith.addf %43, %47 : vector<8x600xf32>
    %c4_42 = arith.constant 4 : index
    %c0_43 = arith.constant 0 : index
    %c0_44 = arith.constant 0 : index
    %49 = vector.load %arg2[%c4_42, %c0_43, %c0_44] : memref<27x8x4xbf16, #tpu.memory_space<vmem>>, vector<1x8x4xbf16>
    %50 = vector.shape_cast %49 : vector<1x8x4xbf16> to vector<8x4xbf16>
    %c0_45 = arith.constant 0 : index
    %c11 = arith.constant 11 : index
    %51 = vector.load %arg8[%c0_45, %c11] : memref<4x822xbf16, #tpu.memory_space<vmem>>, vector<4x600xbf16>
    %cst_46 = arith.constant dense<0.000000e+00> : vector<8x600xf32>
    %52 = tpu.matmul %50, %51, %cst_46 {dimension_numbers = #tpu.dot_dimension_numbers<[1], [0], [0], [1], [0, 0, 1, 1], [], []>} : vector<8x4xbf16>, vector<4x600xbf16>, vector<8x600xf32> -> vector<8x600xf32>
    %53 = arith.addf %48, %52 : vector<8x600xf32>
    %c5 = arith.constant 5 : index
    %c0_47 = arith.constant 0 : index
    %c0_48 = arith.constant 0 : index
    %54 = vector.load %arg2[%c5, %c0_47, %c0_48] : memref<27x8x4xbf16, #tpu.memory_space<vmem>>, vector<1x8x4xbf16>
    %55 = vector.shape_cast %54 : vector<1x8x4xbf16> to vector<8x4xbf16>
    %c0_49 = arith.constant 0 : index
    %c12_50 = arith.constant 12 : index
    %56 = vector.load %arg8[%c0_49, %c12_50] : memref<4x822xbf16, #tpu.memory_space<vmem>>, vector<4x600xbf16>
    %cst_51 = arith.constant dense<0.000000e+00> : vector<8x600xf32>
    %57 = tpu.matmul %55, %56, %cst_51 {dimension_numbers = #tpu.dot_dimension_numbers<[1], [0], [0], [1], [0, 0, 1, 1], [], []>} : vector<8x4xbf16>, vector<4x600xbf16>, vector<8x600xf32> -> vector<8x600xf32>
    %58 = arith.addf %53, %57 : vector<8x600xf32>
    %c6 = arith.constant 6 : index
    %c0_52 = arith.constant 0 : index
    %c0_53 = arith.constant 0 : index
    %59 = vector.load %arg2[%c6, %c0_52, %c0_53] : memref<27x8x4xbf16, #tpu.memory_space<vmem>>, vector<1x8x4xbf16>
    %60 = vector.shape_cast %59 : vector<1x8x4xbf16> to vector<8x4xbf16>
    %c0_54 = arith.constant 0 : index
    %c20_55 = arith.constant 20 : index
    %61 = vector.load %arg8[%c0_54, %c20_55] : memref<4x822xbf16, #tpu.memory_space<vmem>>, vector<4x600xbf16>
    %cst_56 = arith.constant dense<0.000000e+00> : vector<8x600xf32>
    %62 = tpu.matmul %60, %61, %cst_56 {dimension_numbers = #tpu.dot_dimension_numbers<[1], [0], [0], [1], [0, 0, 1, 1], [], []>} : vector<8x4xbf16>, vector<4x600xbf16>, vector<8x600xf32> -> vector<8x600xf32>
    %63 = arith.addf %58, %62 : vector<8x600xf32>
    %c7 = arith.constant 7 : index
    %c0_57 = arith.constant 0 : index
    %c0_58 = arith.constant 0 : index
    %64 = vector.load %arg2[%c7, %c0_57, %c0_58] : memref<27x8x4xbf16, #tpu.memory_space<vmem>>, vector<1x8x4xbf16>
    %65 = vector.shape_cast %64 : vector<1x8x4xbf16> to vector<8x4xbf16>
    %c0_59 = arith.constant 0 : index
    %c21 = arith.constant 21 : index
    %66 = vector.load %arg8[%c0_59, %c21] : memref<4x822xbf16, #tpu.memory_space<vmem>>, vector<4x600xbf16>
    %cst_60 = arith.constant dense<0.000000e+00> : vector<8x600xf32>
    %67 = tpu.matmul %65, %66, %cst_60 {dimension_numbers = #tpu.dot_dimension_numbers<[1], [0], [0], [1], [0, 0, 1, 1], [], []>} : vector<8x4xbf16>, vector<4x600xbf16>, vector<8x600xf32> -> vector<8x600xf32>
    %68 = arith.addf %63, %67 : vector<8x600xf32>
    %c8_61 = arith.constant 8 : index
    %c0_62 = arith.constant 0 : index
    %c0_63 = arith.constant 0 : index
    %69 = vector.load %arg2[%c8_61, %c0_62, %c0_63] : memref<27x8x4xbf16, #tpu.memory_space<vmem>>, vector<1x8x4xbf16>
    %70 = vector.shape_cast %69 : vector<1x8x4xbf16> to vector<8x4xbf16>
    %c0_64 = arith.constant 0 : index
    %c22 = arith.constant 22 : index
    %71 = vector.load %arg8[%c0_64, %c22] : memref<4x822xbf16, #tpu.memory_space<vmem>>, vector<4x600xbf16>
    %cst_65 = arith.constant dense<0.000000e+00> : vector<8x600xf32>
    %72 = tpu.matmul %70, %71, %cst_65 {dimension_numbers = #tpu.dot_dimension_numbers<[1], [0], [0], [1], [0, 0, 1, 1], [], []>} : vector<8x4xbf16>, vector<4x600xbf16>, vector<8x600xf32> -> vector<8x600xf32>
    %73 = arith.addf %68, %72 : vector<8x600xf32>
    %c9 = arith.constant 9 : index
    %c0_66 = arith.constant 0 : index
    %c0_67 = arith.constant 0 : index
    %74 = vector.load %arg2[%c9, %c0_66, %c0_67] : memref<27x8x4xbf16, #tpu.memory_space<vmem>>, vector<1x8x4xbf16>
    %75 = vector.shape_cast %74 : vector<1x8x4xbf16> to vector<8x4xbf16>
    %c0_68 = arith.constant 0 : index
    %c100 = arith.constant 100 : index
    %76 = vector.load %arg8[%c0_68, %c100] : memref<4x822xbf16, #tpu.memory_space<vmem>>, vector<4x600xbf16>
    %cst_69 = arith.constant dense<0.000000e+00> : vector<8x600xf32>
    %77 = tpu.matmul %75, %76, %cst_69 {dimension_numbers = #tpu.dot_dimension_numbers<[1], [0], [0], [1], [0, 0, 1, 1], [], []>} : vector<8x4xbf16>, vector<4x600xbf16>, vector<8x600xf32> -> vector<8x600xf32>
    %78 = arith.addf %73, %77 : vector<8x600xf32>
    %c10_70 = arith.constant 10 : index
    %c0_71 = arith.constant 0 : index
    %c0_72 = arith.constant 0 : index
    %79 = vector.load %arg2[%c10_70, %c0_71, %c0_72] : memref<27x8x4xbf16, #tpu.memory_space<vmem>>, vector<1x8x4xbf16>
    %80 = vector.shape_cast %79 : vector<1x8x4xbf16> to vector<8x4xbf16>
    %c0_73 = arith.constant 0 : index
    %c101 = arith.constant 101 : index
    %81 = vector.load %arg8[%c0_73, %c101] : memref<4x822xbf16, #tpu.memory_space<vmem>>, vector<4x600xbf16>
    %cst_74 = arith.constant dense<0.000000e+00> : vector<8x600xf32>
    %82 = tpu.matmul %80, %81, %cst_74 {dimension_numbers = #tpu.dot_dimension_numbers<[1], [0], [0], [1], [0, 0, 1, 1], [], []>} : vector<8x4xbf16>, vector<4x600xbf16>, vector<8x600xf32> -> vector<8x600xf32>
    %83 = arith.addf %78, %82 : vector<8x600xf32>
    %c11_75 = arith.constant 11 : index
    %c0_76 = arith.constant 0 : index
    %c0_77 = arith.constant 0 : index
    %84 = vector.load %arg2[%c11_75, %c0_76, %c0_77] : memref<27x8x4xbf16, #tpu.memory_space<vmem>>, vector<1x8x4xbf16>
    %85 = vector.shape_cast %84 : vector<1x8x4xbf16> to vector<8x4xbf16>
    %c0_78 = arith.constant 0 : index
    %c102 = arith.constant 102 : index
    %86 = vector.load %arg8[%c0_78, %c102] : memref<4x822xbf16, #tpu.memory_space<vmem>>, vector<4x600xbf16>
    %cst_79 = arith.constant dense<0.000000e+00> : vector<8x600xf32>
    %87 = tpu.matmul %85, %86, %cst_79 {dimension_numbers = #tpu.dot_dimension_numbers<[1], [0], [0], [1], [0, 0, 1, 1], [], []>} : vector<8x4xbf16>, vector<4x600xbf16>, vector<8x600xf32> -> vector<8x600xf32>
    %88 = arith.addf %83, %87 : vector<8x600xf32>
    %c12_80 = arith.constant 12 : index
    %c0_81 = arith.constant 0 : index
    %c0_82 = arith.constant 0 : index
    %89 = vector.load %arg2[%c12_80, %c0_81, %c0_82] : memref<27x8x4xbf16, #tpu.memory_space<vmem>>, vector<1x8x4xbf16>
    %90 = vector.shape_cast %89 : vector<1x8x4xbf16> to vector<8x4xbf16>
    %c0_83 = arith.constant 0 : index
    %c110 = arith.constant 110 : index
    %91 = vector.load %arg8[%c0_83, %c110] : memref<4x822xbf16, #tpu.memory_space<vmem>>, vector<4x600xbf16>
    %cst_84 = arith.constant dense<0.000000e+00> : vector<8x600xf32>
    %92 = tpu.matmul %90, %91, %cst_84 {dimension_numbers = #tpu.dot_dimension_numbers<[1], [0], [0], [1], [0, 0, 1, 1], [], []>} : vector<8x4xbf16>, vector<4x600xbf16>, vector<8x600xf32> -> vector<8x600xf32>
    %93 = arith.addf %88, %92 : vector<8x600xf32>
    %c13 = arith.constant 13 : index
    %c0_85 = arith.constant 0 : index
    %c0_86 = arith.constant 0 : index
    %94 = vector.load %arg2[%c13, %c0_85, %c0_86] : memref<27x8x4xbf16, #tpu.memory_space<vmem>>, vector<1x8x4xbf16>
    %95 = vector.shape_cast %94 : vector<1x8x4xbf16> to vector<8x4xbf16>
    %c0_87 = arith.constant 0 : index
    %c111_88 = arith.constant 111 : index
    %96 = vector.load %arg8[%c0_87, %c111_88] : memref<4x822xbf16, #tpu.memory_space<vmem>>, vector<4x600xbf16>
    %cst_89 = arith.constant dense<0.000000e+00> : vector<8x600xf32>
    %97 = tpu.matmul %95, %96, %cst_89 {dimension_numbers = #tpu.dot_dimension_numbers<[1], [0], [0], [1], [0, 0, 1, 1], [], []>} : vector<8x4xbf16>, vector<4x600xbf16>, vector<8x600xf32> -> vector<8x600xf32>
    %98 = arith.addf %93, %97 : vector<8x600xf32>
    %c14 = arith.constant 14 : index
    %c0_90 = arith.constant 0 : index
    %c0_91 = arith.constant 0 : index
    %99 = vector.load %arg2[%c14, %c0_90, %c0_91] : memref<27x8x4xbf16, #tpu.memory_space<vmem>>, vector<1x8x4xbf16>
    %100 = vector.shape_cast %99 : vector<1x8x4xbf16> to vector<8x4xbf16>
    %c0_92 = arith.constant 0 : index
    %c112 = arith.constant 112 : index
    %101 = vector.load %arg8[%c0_92, %c112] : memref<4x822xbf16, #tpu.memory_space<vmem>>, vector<4x600xbf16>
    %cst_93 = arith.constant dense<0.000000e+00> : vector<8x600xf32>
    %102 = tpu.matmul %100, %101, %cst_93 {dimension_numbers = #tpu.dot_dimension_numbers<[1], [0], [0], [1], [0, 0, 1, 1], [], []>} : vector<8x4xbf16>, vector<4x600xbf16>, vector<8x600xf32> -> vector<8x600xf32>
    %103 = arith.addf %98, %102 : vector<8x600xf32>
    %c15 = arith.constant 15 : index
    %c0_94 = arith.constant 0 : index
    %c0_95 = arith.constant 0 : index
    %104 = vector.load %arg2[%c15, %c0_94, %c0_95] : memref<27x8x4xbf16, #tpu.memory_space<vmem>>, vector<1x8x4xbf16>
    %105 = vector.shape_cast %104 : vector<1x8x4xbf16> to vector<8x4xbf16>
    %c0_96 = arith.constant 0 : index
    %c120 = arith.constant 120 : index
    %106 = vector.load %arg8[%c0_96, %c120] : memref<4x822xbf16, #tpu.memory_space<vmem>>, vector<4x600xbf16>
    %cst_97 = arith.constant dense<0.000000e+00> : vector<8x600xf32>
    %107 = tpu.matmul %105, %106, %cst_97 {dimension_numbers = #tpu.dot_dimension_numbers<[1], [0], [0], [1], [0, 0, 1, 1], [], []>} : vector<8x4xbf16>, vector<4x600xbf16>, vector<8x600xf32> -> vector<8x600xf32>
    %108 = arith.addf %103, %107 : vector<8x600xf32>
    %c16_98 = arith.constant 16 : index
    %c0_99 = arith.constant 0 : index
    %c0_100 = arith.constant 0 : index
    %109 = vector.load %arg2[%c16_98, %c0_99, %c0_100] : memref<27x8x4xbf16, #tpu.memory_space<vmem>>, vector<1x8x4xbf16>
    %110 = vector.shape_cast %109 : vector<1x8x4xbf16> to vector<8x4xbf16>
    %c0_101 = arith.constant 0 : index
    %c121 = arith.constant 121 : index
    %111 = vector.load %arg8[%c0_101, %c121] : memref<4x822xbf16, #tpu.memory_space<vmem>>, vector<4x600xbf16>
    %cst_102 = arith.constant dense<0.000000e+00> : vector<8x600xf32>
    %112 = tpu.matmul %110, %111, %cst_102 {dimension_numbers = #tpu.dot_dimension_numbers<[1], [0], [0], [1], [0, 0, 1, 1], [], []>} : vector<8x4xbf16>, vector<4x600xbf16>, vector<8x600xf32> -> vector<8x600xf32>
    %113 = arith.addf %108, %112 : vector<8x600xf32>
    %c17 = arith.constant 17 : index
    %c0_103 = arith.constant 0 : index
    %c0_104 = arith.constant 0 : index
    %114 = vector.load %arg2[%c17, %c0_103, %c0_104] : memref<27x8x4xbf16, #tpu.memory_space<vmem>>, vector<1x8x4xbf16>
    %115 = vector.shape_cast %114 : vector<1x8x4xbf16> to vector<8x4xbf16>
    %c0_105 = arith.constant 0 : index
    %c122 = arith.constant 122 : index
    %116 = vector.load %arg8[%c0_105, %c122] : memref<4x822xbf16, #tpu.memory_space<vmem>>, vector<4x600xbf16>
    %cst_106 = arith.constant dense<0.000000e+00> : vector<8x600xf32>
    %117 = tpu.matmul %115, %116, %cst_106 {dimension_numbers = #tpu.dot_dimension_numbers<[1], [0], [0], [1], [0, 0, 1, 1], [], []>} : vector<8x4xbf16>, vector<4x600xbf16>, vector<8x600xf32> -> vector<8x600xf32>
    %118 = arith.addf %113, %117 : vector<8x600xf32>
    %c18 = arith.constant 18 : index
    %c0_107 = arith.constant 0 : index
    %c0_108 = arith.constant 0 : index
    %119 = vector.load %arg2[%c18, %c0_107, %c0_108] : memref<27x8x4xbf16, #tpu.memory_space<vmem>>, vector<1x8x4xbf16>
    %120 = vector.shape_cast %119 : vector<1x8x4xbf16> to vector<8x4xbf16>
    %c0_109 = arith.constant 0 : index
    %c200 = arith.constant 200 : index
    %121 = vector.load %arg8[%c0_109, %c200] : memref<4x822xbf16, #tpu.memory_space<vmem>>, vector<4x600xbf16>
    %cst_110 = arith.constant dense<0.000000e+00> : vector<8x600xf32>
    %122 = tpu.matmul %120, %121, %cst_110 {dimension_numbers = #tpu.dot_dimension_numbers<[1], [0], [0], [1], [0, 0, 1, 1], [], []>} : vector<8x4xbf16>, vector<4x600xbf16>, vector<8x600xf32> -> vector<8x600xf32>
    %123 = arith.addf %118, %122 : vector<8x600xf32>
    %c19 = arith.constant 19 : index
    %c0_111 = arith.constant 0 : index
    %c0_112 = arith.constant 0 : index
    %124 = vector.load %arg2[%c19, %c0_111, %c0_112] : memref<27x8x4xbf16, #tpu.memory_space<vmem>>, vector<1x8x4xbf16>
    %125 = vector.shape_cast %124 : vector<1x8x4xbf16> to vector<8x4xbf16>
    %c0_113 = arith.constant 0 : index
    %c201 = arith.constant 201 : index
    %126 = vector.load %arg8[%c0_113, %c201] : memref<4x822xbf16, #tpu.memory_space<vmem>>, vector<4x600xbf16>
    %cst_114 = arith.constant dense<0.000000e+00> : vector<8x600xf32>
    %127 = tpu.matmul %125, %126, %cst_114 {dimension_numbers = #tpu.dot_dimension_numbers<[1], [0], [0], [1], [0, 0, 1, 1], [], []>} : vector<8x4xbf16>, vector<4x600xbf16>, vector<8x600xf32> -> vector<8x600xf32>
    %128 = arith.addf %123, %127 : vector<8x600xf32>
    %c20_115 = arith.constant 20 : index
    %c0_116 = arith.constant 0 : index
    %c0_117 = arith.constant 0 : index
    %129 = vector.load %arg2[%c20_115, %c0_116, %c0_117] : memref<27x8x4xbf16, #tpu.memory_space<vmem>>, vector<1x8x4xbf16>
    %130 = vector.shape_cast %129 : vector<1x8x4xbf16> to vector<8x4xbf16>
    %c0_118 = arith.constant 0 : index
    %c202 = arith.constant 202 : index
    %131 = vector.load %arg8[%c0_118, %c202] : memref<4x822xbf16, #tpu.memory_space<vmem>>, vector<4x600xbf16>
    %cst_119 = arith.constant dense<0.000000e+00> : vector<8x600xf32>
    %132 = tpu.matmul %130, %131, %cst_119 {dimension_numbers = #tpu.dot_dimension_numbers<[1], [0], [0], [1], [0, 0, 1, 1], [], []>} : vector<8x4xbf16>, vector<4x600xbf16>, vector<8x600xf32> -> vector<8x600xf32>
    %133 = arith.addf %128, %132 : vector<8x600xf32>
    %c21_120 = arith.constant 21 : index
    %c0_121 = arith.constant 0 : index
    %c0_122 = arith.constant 0 : index
    %134 = vector.load %arg2[%c21_120, %c0_121, %c0_122] : memref<27x8x4xbf16, #tpu.memory_space<vmem>>, vector<1x8x4xbf16>
    %135 = vector.shape_cast %134 : vector<1x8x4xbf16> to vector<8x4xbf16>
    %c0_123 = arith.constant 0 : index
    %c210 = arith.constant 210 : index
    %136 = vector.load %arg8[%c0_123, %c210] : memref<4x822xbf16, #tpu.memory_space<vmem>>, vector<4x600xbf16>
    %cst_124 = arith.constant dense<0.000000e+00> : vector<8x600xf32>
    %137 = tpu.matmul %135, %136, %cst_124 {dimension_numbers = #tpu.dot_dimension_numbers<[1], [0], [0], [1], [0, 0, 1, 1], [], []>} : vector<8x4xbf16>, vector<4x600xbf16>, vector<8x600xf32> -> vector<8x600xf32>
    %138 = arith.addf %133, %137 : vector<8x600xf32>
    %c22_125 = arith.constant 22 : index
    %c0_126 = arith.constant 0 : index
    %c0_127 = arith.constant 0 : index
    %139 = vector.load %arg2[%c22_125, %c0_126, %c0_127] : memref<27x8x4xbf16, #tpu.memory_space<vmem>>, vector<1x8x4xbf16>
    %140 = vector.shape_cast %139 : vector<1x8x4xbf16> to vector<8x4xbf16>
    %c0_128 = arith.constant 0 : index
    %c211 = arith.constant 211 : index
    %141 = vector.load %arg8[%c0_128, %c211] : memref<4x822xbf16, #tpu.memory_space<vmem>>, vector<4x600xbf16>
    %cst_129 = arith.constant dense<0.000000e+00> : vector<8x600xf32>
    %142 = tpu.matmul %140, %141, %cst_129 {dimension_numbers = #tpu.dot_dimension_numbers<[1], [0], [0], [1], [0, 0, 1, 1], [], []>} : vector<8x4xbf16>, vector<4x600xbf16>, vector<8x600xf32> -> vector<8x600xf32>
    %143 = arith.addf %138, %142 : vector<8x600xf32>
    %c23 = arith.constant 23 : index
    %c0_130 = arith.constant 0 : index
    %c0_131 = arith.constant 0 : index
    %144 = vector.load %arg2[%c23, %c0_130, %c0_131] : memref<27x8x4xbf16, #tpu.memory_space<vmem>>, vector<1x8x4xbf16>
    %145 = vector.shape_cast %144 : vector<1x8x4xbf16> to vector<8x4xbf16>
    %c0_132 = arith.constant 0 : index
    %c212 = arith.constant 212 : index
    %146 = vector.load %arg8[%c0_132, %c212] : memref<4x822xbf16, #tpu.memory_space<vmem>>, vector<4x600xbf16>
    %cst_133 = arith.constant dense<0.000000e+00> : vector<8x600xf32>
    %147 = tpu.matmul %145, %146, %cst_133 {dimension_numbers = #tpu.dot_dimension_numbers<[1], [0], [0], [1], [0, 0, 1, 1], [], []>} : vector<8x4xbf16>, vector<4x600xbf16>, vector<8x600xf32> -> vector<8x600xf32>
    %148 = arith.addf %143, %147 : vector<8x600xf32>
    %c24_134 = arith.constant 24 : index
    %c0_135 = arith.constant 0 : index
    %c0_136 = arith.constant 0 : index
    %149 = vector.load %arg2[%c24_134, %c0_135, %c0_136] : memref<27x8x4xbf16, #tpu.memory_space<vmem>>, vector<1x8x4xbf16>
    %150 = vector.shape_cast %149 : vector<1x8x4xbf16> to vector<8x4xbf16>
    %c0_137 = arith.constant 0 : index
    %c220 = arith.constant 220 : index
    %151 = vector.load %arg8[%c0_137, %c220] : memref<4x822xbf16, #tpu.memory_space<vmem>>, vector<4x600xbf16>
    %cst_138 = arith.constant dense<0.000000e+00> : vector<8x600xf32>
    %152 = tpu.matmul %150, %151, %cst_138 {dimension_numbers = #tpu.dot_dimension_numbers<[1], [0], [0], [1], [0, 0, 1, 1], [], []>} : vector<8x4xbf16>, vector<4x600xbf16>, vector<8x600xf32> -> vector<8x600xf32>
    %153 = arith.addf %148, %152 : vector<8x600xf32>
    %c25 = arith.constant 25 : index
    %c0_139 = arith.constant 0 : index
    %c0_140 = arith.constant 0 : index
    %154 = vector.load %arg2[%c25, %c0_139, %c0_140] : memref<27x8x4xbf16, #tpu.memory_space<vmem>>, vector<1x8x4xbf16>
    %155 = vector.shape_cast %154 : vector<1x8x4xbf16> to vector<8x4xbf16>
    %c0_141 = arith.constant 0 : index
    %c221 = arith.constant 221 : index
    %156 = vector.load %arg8[%c0_141, %c221] : memref<4x822xbf16, #tpu.memory_space<vmem>>, vector<4x600xbf16>
    %cst_142 = arith.constant dense<0.000000e+00> : vector<8x600xf32>
    %157 = tpu.matmul %155, %156, %cst_142 {dimension_numbers = #tpu.dot_dimension_numbers<[1], [0], [0], [1], [0, 0, 1, 1], [], []>} : vector<8x4xbf16>, vector<4x600xbf16>, vector<8x600xf32> -> vector<8x600xf32>
    %158 = arith.addf %153, %157 : vector<8x600xf32>
    %c26 = arith.constant 26 : index
    %c0_143 = arith.constant 0 : index
    %c0_144 = arith.constant 0 : index
    %159 = vector.load %arg2[%c26, %c0_143, %c0_144] : memref<27x8x4xbf16, #tpu.memory_space<vmem>>, vector<1x8x4xbf16>
    %160 = vector.shape_cast %159 : vector<1x8x4xbf16> to vector<8x4xbf16>
    %c0_145 = arith.constant 0 : index
    %c222 = arith.constant 222 : index
    %161 = vector.load %arg8[%c0_145, %c222] : memref<4x822xbf16, #tpu.memory_space<vmem>>, vector<4x600xbf16>
    %cst_146 = arith.constant dense<0.000000e+00> : vector<8x600xf32>
    %162 = tpu.matmul %160, %161, %cst_146 {dimension_numbers = #tpu.dot_dimension_numbers<[1], [0], [0], [1], [0, 0, 1, 1], [], []>} : vector<8x4xbf16>, vector<4x600xbf16>, vector<8x600xf32> -> vector<8x600xf32>
    %163 = arith.addf %158, %162 : vector<8x600xf32>
    %c0_147 = arith.constant 0 : index
    %c0_148 = arith.constant 0 : index
    %164 = vector.load %arg4[%c0_147, %c0_148] : memref<8x1xf32, #tpu.memory_space<vmem>>, vector<8x1xf32>
    %165 = vector.broadcast %164 : vector<8x1xf32> to vector<8x600xf32>
    %166 = arith.addf %163, %165 : vector<8x600xf32>
    %cst_149 = arith.constant 0.000000e+00 : f32
    %167 = vector.broadcast %cst_149 : f32 to vector<8x600xf32>
    %168 = arith.maximumf %166, %167 : vector<8x600xf32>
    %c0_150 = arith.constant 0 : index
    %c0_151 = arith.constant 0 : index
    %169 = vector.load %arg6[%c0_150, %c0_151] : memref<1x600xf32, #tpu.memory_space<vmem>>, vector<1x600xf32>
    %170 = vector.broadcast %169 : vector<1x600xf32> to vector<8x600xf32>
    %171 = arith.mulf %168, %170 : vector<8x600xf32>
    %172 = arith.truncf %171 : vector<8x600xf32> to vector<8x600xbf16>
    %cst_152 = arith.constant 0.000000e+00 : bf16
    %173 = vector.broadcast %cst_152 : bf16 to vector<8x111xbf16>
    %c0_153 = arith.constant 0 : index
    %c0_154 = arith.constant 0 : index
    %174 = vector.load %arg9[%c0_153, %c0_154] : memref<8x822xbf16, #tpu.memory_space<vmem>>, vector<8x111xbf16>
    tpu.vector_store %arg9[%c0_153, %c0_154], %173 {strides = array<i32>} : memref<8x822xbf16, #tpu.memory_space<vmem>>, vector<8x111xbf16>,
    %cst_155 = arith.constant 0.000000e+00 : bf16
    %175 = vector.broadcast %cst_155 : bf16 to vector<8x111xbf16>
    %c0_156 = arith.constant 0 : index
    %c711_157 = arith.constant 711 : index
    %176 = vector.load %arg9[%c0_156, %c711_157] : memref<8x822xbf16, #tpu.memory_space<vmem>>, vector<8x111xbf16>
    tpu.vector_store %arg9[%c0_156, %c711_157], %175 {strides = array<i32>} : memref<8x822xbf16, #tpu.memory_space<vmem>>, vector<8x111xbf16>,
    %c0_158 = arith.constant 0 : index
    %c111_159 = arith.constant 111 : index
    %177 = vector.load %arg9[%c0_158, %c111_159] : memref<8x822xbf16, #tpu.memory_space<vmem>>, vector<8x600xbf16>
    tpu.vector_store %arg9[%c0_158, %c111_159], %172 {strides = array<i32>} : memref<8x822xbf16, #tpu.memory_space<vmem>>, vector<8x600xbf16>,
    %cst_160 = arith.constant 0.000000e+00 : f32
    %178 = vector.broadcast %cst_160 : f32 to vector<8x600xf32>
    %c0_161 = arith.constant 0 : index
    %c0_162 = arith.constant 0 : index
    %c0_163 = arith.constant 0 : index
    %179 = vector.load %arg3[%c0_161, %c0_162, %c0_163] : memref<27x8x8xbf16, #tpu.memory_space<vmem>>, vector<1x8x8xbf16>
    %180 = vector.shape_cast %179 : vector<1x8x8xbf16> to vector<8x8xbf16>
    %c0_164 = arith.constant 0 : index
    %c0_165 = arith.constant 0 : index
    %181 = vector.load %arg9[%c0_164, %c0_165] : memref<8x822xbf16, #tpu.memory_space<vmem>>, vector<8x600xbf16>
    %cst_166 = arith.constant dense<0.000000e+00> : vector<8x600xf32>
    %182 = tpu.matmul %180, %181, %cst_166 {dimension_numbers = #tpu.dot_dimension_numbers<[1], [0], [0], [1], [0, 0, 1, 1], [], []>} : vector<8x8xbf16>, vector<8x600xbf16>, vector<8x600xf32> -> vector<8x600xf32>
    %183 = arith.addf %178, %182 : vector<8x600xf32>
    %c1_167 = arith.constant 1 : index
    %c0_168 = arith.constant 0 : index
    %c0_169 = arith.constant 0 : index
    %184 = vector.load %arg3[%c1_167, %c0_168, %c0_169] : memref<27x8x8xbf16, #tpu.memory_space<vmem>>, vector<1x8x8xbf16>
    %185 = vector.shape_cast %184 : vector<1x8x8xbf16> to vector<8x8xbf16>
    %c0_170 = arith.constant 0 : index
    %c1_171 = arith.constant 1 : index
    %186 = vector.load %arg9[%c0_170, %c1_171] : memref<8x822xbf16, #tpu.memory_space<vmem>>, vector<8x600xbf16>
    %cst_172 = arith.constant dense<0.000000e+00> : vector<8x600xf32>
    %187 = tpu.matmul %185, %186, %cst_172 {dimension_numbers = #tpu.dot_dimension_numbers<[1], [0], [0], [1], [0, 0, 1, 1], [], []>} : vector<8x8xbf16>, vector<8x600xbf16>, vector<8x600xf32> -> vector<8x600xf32>
    %188 = arith.addf %183, %187 : vector<8x600xf32>
    %c2_173 = arith.constant 2 : index
    %c0_174 = arith.constant 0 : index
    %c0_175 = arith.constant 0 : index
    %189 = vector.load %arg3[%c2_173, %c0_174, %c0_175] : memref<27x8x8xbf16, #tpu.memory_space<vmem>>, vector<1x8x8xbf16>
    %190 = vector.shape_cast %189 : vector<1x8x8xbf16> to vector<8x8xbf16>
    %c0_176 = arith.constant 0 : index
    %c2_177 = arith.constant 2 : index
    %191 = vector.load %arg9[%c0_176, %c2_177] : memref<8x822xbf16, #tpu.memory_space<vmem>>, vector<8x600xbf16>
    %cst_178 = arith.constant dense<0.000000e+00> : vector<8x600xf32>
    %192 = tpu.matmul %190, %191, %cst_178 {dimension_numbers = #tpu.dot_dimension_numbers<[1], [0], [0], [1], [0, 0, 1, 1], [], []>} : vector<8x8xbf16>, vector<8x600xbf16>, vector<8x600xf32> -> vector<8x600xf32>
    %193 = arith.addf %188, %192 : vector<8x600xf32>
    %c3_179 = arith.constant 3 : index
    %c0_180 = arith.constant 0 : index
    %c0_181 = arith.constant 0 : index
    %194 = vector.load %arg3[%c3_179, %c0_180, %c0_181] : memref<27x8x8xbf16, #tpu.memory_space<vmem>>, vector<1x8x8xbf16>
    %195 = vector.shape_cast %194 : vector<1x8x8xbf16> to vector<8x8xbf16>
    %c0_182 = arith.constant 0 : index
    %c10_183 = arith.constant 10 : index
    %196 = vector.load %arg9[%c0_182, %c10_183] : memref<8x822xbf16, #tpu.memory_space<vmem>>, vector<8x600xbf16>
    %cst_184 = arith.constant dense<0.000000e+00> : vector<8x600xf32>
    %197 = tpu.matmul %195, %196, %cst_184 {dimension_numbers = #tpu.dot_dimension_numbers<[1], [0], [0], [1], [0, 0, 1, 1], [], []>} : vector<8x8xbf16>, vector<8x600xbf16>, vector<8x600xf32> -> vector<8x600xf32>
    %198 = arith.addf %193, %197 : vector<8x600xf32>
    %c4_185 = arith.constant 4 : index
    %c0_186 = arith.constant 0 : index
    %c0_187 = arith.constant 0 : index
    %199 = vector.load %arg3[%c4_185, %c0_186, %c0_187] : memref<27x8x8xbf16, #tpu.memory_space<vmem>>, vector<1x8x8xbf16>
    %200 = vector.shape_cast %199 : vector<1x8x8xbf16> to vector<8x8xbf16>
    %c0_188 = arith.constant 0 : index
    %c11_189 = arith.constant 11 : index
    %201 = vector.load %arg9[%c0_188, %c11_189] : memref<8x822xbf16, #tpu.memory_space<vmem>>, vector<8x600xbf16>
    %cst_190 = arith.constant dense<0.000000e+00> : vector<8x600xf32>
    %202 = tpu.matmul %200, %201, %cst_190 {dimension_numbers = #tpu.dot_dimension_numbers<[1], [0], [0], [1], [0, 0, 1, 1], [], []>} : vector<8x8xbf16>, vector<8x600xbf16>, vector<8x600xf32> -> vector<8x600xf32>
    %203 = arith.addf %198, %202 : vector<8x600xf32>
    %c5_191 = arith.constant 5 : index
    %c0_192 = arith.constant 0 : index
    %c0_193 = arith.constant 0 : index
    %204 = vector.load %arg3[%c5_191, %c0_192, %c0_193] : memref<27x8x8xbf16, #tpu.memory_space<vmem>>, vector<1x8x8xbf16>
    %205 = vector.shape_cast %204 : vector<1x8x8xbf16> to vector<8x8xbf16>
    %c0_194 = arith.constant 0 : index
    %c12_195 = arith.constant 12 : index
    %206 = vector.load %arg9[%c0_194, %c12_195] : memref<8x822xbf16, #tpu.memory_space<vmem>>, vector<8x600xbf16>
    %cst_196 = arith.constant dense<0.000000e+00> : vector<8x600xf32>
    %207 = tpu.matmul %205, %206, %cst_196 {dimension_numbers = #tpu.dot_dimension_numbers<[1], [0], [0], [1], [0, 0, 1, 1], [], []>} : vector<8x8xbf16>, vector<8x600xbf16>, vector<8x600xf32> -> vector<8x600xf32>
    %208 = arith.addf %203, %207 : vector<8x600xf32>
    %c6_197 = arith.constant 6 : index
    %c0_198 = arith.constant 0 : index
    %c0_199 = arith.constant 0 : index
    %209 = vector.load %arg3[%c6_197, %c0_198, %c0_199] : memref<27x8x8xbf16, #tpu.memory_space<vmem>>, vector<1x8x8xbf16>
    %210 = vector.shape_cast %209 : vector<1x8x8xbf16> to vector<8x8xbf16>
    %c0_200 = arith.constant 0 : index
    %c20_201 = arith.constant 20 : index
    %211 = vector.load %arg9[%c0_200, %c20_201] : memref<8x822xbf16, #tpu.memory_space<vmem>>, vector<8x600xbf16>
    %cst_202 = arith.constant dense<0.000000e+00> : vector<8x600xf32>
    %212 = tpu.matmul %210, %211, %cst_202 {dimension_numbers = #tpu.dot_dimension_numbers<[1], [0], [0], [1], [0, 0, 1, 1], [], []>} : vector<8x8xbf16>, vector<8x600xbf16>, vector<8x600xf32> -> vector<8x600xf32>
    %213 = arith.addf %208, %212 : vector<8x600xf32>
    %c7_203 = arith.constant 7 : index
    %c0_204 = arith.constant 0 : index
    %c0_205 = arith.constant 0 : index
    %214 = vector.load %arg3[%c7_203, %c0_204, %c0_205] : memref<27x8x8xbf16, #tpu.memory_space<vmem>>, vector<1x8x8xbf16>
    %215 = vector.shape_cast %214 : vector<1x8x8xbf16> to vector<8x8xbf16>
    %c0_206 = arith.constant 0 : index
    %c21_207 = arith.constant 21 : index
    %216 = vector.load %arg9[%c0_206, %c21_207] : memref<8x822xbf16, #tpu.memory_space<vmem>>, vector<8x600xbf16>
    %cst_208 = arith.constant dense<0.000000e+00> : vector<8x600xf32>
    %217 = tpu.matmul %215, %216, %cst_208 {dimension_numbers = #tpu.dot_dimension_numbers<[1], [0], [0], [1], [0, 0, 1, 1], [], []>} : vector<8x8xbf16>, vector<8x600xbf16>, vector<8x600xf32> -> vector<8x600xf32>
    %218 = arith.addf %213, %217 : vector<8x600xf32>
    %c8_209 = arith.constant 8 : index
    %c0_210 = arith.constant 0 : index
    %c0_211 = arith.constant 0 : index
    %219 = vector.load %arg3[%c8_209, %c0_210, %c0_211] : memref<27x8x8xbf16, #tpu.memory_space<vmem>>, vector<1x8x8xbf16>
    %220 = vector.shape_cast %219 : vector<1x8x8xbf16> to vector<8x8xbf16>
    %c0_212 = arith.constant 0 : index
    %c22_213 = arith.constant 22 : index
    %221 = vector.load %arg9[%c0_212, %c22_213] : memref<8x822xbf16, #tpu.memory_space<vmem>>, vector<8x600xbf16>
    %cst_214 = arith.constant dense<0.000000e+00> : vector<8x600xf32>
    %222 = tpu.matmul %220, %221, %cst_214 {dimension_numbers = #tpu.dot_dimension_numbers<[1], [0], [0], [1], [0, 0, 1, 1], [], []>} : vector<8x8xbf16>, vector<8x600xbf16>, vector<8x600xf32> -> vector<8x600xf32>
    %223 = arith.addf %218, %222 : vector<8x600xf32>
    %c9_215 = arith.constant 9 : index
    %c0_216 = arith.constant 0 : index
    %c0_217 = arith.constant 0 : index
    %224 = vector.load %arg3[%c9_215, %c0_216, %c0_217] : memref<27x8x8xbf16, #tpu.memory_space<vmem>>, vector<1x8x8xbf16>
    %225 = vector.shape_cast %224 : vector<1x8x8xbf16> to vector<8x8xbf16>
    %c0_218 = arith.constant 0 : index
    %c100_219 = arith.constant 100 : index
    %226 = vector.load %arg9[%c0_218, %c100_219] : memref<8x822xbf16, #tpu.memory_space<vmem>>, vector<8x600xbf16>
    %cst_220 = arith.constant dense<0.000000e+00> : vector<8x600xf32>
    %227 = tpu.matmul %225, %226, %cst_220 {dimension_numbers = #tpu.dot_dimension_numbers<[1], [0], [0], [1], [0, 0, 1, 1], [], []>} : vector<8x8xbf16>, vector<8x600xbf16>, vector<8x600xf32> -> vector<8x600xf32>
    %228 = arith.addf %223, %227 : vector<8x600xf32>
    %c10_221 = arith.constant 10 : index
    %c0_222 = arith.constant 0 : index
    %c0_223 = arith.constant 0 : index
    %229 = vector.load %arg3[%c10_221, %c0_222, %c0_223] : memref<27x8x8xbf16, #tpu.memory_space<vmem>>, vector<1x8x8xbf16>
    %230 = vector.shape_cast %229 : vector<1x8x8xbf16> to vector<8x8xbf16>
    %c0_224 = arith.constant 0 : index
    %c101_225 = arith.constant 101 : index
    %231 = vector.load %arg9[%c0_224, %c101_225] : memref<8x822xbf16, #tpu.memory_space<vmem>>, vector<8x600xbf16>
    %cst_226 = arith.constant dense<0.000000e+00> : vector<8x600xf32>
    %232 = tpu.matmul %230, %231, %cst_226 {dimension_numbers = #tpu.dot_dimension_numbers<[1], [0], [0], [1], [0, 0, 1, 1], [], []>} : vector<8x8xbf16>, vector<8x600xbf16>, vector<8x600xf32> -> vector<8x600xf32>
    %233 = arith.addf %228, %232 : vector<8x600xf32>
    %c11_227 = arith.constant 11 : index
    %c0_228 = arith.constant 0 : index
    %c0_229 = arith.constant 0 : index
    %234 = vector.load %arg3[%c11_227, %c0_228, %c0_229] : memref<27x8x8xbf16, #tpu.memory_space<vmem>>, vector<1x8x8xbf16>
    %235 = vector.shape_cast %234 : vector<1x8x8xbf16> to vector<8x8xbf16>
    %c0_230 = arith.constant 0 : index
    %c102_231 = arith.constant 102 : index
    %236 = vector.load %arg9[%c0_230, %c102_231] : memref<8x822xbf16, #tpu.memory_space<vmem>>, vector<8x600xbf16>
    %cst_232 = arith.constant dense<0.000000e+00> : vector<8x600xf32>
    %237 = tpu.matmul %235, %236, %cst_232 {dimension_numbers = #tpu.dot_dimension_numbers<[1], [0], [0], [1], [0, 0, 1, 1], [], []>} : vector<8x8xbf16>, vector<8x600xbf16>, vector<8x600xf32> -> vector<8x600xf32>
    %238 = arith.addf %233, %237 : vector<8x600xf32>
    %c12_233 = arith.constant 12 : index
    %c0_234 = arith.constant 0 : index
    %c0_235 = arith.constant 0 : index
    %239 = vector.load %arg3[%c12_233, %c0_234, %c0_235] : memref<27x8x8xbf16, #tpu.memory_space<vmem>>, vector<1x8x8xbf16>
    %240 = vector.shape_cast %239 : vector<1x8x8xbf16> to vector<8x8xbf16>
    %c0_236 = arith.constant 0 : index
    %c110_237 = arith.constant 110 : index
    %241 = vector.load %arg9[%c0_236, %c110_237] : memref<8x822xbf16, #tpu.memory_space<vmem>>, vector<8x600xbf16>
    %cst_238 = arith.constant dense<0.000000e+00> : vector<8x600xf32>
    %242 = tpu.matmul %240, %241, %cst_238 {dimension_numbers = #tpu.dot_dimension_numbers<[1], [0], [0], [1], [0, 0, 1, 1], [], []>} : vector<8x8xbf16>, vector<8x600xbf16>, vector<8x600xf32> -> vector<8x600xf32>
    %243 = arith.addf %238, %242 : vector<8x600xf32>
    %c13_239 = arith.constant 13 : index
    %c0_240 = arith.constant 0 : index
    %c0_241 = arith.constant 0 : index
    %244 = vector.load %arg3[%c13_239, %c0_240, %c0_241] : memref<27x8x8xbf16, #tpu.memory_space<vmem>>, vector<1x8x8xbf16>
    %245 = vector.shape_cast %244 : vector<1x8x8xbf16> to vector<8x8xbf16>
    %c0_242 = arith.constant 0 : index
    %c111_243 = arith.constant 111 : index
    %246 = vector.load %arg9[%c0_242, %c111_243] : memref<8x822xbf16, #tpu.memory_space<vmem>>, vector<8x600xbf16>
    %cst_244 = arith.constant dense<0.000000e+00> : vector<8x600xf32>
    %247 = tpu.matmul %245, %246, %cst_244 {dimension_numbers = #tpu.dot_dimension_numbers<[1], [0], [0], [1], [0, 0, 1, 1], [], []>} : vector<8x8xbf16>, vector<8x600xbf16>, vector<8x600xf32> -> vector<8x600xf32>
    %248 = arith.addf %243, %247 : vector<8x600xf32>
    %c14_245 = arith.constant 14 : index
    %c0_246 = arith.constant 0 : index
    %c0_247 = arith.constant 0 : index
    %249 = vector.load %arg3[%c14_245, %c0_246, %c0_247] : memref<27x8x8xbf16, #tpu.memory_space<vmem>>, vector<1x8x8xbf16>
    %250 = vector.shape_cast %249 : vector<1x8x8xbf16> to vector<8x8xbf16>
    %c0_248 = arith.constant 0 : index
    %c112_249 = arith.constant 112 : index
    %251 = vector.load %arg9[%c0_248, %c112_249] : memref<8x822xbf16, #tpu.memory_space<vmem>>, vector<8x600xbf16>
    %cst_250 = arith.constant dense<0.000000e+00> : vector<8x600xf32>
    %252 = tpu.matmul %250, %251, %cst_250 {dimension_numbers = #tpu.dot_dimension_numbers<[1], [0], [0], [1], [0, 0, 1, 1], [], []>} : vector<8x8xbf16>, vector<8x600xbf16>, vector<8x600xf32> -> vector<8x600xf32>
    %253 = arith.addf %248, %252 : vector<8x600xf32>
    %c15_251 = arith.constant 15 : index
    %c0_252 = arith.constant 0 : index
    %c0_253 = arith.constant 0 : index
    %254 = vector.load %arg3[%c15_251, %c0_252, %c0_253] : memref<27x8x8xbf16, #tpu.memory_space<vmem>>, vector<1x8x8xbf16>
    %255 = vector.shape_cast %254 : vector<1x8x8xbf16> to vector<8x8xbf16>
    %c0_254 = arith.constant 0 : index
    %c120_255 = arith.constant 120 : index
    %256 = vector.load %arg9[%c0_254, %c120_255] : memref<8x822xbf16, #tpu.memory_space<vmem>>, vector<8x600xbf16>
    %cst_256 = arith.constant dense<0.000000e+00> : vector<8x600xf32>
    %257 = tpu.matmul %255, %256, %cst_256 {dimension_numbers = #tpu.dot_dimension_numbers<[1], [0], [0], [1], [0, 0, 1, 1], [], []>} : vector<8x8xbf16>, vector<8x600xbf16>, vector<8x600xf32> -> vector<8x600xf32>
    %258 = arith.addf %253, %257 : vector<8x600xf32>
    %c16_257 = arith.constant 16 : index
    %c0_258 = arith.constant 0 : index
    %c0_259 = arith.constant 0 : index
    %259 = vector.load %arg3[%c16_257, %c0_258, %c0_259] : memref<27x8x8xbf16, #tpu.memory_space<vmem>>, vector<1x8x8xbf16>
    %260 = vector.shape_cast %259 : vector<1x8x8xbf16> to vector<8x8xbf16>
    %c0_260 = arith.constant 0 : index
    %c121_261 = arith.constant 121 : index
    %261 = vector.load %arg9[%c0_260, %c121_261] : memref<8x822xbf16, #tpu.memory_space<vmem>>, vector<8x600xbf16>
    %cst_262 = arith.constant dense<0.000000e+00> : vector<8x600xf32>
    %262 = tpu.matmul %260, %261, %cst_262 {dimension_numbers = #tpu.dot_dimension_numbers<[1], [0], [0], [1], [0, 0, 1, 1], [], []>} : vector<8x8xbf16>, vector<8x600xbf16>, vector<8x600xf32> -> vector<8x600xf32>
    %263 = arith.addf %258, %262 : vector<8x600xf32>
    %c17_263 = arith.constant 17 : index
    %c0_264 = arith.constant 0 : index
    %c0_265 = arith.constant 0 : index
    %264 = vector.load %arg3[%c17_263, %c0_264, %c0_265] : memref<27x8x8xbf16, #tpu.memory_space<vmem>>, vector<1x8x8xbf16>
    %265 = vector.shape_cast %264 : vector<1x8x8xbf16> to vector<8x8xbf16>
    %c0_266 = arith.constant 0 : index
    %c122_267 = arith.constant 122 : index
    %266 = vector.load %arg9[%c0_266, %c122_267] : memref<8x822xbf16, #tpu.memory_space<vmem>>, vector<8x600xbf16>
    %cst_268 = arith.constant dense<0.000000e+00> : vector<8x600xf32>
    %267 = tpu.matmul %265, %266, %cst_268 {dimension_numbers = #tpu.dot_dimension_numbers<[1], [0], [0], [1], [0, 0, 1, 1], [], []>} : vector<8x8xbf16>, vector<8x600xbf16>, vector<8x600xf32> -> vector<8x600xf32>
    %268 = arith.addf %263, %267 : vector<8x600xf32>
    %c18_269 = arith.constant 18 : index
    %c0_270 = arith.constant 0 : index
    %c0_271 = arith.constant 0 : index
    %269 = vector.load %arg3[%c18_269, %c0_270, %c0_271] : memref<27x8x8xbf16, #tpu.memory_space<vmem>>, vector<1x8x8xbf16>
    %270 = vector.shape_cast %269 : vector<1x8x8xbf16> to vector<8x8xbf16>
    %c0_272 = arith.constant 0 : index
    %c200_273 = arith.constant 200 : index
    %271 = vector.load %arg9[%c0_272, %c200_273] : memref<8x822xbf16, #tpu.memory_space<vmem>>, vector<8x600xbf16>
    %cst_274 = arith.constant dense<0.000000e+00> : vector<8x600xf32>
    %272 = tpu.matmul %270, %271, %cst_274 {dimension_numbers = #tpu.dot_dimension_numbers<[1], [0], [0], [1], [0, 0, 1, 1], [], []>} : vector<8x8xbf16>, vector<8x600xbf16>, vector<8x600xf32> -> vector<8x600xf32>
    %273 = arith.addf %268, %272 : vector<8x600xf32>
    %c19_275 = arith.constant 19 : index
    %c0_276 = arith.constant 0 : index
    %c0_277 = arith.constant 0 : index
    %274 = vector.load %arg3[%c19_275, %c0_276, %c0_277] : memref<27x8x8xbf16, #tpu.memory_space<vmem>>, vector<1x8x8xbf16>
    %275 = vector.shape_cast %274 : vector<1x8x8xbf16> to vector<8x8xbf16>
    %c0_278 = arith.constant 0 : index
    %c201_279 = arith.constant 201 : index
    %276 = vector.load %arg9[%c0_278, %c201_279] : memref<8x822xbf16, #tpu.memory_space<vmem>>, vector<8x600xbf16>
    %cst_280 = arith.constant dense<0.000000e+00> : vector<8x600xf32>
    %277 = tpu.matmul %275, %276, %cst_280 {dimension_numbers = #tpu.dot_dimension_numbers<[1], [0], [0], [1], [0, 0, 1, 1], [], []>} : vector<8x8xbf16>, vector<8x600xbf16>, vector<8x600xf32> -> vector<8x600xf32>
    %278 = arith.addf %273, %277 : vector<8x600xf32>
    %c20_281 = arith.constant 20 : index
    %c0_282 = arith.constant 0 : index
    %c0_283 = arith.constant 0 : index
    %279 = vector.load %arg3[%c20_281, %c0_282, %c0_283] : memref<27x8x8xbf16, #tpu.memory_space<vmem>>, vector<1x8x8xbf16>
    %280 = vector.shape_cast %279 : vector<1x8x8xbf16> to vector<8x8xbf16>
    %c0_284 = arith.constant 0 : index
    %c202_285 = arith.constant 202 : index
    %281 = vector.load %arg9[%c0_284, %c202_285] : memref<8x822xbf16, #tpu.memory_space<vmem>>, vector<8x600xbf16>
    %cst_286 = arith.constant dense<0.000000e+00> : vector<8x600xf32>
    %282 = tpu.matmul %280, %281, %cst_286 {dimension_numbers = #tpu.dot_dimension_numbers<[1], [0], [0], [1], [0, 0, 1, 1], [], []>} : vector<8x8xbf16>, vector<8x600xbf16>, vector<8x600xf32> -> vector<8x600xf32>
    %283 = arith.addf %278, %282 : vector<8x600xf32>
    %c21_287 = arith.constant 21 : index
    %c0_288 = arith.constant 0 : index
    %c0_289 = arith.constant 0 : index
    %284 = vector.load %arg3[%c21_287, %c0_288, %c0_289] : memref<27x8x8xbf16, #tpu.memory_space<vmem>>, vector<1x8x8xbf16>
    %285 = vector.shape_cast %284 : vector<1x8x8xbf16> to vector<8x8xbf16>
    %c0_290 = arith.constant 0 : index
    %c210_291 = arith.constant 210 : index
    %286 = vector.load %arg9[%c0_290, %c210_291] : memref<8x822xbf16, #tpu.memory_space<vmem>>, vector<8x600xbf16>
    %cst_292 = arith.constant dense<0.000000e+00> : vector<8x600xf32>
    %287 = tpu.matmul %285, %286, %cst_292 {dimension_numbers = #tpu.dot_dimension_numbers<[1], [0], [0], [1], [0, 0, 1, 1], [], []>} : vector<8x8xbf16>, vector<8x600xbf16>, vector<8x600xf32> -> vector<8x600xf32>
    %288 = arith.addf %283, %287 : vector<8x600xf32>
    %c22_293 = arith.constant 22 : index
    %c0_294 = arith.constant 0 : index
    %c0_295 = arith.constant 0 : index
    %289 = vector.load %arg3[%c22_293, %c0_294, %c0_295] : memref<27x8x8xbf16, #tpu.memory_space<vmem>>, vector<1x8x8xbf16>
    %290 = vector.shape_cast %289 : vector<1x8x8xbf16> to vector<8x8xbf16>
    %c0_296 = arith.constant 0 : index
    %c211_297 = arith.constant 211 : index
    %291 = vector.load %arg9[%c0_296, %c211_297] : memref<8x822xbf16, #tpu.memory_space<vmem>>, vector<8x600xbf16>
    %cst_298 = arith.constant dense<0.000000e+00> : vector<8x600xf32>
    %292 = tpu.matmul %290, %291, %cst_298 {dimension_numbers = #tpu.dot_dimension_numbers<[1], [0], [0], [1], [0, 0, 1, 1], [], []>} : vector<8x8xbf16>, vector<8x600xbf16>, vector<8x600xf32> -> vector<8x600xf32>
    %293 = arith.addf %288, %292 : vector<8x600xf32>
    %c23_299 = arith.constant 23 : index
    %c0_300 = arith.constant 0 : index
    %c0_301 = arith.constant 0 : index
    %294 = vector.load %arg3[%c23_299, %c0_300, %c0_301] : memref<27x8x8xbf16, #tpu.memory_space<vmem>>, vector<1x8x8xbf16>
    %295 = vector.shape_cast %294 : vector<1x8x8xbf16> to vector<8x8xbf16>
    %c0_302 = arith.constant 0 : index
    %c212_303 = arith.constant 212 : index
    %296 = vector.load %arg9[%c0_302, %c212_303] : memref<8x822xbf16, #tpu.memory_space<vmem>>, vector<8x600xbf16>
    %cst_304 = arith.constant dense<0.000000e+00> : vector<8x600xf32>
    %297 = tpu.matmul %295, %296, %cst_304 {dimension_numbers = #tpu.dot_dimension_numbers<[1], [0], [0], [1], [0, 0, 1, 1], [], []>} : vector<8x8xbf16>, vector<8x600xbf16>, vector<8x600xf32> -> vector<8x600xf32>
    %298 = arith.addf %293, %297 : vector<8x600xf32>
    %c24_305 = arith.constant 24 : index
    %c0_306 = arith.constant 0 : index
    %c0_307 = arith.constant 0 : index
    %299 = vector.load %arg3[%c24_305, %c0_306, %c0_307] : memref<27x8x8xbf16, #tpu.memory_space<vmem>>, vector<1x8x8xbf16>
    %300 = vector.shape_cast %299 : vector<1x8x8xbf16> to vector<8x8xbf16>
    %c0_308 = arith.constant 0 : index
    %c220_309 = arith.constant 220 : index
    %301 = vector.load %arg9[%c0_308, %c220_309] : memref<8x822xbf16, #tpu.memory_space<vmem>>, vector<8x600xbf16>
    %cst_310 = arith.constant dense<0.000000e+00> : vector<8x600xf32>
    %302 = tpu.matmul %300, %301, %cst_310 {dimension_numbers = #tpu.dot_dimension_numbers<[1], [0], [0], [1], [0, 0, 1, 1], [], []>} : vector<8x8xbf16>, vector<8x600xbf16>, vector<8x600xf32> -> vector<8x600xf32>
    %303 = arith.addf %298, %302 : vector<8x600xf32>
    %c25_311 = arith.constant 25 : index
    %c0_312 = arith.constant 0 : index
    %c0_313 = arith.constant 0 : index
    %304 = vector.load %arg3[%c25_311, %c0_312, %c0_313] : memref<27x8x8xbf16, #tpu.memory_space<vmem>>, vector<1x8x8xbf16>
    %305 = vector.shape_cast %304 : vector<1x8x8xbf16> to vector<8x8xbf16>
    %c0_314 = arith.constant 0 : index
    %c221_315 = arith.constant 221 : index
    %306 = vector.load %arg9[%c0_314, %c221_315] : memref<8x822xbf16, #tpu.memory_space<vmem>>, vector<8x600xbf16>
    %cst_316 = arith.constant dense<0.000000e+00> : vector<8x600xf32>
    %307 = tpu.matmul %305, %306, %cst_316 {dimension_numbers = #tpu.dot_dimension_numbers<[1], [0], [0], [1], [0, 0, 1, 1], [], []>} : vector<8x8xbf16>, vector<8x600xbf16>, vector<8x600xf32> -> vector<8x600xf32>
    %308 = arith.addf %303, %307 : vector<8x600xf32>
    %c26_317 = arith.constant 26 : index
    %c0_318 = arith.constant 0 : index
    %c0_319 = arith.constant 0 : index
    %309 = vector.load %arg3[%c26_317, %c0_318, %c0_319] : memref<27x8x8xbf16, #tpu.memory_space<vmem>>, vector<1x8x8xbf16>
    %310 = vector.shape_cast %309 : vector<1x8x8xbf16> to vector<8x8xbf16>
    %c0_320 = arith.constant 0 : index
    %c222_321 = arith.constant 222 : index
    %311 = vector.load %arg9[%c0_320, %c222_321] : memref<8x822xbf16, #tpu.memory_space<vmem>>, vector<8x600xbf16>
    %cst_322 = arith.constant dense<0.000000e+00> : vector<8x600xf32>
    %312 = tpu.matmul %310, %311, %cst_322 {dimension_numbers = #tpu.dot_dimension_numbers<[1], [0], [0], [1], [0, 0, 1, 1], [], []>} : vector<8x8xbf16>, vector<8x600xbf16>, vector<8x600xf32> -> vector<8x600xf32>
    %313 = arith.addf %308, %312 : vector<8x600xf32>
    %c0_323 = arith.constant 0 : index
    %c0_324 = arith.constant 0 : index
    %314 = vector.load %arg5[%c0_323, %c0_324] : memref<8x1xf32, #tpu.memory_space<vmem>>, vector<8x1xf32>
    %315 = vector.broadcast %314 : vector<8x1xf32> to vector<8x600xf32>
    %316 = arith.addf %313, %315 : vector<8x600xf32>
    %cst_325 = arith.constant 0.000000e+00 : f32
    %317 = vector.broadcast %cst_325 : f32 to vector<8x600xf32>
    %318 = arith.maximumf %316, %317 : vector<8x600xf32>
    %c0_326 = arith.constant 0 : index
    %c0_327 = arith.constant 0 : index
    %c0_328 = arith.constant 0 : index
    %319 = vector.load %arg7[%c0_326, %c0_327, %c0_328] : memref<1x8x600xf32, #tpu.memory_space<vmem>>, vector<1x8x600xf32>
    %320 = vector.shape_cast %319 : vector<1x8x600xf32> to vector<8x600xf32>
    %321 = vector.shape_cast %318 : vector<8x600xf32> to vector<1x8x600xf32>
    tpu.vector_store %arg7[%c0_326, %c0_327, %c0_328], %321 {strides = array<i32>} : memref<1x8x600xf32, #tpu.memory_space<vmem>>, vector<1x8x600xf32>,
    return
  }
  func.func @transform_0(%arg0: i32) -> (i32, i32, i32) {
    %c0_i32 = arith.constant 0 : i32
    %c0_i32_0 = arith.constant 0 : i32
    %c0_i32_1 = arith.constant 0 : i32
    return %arg0, %c0_i32, %c0_i32_0 : i32, i32, i32
  }
  func.func @transform_1(%arg0: i32) -> (i32, i32, i32) {
    %c0_i32 = arith.constant 0 : i32
    %c0_i32_0 = arith.constant 0 : i32
    %c0_i32_1 = arith.constant 0 : i32
    %c0_i32_2 = arith.constant 0 : i32
    return %c0_i32, %c0_i32_0, %c0_i32_1 : i32, i32, i32
  }
  func.func @transform_2(%arg0: i32) -> (i32, i32, i32) {
    %c0_i32 = arith.constant 0 : i32
    %c0_i32_0 = arith.constant 0 : i32
    %c0_i32_1 = arith.constant 0 : i32
    %c0_i32_2 = arith.constant 0 : i32
    return %c0_i32, %c0_i32_0, %c0_i32_1 : i32, i32, i32
  }
  func.func @transform_3(%arg0: i32) -> (i32, i32) {
    %c0_i32 = arith.constant 0 : i32
    %c0_i32_0 = arith.constant 0 : i32
    %c0_i32_1 = arith.constant 0 : i32
    return %c0_i32, %c0_i32_0 : i32, i32
  }
  func.func @transform_4(%arg0: i32) -> (i32, i32) {
    %c0_i32 = arith.constant 0 : i32
    %c0_i32_0 = arith.constant 0 : i32
    %c0_i32_1 = arith.constant 0 : i32
    return %c0_i32, %c0_i32_0 : i32, i32
  }
  func.func @transform_5(%arg0: i32) -> (i32, i32) {
    %c0_i32 = arith.constant 0 : i32
    %c0_i32_0 = arith.constant 0 : i32
    %c0_i32_1 = arith.constant 0 : i32
    return %c0_i32, %c0_i32_0 : i32, i32
  }
  func.func @transform_6(%arg0: i32) -> (i32, i32, i32) {
    %c0_i32 = arith.constant 0 : i32
    %c0_i32_0 = arith.constant 0 : i32
    %c0_i32_1 = arith.constant 0 : i32
    return %arg0, %c0_i32, %c0_i32_0 : i32, i32, i32
  }
}

</mosaic_0001>

<bundles_post_ra>
// kernel: down_doubleconv.1
= control target key start
LH: loop header
LB: loop body
LE: loop exit
PB: predicated region body
PF: predicated region fallthrough
CT: control target
= control target key end

     0   :  { %s7338_s21 = smov 0   ;;  %s9939_s0 = inlined_call_operand.vmem [shape: bf16[2,32,600], index: 0, kind: input, shape index: {}]   ;;  %s9940_s1 = inlined_call_operand.vmem [shape: bf16[27,8,4], index: 1, kind: input, shape index: {}]   ;;  %s9941_s2 = inlined_call_operand.vmem [shape: bf16[27,8,8], index: 2, kind: input, shape index: {}]   ;;  %s9942_s3 = inlined_call_operand.vmem [shape: f32[8,1], index: 3, kind: input, shape index: {}]   ;;  %s9943_s4 = inlined_call_operand.vmem [shape: f32[8,1], index: 4, kind: input, shape index: {}]   ;;  %s9944_s5 = inlined_call_operand.vmem [shape: f32[1,600], index: 5, kind: input, shape index: {}]   ;;  %s9945_s6 = inlined_call_operand.vmem [shape: f32[2,8,600], index: 6, kind: output, shape index: {}]  }
   0x1 LB: > { %s6897_s22 = sadd.s32 4294967295, %s7273_s21   ;;  %p6901_p0 = scmp.ge.s32.totalorder %s7273_s21, 1  ;;  %s7273_s21 = sphi %s7338_s21, %s16_s21  }
   0x2   : > { %p212_p1 = scmp.lt.s32.totalorder %s7273_s21, 3 }
   0x4   : > { %p213_p2 = pnand %p6901_p0, %p212_p1 }
   0x6   : > { %216 = sbr.rel (%p213_p2) target bundleno = 1891 (0x763), region = 44 }
   0xb   : > { %p242_p3 = scmp.lt.s32.totalorder %s6897_s22, 1  ;;  %vm476_vm0 = vcmask 1041408   ;;  %vm480_vm1 = vcmask 1045508   ;;  %vm463_vm2 = vcmask 902144   ;;  %vm484_vm3 = vcmask 1043456   ;;  %s7276_s27 = smov 111  }
   0xc   : > { %vm465_vm4 = vcmask 1041976   ;;  %vm466_vm5 = vcmask 437250   ;;  %vm504_vm7 = vcmask 1042296   ;;  %vm505_vm8 = vcmask 1043458   ;;  %s7277_s28 = smov 127   ;;  %s7278_s29 = smov 126  }
   0xd   : > { %s10107_s22 = smov (!%p242_p3, %s6897_s22), 1  ;;  %vm467_vm6 = vmor %vm466_vm5, %vm465_vm4  ;;  %vm508_vm11 = vcmask 1047558   ;;  %vm497_vm12 = vcmask 908288   ;;  %vm511_vm14 = vcmask 576514   ;;  %s7279_s30 = smov 118   ;;  %vm748_vm4 = vcmask 1031168  }
   0xe   : > { %s7228_s23 = smul.u32 80, %s10107_s22  ;;  %vm506_vm9 = vmor %vm505_vm8, %vm504_vm7  ;;  %s7280_s7 = smov 117   ;;  %vm870_vm5 = vcmask 965632   ;;  %vm1114_vm7 = vcmask 949248   ;;  %vm1236_vm8 = vcmask 883712  }
   0xf   : > { %vm507_vm10 = vmor %vm480_vm1, %vm506_vm9  ;;  %s7281_s8 = smov 116   ;;  %s7282_s9 = smov 108   ;;  %vm9984_vm9 = vcmask 875520  }
  0x10   : > { %s7352_s26 = scalar_lea.vmem %s9939_s0, %s7228_s23  ;;  %vm509_vm13 = vmor %vm508_vm11, %vm507_vm10  ;;  %s7283_s10 = smov 107   ;;  %vm9983_vm10 = vcmask 867328   ;;  %vm9967_vm11 = vcmask 228352  }
  0x11   : > { %v253_v0 = vld [vmem:[%s7352_s26] sm:$0x33]  ;;  %v254_v1 = vld [vmem:[%s7352_s26 + $0x8] sm:$0x33]  ;;  %v256_v2 = vld [vmem:[%s7352_s26] sm:$0xcc] }
  0x12   : > { %v257_v3 = vld [vmem:[%s7352_s26 + $0x8] sm:$0xcc]  ;;  %v259_v4 = vunpack.c.l.bf16 %v253_v0  ;;  %v260_v5 = vunpack.c.h.bf16 %v253_v0  ;;  %v261_v6 = vunpack.c.l.bf16 %v254_v1  ;;  %v262_v7 = vunpack.c.h.bf16 %v254_v1  ;;  %v292_v8 = vld [vmem:[%s7352_s26 + $0x14] sm:$0x33]  ;;  %v293_v9 = vld [vmem:[%s7352_s26 + $0x1c] sm:$0x33] }
  0x13   : > { %v264_v10 = vunpack.c.l.bf16 %v256_v2  ;;  %v265_v11 = vunpack.c.h.bf16 %v256_v2  ;;  %v266_v12 = vunpack.c.l.bf16 %v257_v3  ;;  %v267_v13 = vunpack.c.h.bf16 %v257_v3  ;;  %v313_v14 = vld [vmem:[%s7352_s26 + $0x14] sm:$0xcc]  ;;  %v314_v15 = vld [vmem:[%s7352_s26 + $0x1c] sm:$0xcc]  ;;  %v349_v32 = vld [vmem:[%s7352_s26 + $0x28] sm:$0x33] }
  0x14   : > { %v300_v16 = vunpack.c.l.bf16 %v292_v8  ;;  %v301_v17 = vunpack.c.h.bf16 %v292_v8  ;;  %v302_v18 = vunpack.c.l.bf16 %v293_v9  ;;  %v303_v19 = vunpack.c.h.bf16 %v293_v9  ;;  %v350_v33 = vld [vmem:[%s7352_s26 + $0x30] sm:$0x33]  ;;  %v370_v42 = vld [vmem:[%s7352_s26 + $0x28] sm:$0xcc]  ;;  %v371_v43 = vld [vmem:[%s7352_s26 + $0x30] sm:$0xcc] }
  0x15   : > { %v274_v20 = vrot.slane %v264_v10, 4  ;;  %v275_v21 = vrot.slane %v265_v11, 4  ;;  %v276_v22 = vrot.slane %v266_v12, 4  ;;  %v277_v23 = vrot.slane %v267_v13, 4  ;;  %v406_v56 = vld [vmem:[%s7352_s26 + $0x3c] sm:$0x33]  ;;  %vm512_vm15 = vmor %vm511_vm14, %vm476_vm0 }
  0x16   : > { %v321_v24 = vunpack.c.l.bf16 %v313_v14  ;;  %v322_v25 = vunpack.c.h.bf16 %v313_v14  ;;  %v323_v26 = vunpack.c.l.bf16 %v314_v15  ;;  %v324_v27 = vunpack.c.h.bf16 %v314_v15  ;;  %v407_v57 = vld [vmem:[%s7352_s26 + $0x44] sm:$0x33]  ;;  %v427_v62 = vld [vmem:[%s7352_s26 + $0x3c] sm:$0xcc]  ;;  %v428_v3 = vld [vmem:[%s7352_s26 + $0x44] sm:$0xcc] }
  0x17   : > { %v284_v28 = vmax.f32 %v259_v4, %v274_v20  ;;  %v285_v29 = vmax.f32 %v260_v5, %v275_v21  ;;  %v286_v30 = vmax.f32 %v261_v6, %v276_v22  ;;  %v287_v31 = vmax.f32 %v262_v7, %v277_v23  ;;  %s7284_s13 = smov 106   ;;  %s7285_s14 = smov 28  }
  0x18   : > { %v331_v34 = vrot.slane %v321_v24, 4  ;;  %v332_v35 = vrot.slane %v322_v25, 4  ;;  %v333_v36 = vrot.slane %v323_v26, 4  ;;  %v334_v37 = vrot.slane %v324_v27, 4  ;;  %v294_v27 = vld [vmem:[%s7352_s26 + $0x24] sm:$0x3] }
  0x19   : > { %v305_v38 = vmax.f32 %v284_v28, %v300_v16  ;;  %v306_v39 = vmax.f32 %v285_v29, %v301_v17  ;;  %v307_v40 = vmax.f32 %v286_v30, %v302_v18  ;;  %v308_v41 = vmax.f32 %v287_v31, %v303_v19  ;;  %v255_v16 = vld [vmem:[%s7352_s26 + $0x10] sm:$0x3]  ;;  %v258_v17 = vld [vmem:[%s7352_s26 + $0x10] sm:$0xc]  ;;  %v315_v18 = vld [vmem:[%s7352_s26 + $0x24] sm:$0xc] }
  0x1a   : > { %v357_v44 = vunpack.c.l.bf16 %v349_v32  ;;  %v358_v45 = vunpack.c.h.bf16 %v349_v32  ;;  %v359_v46 = vunpack.c.l.bf16 %v350_v33  ;;  %v360_v47 = vunpack.c.h.bf16 %v350_v33  ;;  %s7286_s17 = smov 27   ;;  %s7287_s20 = smov 26  }
  0x1b   : > { %v341_v48 = vmax.f32 %v305_v38, %v331_v34  ;;  %v342_v49 = vmax.f32 %v306_v39, %v332_v35  ;;  %v343_v50 = vmax.f32 %v307_v40, %v333_v36  ;;  %v344_v51 = vmax.f32 %v308_v41, %v334_v37  ;;  %v372_v35 = vld [vmem:[%s7352_s26 + $0x38] sm:$0xc]  ;;  %v351_v41 = vld [vmem:[%s7352_s26 + $0x38] sm:$0x3]  ;;  %s7288_s23 = smov 18   ;;  %s7289_s12 = smov 17  }
  0x1c   : > { %v378_v52 = vunpack.c.l.bf16 %v370_v42  ;;  %v379_v53 = vunpack.c.h.bf16 %v370_v42  ;;  %v380_v54 = vunpack.c.l.bf16 %v371_v43  ;;  %v381_v55 = vunpack.c.h.bf16 %v371_v43  ;;  %s7290_s15 = smov 16   ;;  %s7291_s19 = smov 8  }
  0x1d   : > { %v362_v58 = vmax.f32 %v341_v48, %v357_v44  ;;  %v363_v59 = vmax.f32 %v342_v49, %v358_v45  ;;  %v364_v60 = vmax.f32 %v343_v50, %v359_v46  ;;  %v365_v61 = vmax.f32 %v344_v51, %v360_v47  ;;  %v429_v44 = vld [vmem:[%s7352_s26 + $0x4c] sm:$0xc]  ;;  %s7293_s11 = smov 6   ;;  %s9948_s24 = smov 56  }
  0x1e   : > { %v388_v63 = vrot.slane %v378_v52, 4  ;;  %v389_v0 = vrot.slane %v379_v53, 4  ;;  %v390_v1 = vrot.slane %v380_v54, 4  ;;  %v391_v2 = vrot.slane %v381_v55, 4  ;;  %v408_v53 = vld [vmem:[%s7352_s26 + $0x4c] sm:$0x3] }
  0x1f   : > { %v414_v4 = vunpack.c.l.bf16 %v406_v56  ;;  %v415_v5 = vunpack.c.h.bf16 %v406_v56  ;;  %v416_v6 = vunpack.c.l.bf16 %v407_v57  ;;  %v417_v7 = vunpack.c.h.bf16 %v407_v57  ;;  %s7292_s26 = smov 7   ;;  %s9953_s18 = smov 55  }
  0x20   : > { %v398_v8 = vmax.f32 %v362_v58, %v388_v63  ;;  %v399_v9 = vmax.f32 %v363_v59, %v389_v0  ;;  %v400_v10 = vmax.f32 %v364_v60, %v390_v1  ;;  %v401_v11 = vmax.f32 %v365_v61, %v391_v2  ;;  %s9951_s25 = smov 54   ;;  %s9958_s16 = smov 45  }
  0x21   : > { %v435_v12 = vunpack.c.l.bf16 %v427_v62  ;;  %v436_v13 = vunpack.c.h.bf16 %v427_v62  ;;  %v437_v14 = vunpack.c.l.bf16 %v428_v3  ;;  %v438_v15 = vunpack.c.h.bf16 %v428_v3 }
  0x22   : > { %v419_v19 = vmax.f32 %v398_v8, %v414_v4  ;;  %v420_v20 = vmax.f32 %v399_v9, %v415_v5  ;;  %v421_v21 = vmax.f32 %v400_v10, %v416_v6  ;;  %v422_v22 = vmax.f32 %v401_v11, %v417_v7 }
  0x23   : > { %v445_v23 = vrot.slane %v435_v12, 4  ;;  %v446_v24 = vrot.slane %v436_v13, 4  ;;  %v447_v25 = vrot.slane %v437_v14, 4  ;;  %v448_v26 = vrot.slane %v438_v15, 4 }
  0x24   : > { %v263_v28 = vunpack.c.l.bf16 %v255_v16  ;;  %v268_v29 = vunpack.c.l.bf16 %v258_v17  ;;  %v325_v30 = vunpack.c.l.bf16 %v315_v18  ;;  %v304_v37 = vunpack.c.l.bf16 %v294_v27 }
  0x25   : > { %v455_v31 = vmax.f32 %v419_v19, %v445_v23  ;;  %v456_v32 = vmax.f32 %v420_v20, %v446_v24  ;;  %v457_v33 = vmax.f32 %v421_v21, %v447_v25  ;;  %v458_v34 = vmax.f32 %v422_v22, %v448_v26 }
  0x26   : > { %v278_v36 = vrot.slane %v268_v29, 4  ;;  %v335_v40 = vrot.slane %v325_v30, 4  ;;  %v382_v43 = vunpack.c.l.bf16 %v372_v35  ;;  %v9946_v48 = vmov 0  }
  0x27   : > { %v460_v38 = vpack.c.bf16 %v456_v32, %v455_v31  ;;  %v461_v39 = vpack.c.bf16 %v458_v34, %v457_v33  ;;  %464 = vst.msk [vmem:[#allocation2] sm:$0x3] %vm463_vm2, %v9946_v48  ;;  %7266 = vset.pattern.permute.xlu0 %v9946_v48  ;;  %v361_v50 = vunpack.c.l.bf16 %v351_v41  ;;  %v439_v57 = vunpack.c.l.bf16 %v429_v44 }
  0x28   : > { %v288_v42 = vmax.f32 %v263_v28, %v278_v36  ;;  %v392_v56 = vrot.slane %v382_v43, 4  ;;  %468 = vst.msk [vmem:[#allocation2 + $0xa] sm:$0xf] %vm467_vm6, %v9946_v48  ;;  %v418_v59 = vunpack.c.l.bf16 %v408_v53  ;;  %vm549_vm2 = vcmask 31744  }
  0x29   : > { %v472_v45 = vrot.slane %v460_v38, 2  ;;  %v473_v46 = vrot.slane %v461_v39, 4  ;;  %v474_v47 = vrot.slane %v461_v39, 6  ;;  %v449_v61 = vrot.slane %v439_v57, 4 }
  0x2a   : > { %v309_v49 = vmax.f32 %v288_v42, %v304_v37  ;;  %vm992_vm6 = vcmask 957440   ;;  %vm9955_vm14 = vcmask 211968  }
  0x2b   : > { %v479_v51 = vsel %vm476_vm0, %v460_v38, %v472_v45  ;;  %v483_v52 = vsel %vm480_vm1, %v473_v46, %v474_v47  ;;  %vm544_vm1 = vcmask 1039360  }
  0x2c   : > { %v485_v54 = vsel %vm484_vm3, %v479_v51, %v483_v52  ;;  %v345_v55 = vmax.f32 %v309_v49, %v335_v40 }
  0x2d   : > { %491 = vrot.lane.b32.xlu0 %v485_v54, %s7276_s27 }
  0x2e   : > { %v366_v58 = vmax.f32 %v345_v55, %v361_v50 }
  0x30   : > { %v402_v60 = vmax.f32 %v366_v58, %v392_v56 }
  0x32   : > { %v423_v62 = vmax.f32 %v402_v60, %v418_v59 }
  0x34   : > { %v459_v63 = vmax.f32 %v423_v62, %v449_v61 }
  0x36   : > { %v462_v0 = vpack.c.bf16 %v459_v63, %v459_v63 }
  0x38   : > { %v475_v1 = vrot.slane %v462_v0, 2 }
  0x3a   : > { %v489_v2 = vsel %vm476_vm0, %v462_v0, %v475_v1 }
  0x3b   : > { %493 = vrot.lane.b32.xlu0 %v489_v2, %s7276_s27 }
  0x9f   : > { %v492_v3 = vpop.permute.xlu0 %491 }
  0xa0   : > { %v495_v4 = vrot.slane %v492_v3, 6 }
  0xa2   : > { %v498_v5 = vsel %vm497_vm12, %v495_v4, %v492_v3 }
  0xa3   : > { %510 = vst.msk [vmem:[#allocation2] sm:$0xff] %vm509_vm13, %v498_v5  ;;  %vm9950_vm13 = vcmask 220160  }
  0xaa   : > { %v7389_v6 = vld [vmem:[#allocation2] sm:$0xff] }
  0xab   : > { %520 = vst [vmem:[#allocation1] ss:$4 sm:$0xff] %v7389_v6 }
  0xad   : > { %v494_v7 = vpop.permute.xlu0 %493 }
  0xae   : > { %v496_v8 = vrot.slane %v494_v7, 6 }
  0xb0   : > { %v500_v9 = vsel %vm476_vm0, %v495_v4, %v496_v8 }
  0xb1   : > { %v501_v12 = vsel %vm497_vm12, %v500_v9, %v494_v7 }
  0xb2   : > { %v524_v10 = vld.sshfl [vmem:[#allocation1] sm:$0xff pattern:$0x73625140]  ;;  %v526_v11 = vld.sshfl [vmem:[#allocation1 + $0x8] sm:$0xff pattern:$0x73625140] }
  0xb3   : > { %v528_v13 = vld.sshfl [vmem:[#allocation1 + $0x10] sm:$0xff pattern:$0x73625140]  ;;  %v530_v14 = vld.sshfl [vmem:[#allocation1 + $0x18] sm:$0xff pattern:$0x73625140]  ;;  %534 = vrot.lane.b32.xlu1 %v524_v10, %s7277_s28 }
  0xb4   : > { %633 = vst [vmem:[#allocation1] ss:$4 sm:$0xff] %v7389_v6  ;;  %538 = vrot.lane.b32.xlu2 %v528_v13, %s7277_s28 }
  0xb5   : > { %513 = vst.msk [vmem:[#allocation2 + $0x8] sm:$0xf] %vm512_vm15, %v501_v12  ;;  %vm9964_vm15 = vcmask 146432  }
  0xbb   : > { %v7398_v15 = vld.sshfl [vmem:[#allocation1] sm:$0xff pattern:$0x73625140]  ;;  %v7400_v16 = vld.sshfl [vmem:[#allocation1 + $0x8] sm:$0xff pattern:$0x73625140]  ;;  %536 = vrot.lane.b32.xlu1 %v526_v11, %s7277_s28 }
  0xbc   : > { %v7403_v17 = vld.sshfl [vmem:[#allocation1 + $0x10] sm:$0xff pattern:$0x73625140]  ;;  %v7405_v18 = vld.sshfl [vmem:[#allocation1 + $0x18] sm:$0xff pattern:$0x73625140]  ;;  %540 = vrot.lane.b32.xlu2 %v530_v14, %s7277_s28 }
  0xbd   : > { %724 = vst [vmem:[#allocation1] ss:$4 sm:$0xff] %v7389_v6  ;;  %v516_v19 = vld [vmem:[#allocation2 + $0x8] sm:$0x3] }
  0xbe   : > { %523 = vst [vmem:[#allocation1 + $0x20] ss:$4 sm:$0xff] %v516_v19  ;;  %v722_v30 = vld [vmem:[#allocation2 + $0x8] sm:$0x3] }
  0xbf   : > { %v844_v31 = vld [vmem:[#allocation2 + $0x8] sm:$0x3] }
  0xc0   : > { %v966_v37 = vld [vmem:[#allocation2 + $0x8] sm:$0x3] }
  0xc1   : > { %v1088_v44 = vld [vmem:[#allocation2 + $0x8] sm:$0x3] }
  0xc2   : > { %v1210_v51 = vld [vmem:[#allocation2 + $0x8] sm:$0x3] }
  0xc3   : > { %v1332_v57 = vld [vmem:[#allocation2 + $0x8] sm:$0x3] }
  0xc4   : > { %v728_v20 = vld.sshfl [vmem:[#allocation1] sm:$0xff pattern:$0x73625140]  ;;  %v730_v21 = vld.sshfl [vmem:[#allocation1 + $0x8] sm:$0xff pattern:$0x73625140] }
  0xc5   : > { %v732_v22 = vld.sshfl [vmem:[#allocation1 + $0x10] sm:$0xff pattern:$0x73625140]  ;;  %v734_v23 = vld.sshfl [vmem:[#allocation1 + $0x18] sm:$0xff pattern:$0x73625140]  ;;  %740 = vrot.lane.b32.xlu2 %v730_v21, %s7278_s29  ;;  %738 = vrot.lane.b32.xlu1 %v728_v20, %s7278_s29 }
  0xc6   : > { %846 = vst [vmem:[#allocation1] ss:$4 sm:$0xff] %v7389_v6  ;;  %v532_v24 = vld.sshfl [vmem:[#allocation1 + $0x20] sm:$0xff pattern:$0x73625140] }
  0xc7   : > { %542 = vrot.lane.b32.xlu0 %v532_v24, %s7277_s28  ;;  %635 = vst [vmem:[#allocation1 + $0x20] ss:$4 sm:$0xff] %v516_v19  ;;  %v1454_v63 = vld [vmem:[#allocation2 + $0x8] sm:$0x3] }
  0xc8   : > { %v1576_v5 = vld [vmem:[#allocation2 + $0x8] sm:$0xf] }
  0xc9   : > { %v1703_v14 = vld [vmem:[#allocation2 + $0x8] sm:$0xf] }
  0xcd   : > { %v850_v25 = vld.sshfl [vmem:[#allocation1] sm:$0xff pattern:$0x73625140]  ;;  %v852_v26 = vld.sshfl [vmem:[#allocation1 + $0x8] sm:$0xff pattern:$0x73625140]  ;;  %744 = vrot.lane.b32.xlu1 %v734_v23, %s7278_s29 }
  0xce   : > { %v854_v27 = vld.sshfl [vmem:[#allocation1 + $0x10] sm:$0xff pattern:$0x73625140]  ;;  %v856_v28 = vld.sshfl [vmem:[#allocation1 + $0x18] sm:$0xff pattern:$0x73625140] }
  0xcf   : > { %968 = vst [vmem:[#allocation1] ss:$4 sm:$0xff] %v7389_v6  ;;  %v7415_v29 = vld.sshfl [vmem:[#allocation1 + $0x20] sm:$0xff pattern:$0x73625140]  ;;  %742 = vrot.lane.b32.xlu0 %v732_v22, %s7278_s29  ;;  %v646_v22 = vsel %vm476_vm0, %v7400_v16, 0 }
  0xd0   : > { %727 = vst [vmem:[#allocation1 + $0x20] ss:$4 sm:$0xff] %v722_v30  ;;  %v7478_v23 = vld [vmem:[%s9940_s1 + $0x4] sm:$0xf] }
  0xd5   : > { %862 = vrot.lane.b32.xlu1 %v852_v26, %s7279_s30 }
  0xd6   : > { %v974_v32 = vld.sshfl [vmem:[#allocation1 + $0x8] sm:$0xff pattern:$0x73625140]  ;;  %v972_v33 = vld.sshfl [vmem:[#allocation1] sm:$0xff pattern:$0x73625140] }
  0xd7   : > { %v976_v34 = vld.sshfl [vmem:[#allocation1 + $0x10] sm:$0xff pattern:$0x73625140]  ;;  %v978_v35 = vld.sshfl [vmem:[#allocation1 + $0x18] sm:$0xff pattern:$0x73625140]  ;;  %860 = vrot.lane.b32.xlu0 %v850_v25, %s7279_s30 }
  0xd8   : > { %v736_v36 = vld.sshfl [vmem:[#allocation1 + $0x20] sm:$0xff pattern:$0x73625140]  ;;  %1090 = vst [vmem:[#allocation1] ss:$4 sm:$0xff] %v7389_v6 }
  0xd9   : > { %746 = vrot.lane.b32.xlu2 %v736_v36, %s7278_s29  ;;  %849 = vst [vmem:[#allocation1 + $0x20] ss:$4 sm:$0xff] %v844_v31  ;;  %v1830_v25 = vld [vmem:[#allocation2 + $0x8] sm:$0xf] }
  0xdf   : > { %v1094_v38 = vld.sshfl [vmem:[#allocation1] sm:$0xff pattern:$0x73625140]  ;;  %v1096_v39 = vld.sshfl [vmem:[#allocation1 + $0x8] sm:$0xff pattern:$0x73625140]  ;;  %866 = vrot.lane.b32.xlu0 %v856_v28, %s7279_s30 }
  0xe0   : > { %v858_v40 = vld.sshfl [vmem:[#allocation1 + $0x20] sm:$0xff pattern:$0x73625140]  ;;  %v1098_v41 = vld.sshfl [vmem:[#allocation1 + $0x10] sm:$0xff pattern:$0x73625140] }
  0xe1   : > { %864 = vrot.lane.b32.xlu2 %v854_v27, %s7279_s30  ;;  %971 = vst [vmem:[#allocation1 + $0x20] ss:$4 sm:$0xff] %v966_v37  ;;  %v1100_v42 = vld.sshfl [vmem:[#allocation1 + $0x18] sm:$0xff pattern:$0x73625140]  ;;  %868 = vrot.lane.b32.xlu1 %v858_v40, %s7279_s30 }
  0xe2   : > { %1212 = vst [vmem:[#allocation1] ss:$4 sm:$0xff] %v7389_v6 }
  0xe7   : > { %984 = vrot.lane.b32.xlu0 %v974_v32, %s7280_s7  ;;  %v1957_v32 = vld [vmem:[#allocation2 + $0x8] sm:$0xf] }
  0xe8   : > { %v980_v43 = vld.sshfl [vmem:[#allocation1 + $0x20] sm:$0xff pattern:$0x73625140] }
  0xe9   : > { %982 = vrot.lane.b32.xlu2 %v972_v33, %s7280_s7  ;;  %v1216_v45 = vld.sshfl [vmem:[#allocation1] sm:$0xff pattern:$0x73625140]  ;;  %1093 = vst [vmem:[#allocation1 + $0x20] ss:$4 sm:$0xff] %v1088_v44  ;;  %986 = vrot.lane.b32.xlu1 %v976_v34, %s7280_s7 }
  0xea   : > { %v1218_v46 = vld.sshfl [vmem:[#allocation1 + $0x8] sm:$0xff pattern:$0x73625140]  ;;  %v1222_v47 = vld.sshfl [vmem:[#allocation1 + $0x18] sm:$0xff pattern:$0x73625140] }
  0xeb   : > { %v1220_v49 = vld.sshfl [vmem:[#allocation1 + $0x10] sm:$0xff pattern:$0x73625140] }
  0xec   : > { %1334 = vst [vmem:[#allocation1] ss:$4 sm:$0xff] %v7389_v6 }
  0xef   : > { %990 = vrot.lane.b32.xlu0 %v980_v43, %s7280_s7 }
  0xf0   : > { %v1102_v50 = vld.sshfl [vmem:[#allocation1 + $0x20] sm:$0xff pattern:$0x73625140] }
  0xf1   : > { %988 = vrot.lane.b32.xlu2 %v978_v35, %s7280_s7  ;;  %1215 = vst [vmem:[#allocation1 + $0x20] ss:$4 sm:$0xff] %v1210_v51  ;;  %1104 = vrot.lane.b32.xlu1 %v1094_v38, %s7281_s8 }
  0xf3   : > { %v1340_v52 = vld.sshfl [vmem:[#allocation1 + $0x8] sm:$0xff pattern:$0x73625140]  ;;  %v1338_v53 = vld.sshfl [vmem:[#allocation1] sm:$0xff pattern:$0x73625140] }
  0xf4   : > { %v1342_v54 = vld.sshfl [vmem:[#allocation1 + $0x10] sm:$0xff pattern:$0x73625140]  ;;  %v1344_v55 = vld.sshfl [vmem:[#allocation1 + $0x18] sm:$0xff pattern:$0x73625140] }
  0xf5   : > { %1456 = vst [vmem:[#allocation1] ss:$4 sm:$0xff] %v7389_v6 }
  0xf7   : > { %1108 = vrot.lane.b32.xlu0 %v1098_v41, %s7281_s8 }
  0xf8   : > { %v1224_v56 = vld.sshfl [vmem:[#allocation1 + $0x20] sm:$0xff pattern:$0x73625140] }
  0xf9   : > { %1106 = vrot.lane.b32.xlu2 %v1096_v39, %s7281_s8  ;;  %1337 = vst [vmem:[#allocation1 + $0x20] ss:$4 sm:$0xff] %v1332_v57  ;;  %1110 = vrot.lane.b32.xlu1 %v1100_v42, %s7281_s8  ;;  %v7520_v39 = vld [vmem:[%s9940_s1] sm:$0xf] }
  0xfc   : > { %v1460_v58 = vld.sshfl [vmem:[#allocation1] sm:$0xff pattern:$0x73625140]  ;;  %v1462_v59 = vld.sshfl [vmem:[#allocation1 + $0x8] sm:$0xff pattern:$0x73625140] }
  0xfd   : > { %v1464_v60 = vld.sshfl [vmem:[#allocation1 + $0x10] sm:$0xff pattern:$0x73625140]  ;;  %v1466_v61 = vld.sshfl [vmem:[#allocation1 + $0x18] sm:$0xff pattern:$0x73625140] }
  0xfe   : > { %1578 = vst [vmem:[#allocation1] ss:$4 sm:$0xff] %v7389_v6 }
  0xff   : > { %1226 = vrot.lane.b32.xlu0 %v1216_v45, %s7282_s9 }
 0x100   : > { %v1346_v62 = vld.sshfl [vmem:[#allocation1 + $0x20] sm:$0xff pattern:$0x73625140] }
 0x101   : > { %1112 = vrot.lane.b32.xlu2 %v1102_v50, %s7281_s8  ;;  %1459 = vst [vmem:[#allocation1 + $0x20] ss:$4 sm:$0xff] %v1454_v63  ;;  %1228 = vrot.lane.b32.xlu1 %v1218_v46, %s7282_s9 }
 0x105   : > { %v1582_v0 = vld.sshfl [vmem:[#allocation1] sm:$0xff pattern:$0x73625140]  ;;  %v1584_v1 = vld.sshfl [vmem:[#allocation1 + $0x8] sm:$0xff pattern:$0x73625140] }
 0x106   : > { %v7441_v2 = vld.sshfl [vmem:[#allocation1 + $0x18] sm:$0xff pattern:$0x73625140]  ;;  %v7443_v3 = vld.sshfl [vmem:[#allocation1 + $0x10] sm:$0xff pattern:$0x73625140] }
 0x107   : > { %1705 = vst [vmem:[#allocation1] ss:$4 sm:$0xff] %v7389_v6  ;;  %1232 = vrot.lane.b32.xlu0 %v1222_v47, %s7282_s9 }
 0x108   : > { %v1468_v4 = vld.sshfl [vmem:[#allocation1 + $0x20] sm:$0xff pattern:$0x73625140] }
 0x109   : > { %1230 = vrot.lane.b32.xlu2 %v1220_v49, %s7282_s9  ;;  %1581 = vst [vmem:[#allocation1 + $0x20] ss:$4 sm:$0xff] %v1576_v5  ;;  %1234 = vrot.lane.b32.xlu1 %v1224_v56, %s7282_s9 }
 0x10e   : > { %v7449_v7 = vpop.permute.xlu2 %538  ;;  %v7451_v8 = vld.sshfl [vmem:[#allocation1] sm:$0xff pattern:$0x73625140]  ;;  %v7453_v9 = vld.sshfl [vmem:[#allocation1 + $0x8] sm:$0xff pattern:$0x73625140] }
 0x10f   : > { %v7455_v10 = vld.sshfl [vmem:[#allocation1 + $0x18] sm:$0xff pattern:$0x73625140]  ;;  %v7457_v11 = vld.sshfl [vmem:[#allocation1 + $0x10] sm:$0xff pattern:$0x73625140]  ;;  %1350 = vrot.lane.b32.xlu0 %v1340_v52, %s7283_s10 }
 0x110   : > { %v7459_v12 = vld.sshfl [vmem:[#allocation1 + $0x20] sm:$0xff pattern:$0x73625140]  ;;  %v7461_v13 = vld.sshfl [vmem:[#allocation1 + $0x28] sm:$0xff pattern:$0x73625140] }
 0x111   : > { %1348 = vrot.lane.b32.xlu2 %v1338_v53, %s7283_s10  ;;  %1832 = vst [vmem:[#allocation1] ss:$4 sm:$0xff] %v7389_v6  ;;  %1352 = vrot.lane.b32.xlu1 %v1342_v54, %s7283_s10  ;;  %v2084_v53 = vld [vmem:[#allocation2 + $0x8] sm:$0xf]  ;;  %v644_v54 = vsel %vm476_vm0, %v7398_v15, 0 }
 0x112   : > { %1708 = vst [vmem:[#allocation1 + $0x20] ss:$4 sm:$0xff] %v1703_v14 }
 0x116   : > { %v7467_v19 = vpop.permute.xlu2 %540 }
 0x117   : > { %v547_v20 = vsel %vm544_vm1, %v7449_v7, %v7467_v19  ;;  %1356 = vrot.lane.b32.xlu0 %v1346_v62, %s7283_s10 }
 0x118   : > { %v560_v21 = vsel %vm476_vm0, %v547_v20, 0  ;;  %v7480_v24 = vld.sshfl [vmem:[#allocation1] sm:$0xff pattern:$0x73625140] }
 0x119   : > { %1354 = vrot.lane.b32.xlu2 %v1344_v55, %s7283_s10  ;;  %v7484_v26 = vld.sshfl [vmem:[#allocation1 + $0x20] sm:$0xff pattern:$0x73625140]  ;;  %v7486_v27 = vld.sshfl [vmem:[#allocation1 + $0x28] sm:$0xff pattern:$0x73625140]  ;;  %1470 = vrot.lane.b32.xlu1 %v1460_v58, %s7284_s13 }
 0x11a   : > { %601 = vmatpush.bf16.msra.mxu2 %v560_v21  ;;  %v7489_v16 = vld.sshfl [vmem:[#allocation1 + $0x8] sm:$0xff pattern:$0x73625140]  ;;  %v7491_v28 = vld.sshfl [vmem:[#allocation1 + $0x18] sm:$0xff pattern:$0x73625140] }
 0x11b   : > { %v7493_v30 = vld.sshfl [vmem:[#allocation1 + $0x10] sm:$0xff pattern:$0x73625140]  ;;  %1835 = vst [vmem:[#allocation1 + $0x20] ss:$4 sm:$0xff] %v1830_v25  ;;  %v652_v55 = vsel %vm476_vm0, %v7415_v29, 0 }
 0x11c   : > { %1959 = vst [vmem:[#allocation1] ss:$4 sm:$0xff] %v7389_v6 }
 0x11d   : > { %6907 = vmatmul.msk.bf16.vlgmr.msra.gmra.mxu2 %vm549_vm2, %v7478_v23 }
 0x11e   : > { %674 = vmatpush.bf16.msrb.mxu2 %v646_v22 }
 0x11f   : > { %1474 = vrot.lane.b32.xlu0 %v1464_v60, %s7284_s13  ;;  %v7526_v42 = vpop.permute.xlu2 %740 }
 0x121   : > { %1472 = vrot.lane.b32.xlu2 %v1462_v59, %s7284_s13  ;;  %1476 = vrot.lane.b32.xlu1 %v1466_v61, %s7284_s13 }
 0x122   : > { %v7501_v31 = vld.sshfl [vmem:[#allocation1 + $0x20] sm:$0xff pattern:$0x73625140]  ;;  %v7505_v34 = vld.sshfl [vmem:[#allocation1 + $0x28] sm:$0xff pattern:$0x73625140] }
 0x123   : > { %v7503_v33 = vld.sshfl [vmem:[#allocation1] sm:$0xff pattern:$0x73625140]  ;;  %v7507_v35 = vld.sshfl [vmem:[#allocation1 + $0x8] sm:$0xff pattern:$0x73625140] }
 0x124   : > { %v7509_v36 = vld.sshfl [vmem:[#allocation1 + $0x18] sm:$0xff pattern:$0x73625140]  ;;  %v7511_v38 = vld.sshfl [vmem:[#allocation1 + $0x10] sm:$0xff pattern:$0x73625140] }
 0x125   : > { %v535_v37 = vpop.permute.xlu1 %534  ;;  %1962 = vst [vmem:[#allocation1 + $0x20] ss:$4 sm:$0xff] %v1957_v32 }
 0x126   : > { %2086 = vst [vmem:[#allocation1] ss:$4 sm:$0xff] %v7389_v6 }
 0x127   : > { %1594 = vrot.lane.b32.xlu0 %v1582_v0, %s7285_s14  ;;  %v2211_v0 = vld [vmem:[#allocation2 + $0x8] sm:$0xf] }
 0x129   : > { %1478 = vrot.lane.b32.xlu2 %v1468_v4, %s7284_s13  ;;  %1596 = vrot.lane.b32.xlu1 %v1584_v1, %s7285_s14 }
 0x12c   : > { %v7522_v40 = vld.sshfl [vmem:[#allocation1 + $0x20] sm:$0xff pattern:$0x73625140]  ;;  %v7524_v41 = vld.sshfl [vmem:[#allocation1 + $0x28] sm:$0xff pattern:$0x73625140] }
 0x12d   : > { %6911 = vmatmul.msk.bf16.vlgmr.msrb.gmra.mxu2 %vm549_vm2, %v7520_v39  ;;  %v537_v43 = vpop.permute.xlu1 %536  ;;  %v7530_v44 = vld.sshfl [vmem:[#allocation1] sm:$0xff pattern:$0x73625140]  ;;  %v7532_v45 = vld.sshfl [vmem:[#allocation1 + $0x8] sm:$0xff pattern:$0x73625140] }
 0x12e   : > { %v545_v46 = vsel %vm544_vm1, %v535_v37, %v537_v43  ;;  %v546_v47 = vsel %vm544_vm1, %v537_v43, %v7449_v7  ;;  %v7537_v49 = vld.sshfl [vmem:[#allocation1 + $0x18] sm:$0xff pattern:$0x73625140]  ;;  %v7539_v50 = vld.sshfl [vmem:[#allocation1 + $0x10] sm:$0xff pattern:$0x73625140] }
 0x12f   : > { %v554_v51 = vsel %vm476_vm0, %v545_v46, 0  ;;  %v557_v52 = vsel %vm476_vm0, %v546_v47, 0  ;;  %2213 = vst [vmem:[#allocation1] ss:$4 sm:$0xff] %v7389_v6  ;;  %1600 = vrot.lane.b32.xlu0 %v7441_v2, %s7285_s14  ;;  %v7584_v2 = vld [vmem:[%s9940_s1 + $0x8] sm:$0xf] }
 0x130   : > { %575 = vmatpush.bf16.msra.mxu0 %v554_v51  ;;  %588 = vmatpush.bf16.msra.mxu1 %v557_v52  ;;  %2089 = vst [vmem:[#allocation1 + $0x20] ss:$4 sm:$0xff] %v2084_v53  ;;  %v2465_v46 = vld [vmem:[#allocation2 + $0x8] sm:$0xf] }
 0x131   : > { %1598 = vrot.lane.b32.xlu2 %v7443_v3, %s7285_s14  ;;  %1602 = vrot.lane.b32.xlu1 %v7459_v12, %s7285_s14 }
 0x133   : > { %6905 = vmatmul.msk.bf16.vlgmr.msra.gmra.mxu0 %vm549_vm2, %v7478_v23  ;;  %6906 = vmatmul.msk.bf16.vlgmr.msra.gmra.mxu1 %vm549_vm2, %v7478_v23  ;;  %v747_v15 = vpop.permute.xlu2 %746 }
 0x134   : > { %661 = vmatpush.bf16.msrb.mxu1 %v644_v54  ;;  %v769_v1 = vsel %vm476_vm0, %v747_v15, 0 }
 0x136   : > { %v7558_v56 = vld.sshfl [vmem:[#allocation1] sm:$0xff pattern:$0x73625140]  ;;  %v7560_v57 = vld.sshfl [vmem:[#allocation1 + $0x8] sm:$0xff pattern:$0x73625140] }
 0x137   : > { %v739_v58 = vpop.permute.xlu1 %738  ;;  %v7562_v59 = vld.sshfl [vmem:[#allocation1 + $0x20] sm:$0xff pattern:$0x73625140]  ;;  %v7564_v60 = vld.sshfl [vmem:[#allocation1 + $0x28] sm:$0xff pattern:$0x73625140]  ;;  %1721 = vrot.lane.b32.xlu0 %v7451_v8, %s7286_s17 }
 0x138   : > { %713 = vmatpush.bf16.msra.mxu1 %v652_v55  ;;  %v749_v61 = vsel %vm748_vm4, %v739_v58, %v7526_v42  ;;  %v7568_v62 = vld.sshfl [vmem:[#allocation1 + $0x18] sm:$0xff pattern:$0x73625140]  ;;  %v7570_v63 = vld.sshfl [vmem:[#allocation1 + $0x10] sm:$0xff pattern:$0x73625140] }
 0x139   : > { %1604 = vrot.lane.b32.xlu2 %v7461_v13, %s7285_s14  ;;  %v757_v29 = vsel %vm476_vm0, %v749_v61, 0  ;;  %2340 = vst [vmem:[#allocation1] ss:$4 sm:$0xff] %v7389_v6  ;;  %1723 = vrot.lane.b32.xlu1 %v7453_v9, %s7286_s17  ;;  %v543_v3 = vpop.permute.xlu0 %542  ;;  %v650_v8 = vsel %vm476_vm0, %v7405_v18, 0  ;;  %v648_v9 = vsel %vm476_vm0, %v7403_v17, 0 }
 0x13a   : > { %778 = vmatpush.bf16.msra.mxu2 %v757_v29  ;;  %2216 = vst [vmem:[#allocation1 + $0x20] ss:$4 sm:$0xff] %v2211_v0  ;;  %v548_v4 = vsel %vm544_vm1, %v7467_v19, %v543_v3  ;;  %v566_v5 = vsel %vm476_vm0, %v543_v3, 0  ;;  %v2338_v19 = vld [vmem:[#allocation2 + $0x8] sm:$0xf] }
 0x13b   : > { %v563_v7 = vsel %vm476_vm0, %v548_v4, 0  ;;  %627 = vmatpush.bf16.msrb.mxu0 %v566_v5  ;;  %v2592_v61 = vld [vmem:[#allocation2 + $0x8] sm:$0xf] }
 0x13c   : > { %614 = vmatpush.bf16.msra.mxu3 %v563_v7 }
 0x13d   : > { %6916 = vmatmul.msk.bf16.vlgmr.msra.gmra.mxu2 %vm549_vm2, %v7584_v2 }
 0x13e   : > { %830 = vmatpush.bf16.msrb.mxu2 %v769_v1  ;;  %v7670_v1 = vld [vmem:[#allocation2 + $0x2] sm:$0xff] }
 0x13f   : > { %700 = vmatpush.bf16.msra.mxu0 %v650_v8  ;;  %v745_v12 = vpop.permute.xlu1 %744  ;;  %6908 = vmatmul.msk.bf16.vlgmr.msra.gmra.mxu3 %vm549_vm2, %v7478_v23 }
 0x140   : > { %687 = vmatpush.bf16.msrb.mxu3 %v648_v9  ;;  %v752_v13 = vsel %vm748_vm4, %v745_v12, %v747_v15  ;;  %v7597_v14 = vld.sshfl [vmem:[#allocation1] sm:$0xff pattern:$0x73625140]  ;;  %1727 = vrot.lane.b32.xlu0 %v7455_v10, %s7286_s17  ;;  %v7605_v20 = vld.sshfl [vmem:[#allocation1 + $0x8] sm:$0xff pattern:$0x73625140] }
 0x141   : > { %v7603_v18 = vld.sshfl [vmem:[#allocation1 + $0x20] sm:$0xff pattern:$0x73625140]  ;;  %1725 = vrot.lane.b32.xlu2 %v7457_v11, %s7286_s17  ;;  %1729 = vrot.lane.b32.xlu1 %v7484_v26, %s7286_s17  ;;  %v7611_v17 = vld.sshfl [vmem:[#allocation1 + $0x28] sm:$0xff pattern:$0x73625140]  ;;  %v743_v22 = vpop.permute.xlu0 %742  ;;  %v865_v11 = vpop.permute.xlu2 %864 }
 0x142   : > { %v7613_v21 = vld.sshfl [vmem:[#allocation1 + $0x18] sm:$0xff pattern:$0x73625140]  ;;  %v766_v10 = vsel %vm476_vm0, %v752_v13, 0  ;;  %2343 = vst [vmem:[#allocation1 + $0x20] ss:$4 sm:$0xff] %v2338_v19  ;;  %v750_v26 = vsel %vm748_vm4, %v7526_v42, %v743_v22  ;;  %v751_v32 = vsel %vm748_vm4, %v743_v22, %v745_v12 }
 0x143   : > { %6909 = vmatmul.msk.bf16.vlgmr.msrb.gmra.mxu0 %vm549_vm2, %v7478_v23  ;;  %6910 = vmatmul.msk.bf16.vlgmr.msrb.gmra.mxu1 %vm549_vm2, %v7520_v39  ;;  %v7620_v25 = vld.sshfl [vmem:[#allocation1 + $0x10] sm:$0xff pattern:$0x73625140]  ;;  %v760_v37 = vsel %vm476_vm0, %v750_v26, 0  ;;  %v763_v23 = vsel %vm476_vm0, %v751_v32, 0 }
 0x144   : > { %817 = vmatpush.bf16.msrb.mxu1 %v766_v10  ;;  %2467 = vst [vmem:[#allocation1] ss:$4 sm:$0xff] %v7389_v6  ;;  %791 = vmatpush.bf16.msra.mxu3 %v760_v37  ;;  %v7693_v12 = vld [vmem:[%s9940_s1 + $0xc] sm:$0xf] }
 0x145   : > { %804 = vmatpush.bf16.msrb.mxu0 %v763_v23 }
 0x147   : > { %v863_v43 = vpop.permute.xlu1 %862 }
 0x148   : > { %1848 = vrot.lane.b32.xlu0 %v7480_v24, %s7287_s20  ;;  %v872_v15 = vsel %vm870_vm5, %v863_v43, %v865_v11 }
 0x149   : > { %1731 = vrot.lane.b32.xlu2 %v7486_v27, %s7286_s17  ;;  %1850 = vrot.lane.b32.xlu1 %v7489_v16, %s7287_s20  ;;  %v7634_v42 = vld.sshfl [vmem:[#allocation1 + $0x20] sm:$0xff pattern:$0x73625140]  ;;  %v861_v47 = vpop.permute.xlu0 %860  ;;  %v7638_v52 = vld.sshfl [vmem:[#allocation1 + $0x28] sm:$0xff pattern:$0x73625140]  ;;  %v983_v16 = vpop.permute.xlu2 %982 }
 0x14a   : > { %v871_v53 = vsel %vm870_vm5, %v861_v47, %v863_v43  ;;  %2470 = vst [vmem:[#allocation1 + $0x20] ss:$4 sm:$0xff] %v2465_v46 }
 0x14b   : > { %v7636_v51 = vld.sshfl [vmem:[#allocation1] sm:$0xff pattern:$0x73625140]  ;;  %v7641_v54 = vld.sshfl [vmem:[#allocation1 + $0x8] sm:$0xff pattern:$0x73625140] }
 0x14c   : > { %v7643_v24 = vld.sshfl [vmem:[#allocation1 + $0x18] sm:$0xff pattern:$0x73625140]  ;;  %v7647_v27 = vld.sshfl [vmem:[#allocation1 + $0x10] sm:$0xff pattern:$0x73625140] }
 0x14d   : > { %6920 = vmatmul.msk.bf16.vlgmr.msrb.gmra.mxu2 %vm549_vm2, %v7584_v2  ;;  %2594 = vst [vmem:[#allocation1] ss:$4 sm:$0xff] %v7389_v6  ;;  %v879_v55 = vsel %vm476_vm0, %v871_v53, 0  ;;  %v882_v6 = vsel %vm476_vm0, %v872_v15, 0  ;;  %v2846_v15 = vld [vmem:[#allocation2 + $0xa] sm:$0xf] }
 0x14f   : > { %6912 = vmatmul.msk.bf16.vlgmr.msrb.gmra.mxu3 %vm549_vm2, %v7520_v39 }
 0x150   : > { %1854 = vrot.lane.b32.xlu0 %v7491_v28, %s7287_s20  ;;  %900 = vmatpush.bf16.msrb.mxu3 %v879_v55 }
 0x151   : > { %1852 = vrot.lane.b32.xlu2 %v7493_v30, %s7287_s20  ;;  %v867_v58 = vpop.permute.xlu0 %866  ;;  %1856 = vrot.lane.b32.xlu1 %v7501_v31, %s7287_s20  ;;  %v7666_v28 = vld.sshfl [vmem:[#allocation1 + $0x20] sm:$0xff pattern:$0x73625140]  ;;  %v7668_v30 = vld.sshfl [vmem:[#allocation1 + $0x28] sm:$0xff pattern:$0x73625140]  ;;  %v7683_v9 = vpop.permute.xlu2 %988 }
 0x152   : > { %v873_v29 = vsel %vm870_vm5, %v865_v11, %v867_v58  ;;  %2597 = vst [vmem:[#allocation1 + $0x20] ss:$4 sm:$0xff] %v2592_v61 }
 0x153   : > { %6913 = vmatmul.msk.bf16.vlgmr.msra.gmra.mxu0 %vm549_vm2, %v7520_v39  ;;  %v869_v0 = vpop.permute.xlu1 %868  ;;  %6914 = vmatmul.msk.bf16.vlgmr.msra.gmra.mxu1 %vm549_vm2, %v7520_v39  ;;  %v885_v3 = vsel %vm476_vm0, %v873_v29, 0 }
 0x154   : > { %913 = vmatpush.bf16.msra.mxu0 %v882_v6  ;;  %v874_v31 = vsel %vm870_vm5, %v867_v58, %v869_v0  ;;  %v7674_v4 = vld.sshfl [vmem:[#allocation1] sm:$0xff pattern:$0x73625140]  ;;  %926 = vmatpush.bf16.msra.mxu1 %v885_v3  ;;  %v7677_v7 = vld.sshfl [vmem:[#allocation1 + $0x8] sm:$0xff pattern:$0x73625140] }
 0x155   : > { %v888_v5 = vsel %vm476_vm0, %v874_v31, 0  ;;  %v7679_v39 = vld.sshfl [vmem:[#allocation1 + $0x18] sm:$0xff pattern:$0x73625140]  ;;  %v891_v23 = vsel %vm476_vm0, %v869_v0, 0 }
 0x156   : > { %939 = vmatpush.bf16.msra.mxu2 %v888_v5  ;;  %v7681_v8 = vld.sshfl [vmem:[#allocation1 + $0x10] sm:$0xff pattern:$0x73625140] }
 0x157   : > { %2721 = vst [vmem:[#allocation1] ss:$4 sm:$0xff] %v7670_v1 }
 0x158   : > { %1975 = vrot.lane.b32.xlu0 %v7503_v33, %s7288_s23 }
 0x159   : > { %1858 = vrot.lane.b32.xlu2 %v7505_v34, %s7287_s20  ;;  %v985_v13 = vpop.permute.xlu0 %984  ;;  %1977 = vrot.lane.b32.xlu1 %v7507_v35, %s7288_s23  ;;  %v7701_v33 = vld.sshfl [vmem:[#allocation1 + $0x20] sm:$0xff pattern:$0x73625140]  ;;  %v2719_v34 = vld [vmem:[#allocation2 + $0xa] sm:$0xf]  ;;  %v1107_v47 = vpop.permute.xlu2 %1106 }
 0x15a   : > { %v7704_v11 = vld.sshfl [vmem:[#allocation1 + $0x28] sm:$0xff pattern:$0x73625140]  ;;  %v993_v35 = vsel %vm992_vm6, %v983_v16, %v985_v13 }
 0x15b   : > { %v987_v19 = vpop.permute.xlu1 %986  ;;  %2724 = vst [vmem:[#allocation1 + $0x20] ss:$4 sm:$0xff] %v2719_v34 }
 0x15c   : > { %v995_v22 = vsel %vm992_vm6, %v987_v19, %v7683_v9  ;;  %v994_v43 = vsel %vm992_vm6, %v985_v13, %v987_v19 }
 0x15d   : > { %6925 = vmatmul.msk.bf16.vlgmr.msra.gmra.mxu2 %vm549_vm2, %v7693_v12  ;;  %v1007_v10 = vsel %vm476_vm0, %v995_v22, 0  ;;  %v1004_v55 = vsel %vm476_vm0, %v994_v43, 0 }
 0x15e   : > { %1048 = vmatpush.bf16.msrb.mxu2 %v1007_v10  ;;  %v7706_v26 = vld.sshfl [vmem:[#allocation1] sm:$0xff pattern:$0x73625140]  ;;  %v7709_v32 = vld.sshfl [vmem:[#allocation1 + $0x8] sm:$0xff pattern:$0x73625140] }
 0x15f   : > { %v7711_v37 = vld.sshfl [vmem:[#allocation1 + $0x18] sm:$0xff pattern:$0x73625140]  ;;  %6917 = vmatmul.msk.bf16.vlgmr.msra.gmra.mxu3 %vm549_vm2, %v7584_v2  ;;  %v7719_v46 = vld.sshfl [vmem:[#allocation1 + $0x10] sm:$0xff pattern:$0x73625140] }
 0x160   : > { %1981 = vrot.lane.b32.xlu0 %v7509_v36, %s7288_s23  ;;  %952 = vmatpush.bf16.msra.mxu3 %v891_v23  ;;  %2848 = vst [vmem:[#allocation1] ss:$4 sm:$0xff] %v7670_v1  ;;  %v1001_v36 = vsel %vm476_vm0, %v993_v35, 0 }
 0x161   : > { %1979 = vrot.lane.b32.xlu2 %v7511_v38, %s7288_s23  ;;  %v991_v53 = vpop.permute.xlu0 %990  ;;  %1983 = vrot.lane.b32.xlu1 %v7522_v40, %s7288_s23  ;;  %v7739_v40 = vld [vmem:[%s9940_s1 + $0x10] sm:$0xf]  ;;  %v7756_v31 = vpop.permute.xlu2 %1112 }
 0x162   : > { %v7732_v38 = vld.sshfl [vmem:[#allocation1 + $0x20] sm:$0xff pattern:$0x73625140]  ;;  %v7734_v58 = vld.sshfl [vmem:[#allocation1 + $0x28] sm:$0xff pattern:$0x73625140]  ;;  %v996_v13 = vsel %vm992_vm6, %v7683_v9, %v991_v53 }
 0x163   : > { %6918 = vmatmul.msk.bf16.vlgmr.msrb.gmra.mxu0 %vm549_vm2, %v7584_v2  ;;  %v1105_v16 = vpop.permute.xlu1 %1104  ;;  %6919 = vmatmul.msk.bf16.vlgmr.msrb.gmra.mxu1 %vm549_vm2, %v7584_v2  ;;  %2851 = vst [vmem:[#allocation1 + $0x20] ss:$4 sm:$0xff] %v2846_v15  ;;  %v1010_v34 = vsel %vm476_vm0, %v996_v13, 0  ;;  %v1013_v9 = vsel %vm476_vm0, %v991_v53, 0  ;;  %v3100_v53 = vld [vmem:[#allocation2 + $0xa] sm:$0xf] }
 0x164   : > { %1022 = vmatpush.bf16.msrb.mxu0 %v1001_v36  ;;  %1035 = vmatpush.bf16.msrb.mxu1 %v1004_v55  ;;  %v1115_v22 = vsel %vm1114_vm7, %v1105_v16, %v1107_v47 }
 0x167   : > { %v7743_v2 = vld.sshfl [vmem:[#allocation1] sm:$0xff pattern:$0x73625140]  ;;  %v7745_v6 = vld.sshfl [vmem:[#allocation1 + $0x8] sm:$0xff pattern:$0x73625140] }
 0x168   : > { %2102 = vrot.lane.b32.xlu0 %v7530_v44, %s7289_s12  ;;  %v7749_v61 = vld.sshfl [vmem:[#allocation1 + $0x18] sm:$0xff pattern:$0x73625140]  ;;  %v7751_v29 = vld.sshfl [vmem:[#allocation1 + $0x10] sm:$0xff pattern:$0x73625140] }
 0x169   : > { %1985 = vrot.lane.b32.xlu2 %v7524_v41, %s7288_s23  ;;  %v1109_v0 = vpop.permute.xlu0 %1108  ;;  %2104 = vrot.lane.b32.xlu1 %v7532_v45, %s7289_s12  ;;  %2975 = vst [vmem:[#allocation1] ss:$4 sm:$0xff] %v7670_v1  ;;  %v2973_v41 = vld [vmem:[#allocation2 + $0xa] sm:$0xf]  ;;  %v7797_v36 = vpop.permute.xlu2 %1230 }
 0x16a   : > { %v1116_v44 = vsel %vm1114_vm7, %v1107_v47, %v1109_v0  ;;  %v7764_v19 = vld.sshfl [vmem:[#allocation1 + $0x20] sm:$0xff pattern:$0x73625140]  ;;  %v7766_v45 = vld.sshfl [vmem:[#allocation1 + $0x28] sm:$0xff pattern:$0x73625140] }
 0x16b   : > { %v1111_v3 = vpop.permute.xlu1 %1110  ;;  %v1126_v5 = vsel %vm476_vm0, %v1116_v44, 0  ;;  %2978 = vst [vmem:[#allocation1 + $0x20] ss:$4 sm:$0xff] %v2973_v41  ;;  %v7811_v44 = vld [vmem:[%s9940_s1 + $0x14] sm:$0xf] }
 0x16c   : > { %1157 = vmatpush.bf16.msra.mxu2 %v1126_v5 }
 0x16d   : > { %6930 = vmatmul.msk.bf16.vlgmr.msrb.gmra.mxu2 %vm549_vm2, %v7739_v40 }
 0x16f   : > { %6922 = vmatmul.msk.bf16.vlgmr.msrb.gmra.mxu3 %vm549_vm2, %v7693_v12 }
 0x170   : > { %2108 = vrot.lane.b32.xlu0 %v7537_v49, %s7289_s12  ;;  %1061 = vmatpush.bf16.msrb.mxu3 %v1010_v34  ;;  %v7777_v10 = vld.sshfl [vmem:[#allocation1] sm:$0xff pattern:$0x73625140]  ;;  %v7783_v23 = vld.sshfl [vmem:[#allocation1 + $0x8] sm:$0xff pattern:$0x73625140]  ;;  %v1117_v34 = vsel %vm1114_vm7, %v1109_v0, %v1111_v3 }
 0x171   : > { %2106 = vrot.lane.b32.xlu2 %v7539_v50, %s7289_s12  ;;  %v1227_v35 = vpop.permute.xlu0 %1226  ;;  %2110 = vrot.lane.b32.xlu1 %v7562_v59, %s7289_s12  ;;  %v7785_v43 = vld.sshfl [vmem:[#allocation1 + $0x18] sm:$0xff pattern:$0x73625140]  ;;  %v1123_v49 = vsel %vm476_vm0, %v1115_v22, 0  ;;  %v1129_v0 = vsel %vm476_vm0, %v1117_v34, 0 }
 0x172   : > { %v7792_v50 = vld.sshfl [vmem:[#allocation1 + $0x10] sm:$0xff pattern:$0x73625140]  ;;  %v7800_v55 = vld.sshfl [vmem:[#allocation1 + $0x20] sm:$0xff pattern:$0x73625140] }
 0x173   : > { %6923 = vmatmul.msk.bf16.vlgmr.msra.gmra.mxu0 %vm549_vm2, %v7693_v12  ;;  %v7788_v47 = vpop.permute.xlu1 %1228  ;;  %6924 = vmatmul.msk.bf16.vlgmr.msra.gmra.mxu1 %vm549_vm2, %v7693_v12  ;;  %3102 = vst [vmem:[#allocation1] ss:$4 sm:$0xff] %v7670_v1  ;;  %v7802_v15 = vld.sshfl [vmem:[#allocation1 + $0x28] sm:$0xff pattern:$0x73625140] }
 0x174   : > { %1074 = vmatpush.bf16.msra.mxu0 %v1013_v9  ;;  %v1237_v59 = vsel %vm1236_vm8, %v1227_v35, %v7788_v47  ;;  %1144 = vmatpush.bf16.msra.mxu1 %v1123_v49  ;;  %3105 = vst [vmem:[#allocation1 + $0x20] ss:$4 sm:$0xff] %v3100_v53  ;;  %v3227_v35 = vld [vmem:[#allocation2 + $0xa] sm:$0xf]  ;;  %v7830_v49 = vpop.permute.xlu2 %1348 }
 0x175   : > { %v1245_v16 = vsel %vm476_vm0, %v1237_v59, 0  ;;  %v1118_v59 = vsel %vm1114_vm7, %v1111_v3, %v7756_v31 }
 0x176   : > { %1266 = vmatpush.bf16.msrb.mxu2 %v1245_v16 }
 0x178   : > { %2229 = vrot.lane.b32.xlu0 %v7558_v56, %s7290_s15 }
 0x179   : > { %2112 = vrot.lane.b32.xlu2 %v7564_v60, %s7289_s12  ;;  %v1233_v5 = vpop.permute.xlu0 %1232  ;;  %2231 = vrot.lane.b32.xlu1 %v7560_v57, %s7290_s15 }
 0x17a   : > { %v7815_v13 = vld.sshfl [vmem:[#allocation1] sm:$0xff pattern:$0x73625140]  ;;  %v7817_v22 = vld.sshfl [vmem:[#allocation1 + $0x8] sm:$0xff pattern:$0x73625140] }
 0x17b   : > { %v1235_v41 = vpop.permute.xlu1 %1234  ;;  %v7822_v60 = vld.sshfl [vmem:[#allocation1 + $0x18] sm:$0xff pattern:$0x73625140]  ;;  %v7825_v9 = vld.sshfl [vmem:[#allocation1 + $0x10] sm:$0xff pattern:$0x73625140] }
 0x17c   : > { %v1257_v56 = vsel %vm476_vm0, %v1235_v41, 0  ;;  %3229 = vst [vmem:[#allocation1] ss:$4 sm:$0xff] %v7670_v1  ;;  %v7828_v57 = vld.sshfl [vmem:[#allocation1 + $0x20] sm:$0xff pattern:$0x73625140] }
 0x17d   : > { %6935 = vmatmul.msk.bf16.vlgmr.msra.gmra.mxu2 %vm549_vm2, %v7811_v44  ;;  %v7834_v53 = vld.sshfl [vmem:[#allocation1 + $0x28] sm:$0xff pattern:$0x73625140] }
 0x17e   : > { %1318 = vmatpush.bf16.msra.mxu2 %v1257_v56  ;;  %3232 = vst [vmem:[#allocation1 + $0x20] ss:$4 sm:$0xff] %v3227_v35  ;;  %v3354_v56 = vld [vmem:[#allocation2 + $0xa] sm:$0xf] }
 0x17f   : > { %6926 = vmatmul.msk.bf16.vlgmr.msra.gmra.mxu3 %vm549_vm2, %v7693_v12  ;;  %v1132_v12 = vsel %vm476_vm0, %v1118_v59, 0 }
 0x180   : > { %2235 = vrot.lane.b32.xlu0 %v7568_v62, %s7290_s15  ;;  %1170 = vmatpush.bf16.msra.mxu3 %v1129_v0  ;;  %v1135_v62 = vsel %vm476_vm0, %v7756_v31, 0  ;;  %v7871_v31 = vpop.permute.xlu2 %1354 }
 0x181   : > { %2233 = vrot.lane.b32.xlu2 %v7570_v63, %s7290_s15  ;;  %v7843_v16 = vpop.permute.xlu0 %1350  ;;  %2237 = vrot.lane.b32.xlu1 %v7603_v18, %s7290_s15 }
 0x183   : > { %6928 = vmatmul.msk.bf16.vlgmr.msrb.gmra.mxu0 %vm549_vm2, %v7739_v40  ;;  %v7850_v3 = vpop.permute.xlu1 %1352  ;;  %6929 = vmatmul.msk.bf16.vlgmr.msrb.gmra.mxu1 %vm549_vm2, %v7739_v40  ;;  %v7856_v63 = vld.sshfl [vmem:[#allocation1] sm:$0xff pattern:$0x73625140]  ;;  %v7858_v34 = vld.sshfl [vmem:[#allocation1 + $0x8] sm:$0xff pattern:$0x73625140] }
 0x184   : > { %1183 = vmatpush.bf16.msrb.mxu0 %v1132_v12  ;;  %1196 = vmatpush.bf16.msrb.mxu1 %v1135_v62  ;;  %v7860_v18 = vld.sshfl [vmem:[#allocation1 + $0x18] sm:$0xff pattern:$0x73625140]  ;;  %v7862_v35 = vld.sshfl [vmem:[#allocation1 + $0x10] sm:$0xff pattern:$0x73625140] }
 0x185   : > { %9985 = vst [vmem:[#allocation4_spill] sm:$0xff] %v7860_v18  ;;  %v7864_v59 = vld.sshfl [vmem:[#allocation1 + $0x20] sm:$0xff pattern:$0x73625140]  ;;  %v7878_v12 = vld [vmem:[%s9940_s1 + $0x18] sm:$0xf] }
 0x186   : > { %9986 = vst [vmem:[#allocation5_spill] sm:$0xff] %v7862_v35  ;;  %v7869_v0 = vld.sshfl [vmem:[#allocation1 + $0x28] sm:$0xff pattern:$0x73625140]  ;;  %v1240_v35 = vsel %vm1236_vm8, %v1233_v5, %v1235_v41 }
 0x187   : > { %9987 = vst [vmem:[#allocation6_spill] sm:$0xff] %v7864_v59 }
 0x188   : > { %2356 = vrot.lane.b32.xlu0 %v7597_v14, %s7291_s19  ;;  %3356 = vst [vmem:[#allocation1] ss:$4 sm:$0xff] %v7670_v1  ;;  %v1238_v14 = vsel %vm1236_vm8, %v7788_v47, %v7797_v36  ;;  %v7923_v41 = vpop.permute.xlu2 %1472 }
 0x189   : > { %9988 = vst [vmem:[#allocation7_spill] sm:$0xff] %v7869_v0  ;;  %2239 = vrot.lane.b32.xlu2 %v7611_v17, %s7290_s15  ;;  %v7880_v62 = vpop.permute.xlu0 %1356  ;;  %2358 = vrot.lane.b32.xlu1 %v7605_v20, %s7291_s19  ;;  %v1248_v0 = vsel %vm476_vm0, %v1238_v14, 0  ;;  %v1239_v20 = vsel %vm1236_vm8, %v7797_v36, %v1233_v5  ;;  %v3481_v14 = vld [vmem:[#allocation2 + $0xa] sm:$0xf] }
 0x18a   : > { %3359 = vst [vmem:[#allocation1 + $0x20] ss:$4 sm:$0xff] %v3354_v56  ;;  %v1362_v17 = vsel %vm9984_vm9, %v7871_v31, %v7880_v62 }
 0x18b   : > { %v7890_v48 = vpop.permute.xlu1 %1470  ;;  %v1376_v56 = vsel %vm476_vm0, %v1362_v17, 0 }
 0x18d   : > { %6940 = vmatmul.msk.bf16.vlgmr.msrb.gmra.mxu2 %vm549_vm2, %v7878_v12 }
 0x18e   : > { %1427 = vmatpush.bf16.msrb.mxu2 %v1376_v56 }
 0x18f   : > { %v7898_v59 = vld.sshfl [vmem:[#allocation1] sm:$0xff pattern:$0x73625140]  ;;  %v7900_v47 = vld.sshfl [vmem:[#allocation1 + $0x8] sm:$0xff pattern:$0x73625140]  ;;  %6931 = vmatmul.msk.bf16.vlgmr.msrb.gmra.mxu3 %vm549_vm2, %v7739_v40 }
 0x190   : > { %2362 = vrot.lane.b32.xlu0 %v7613_v21, %s7291_s19  ;;  %v7907_v18 = vld.sshfl [vmem:[#allocation1 + $0x18] sm:$0xff pattern:$0x73625140]  ;;  %v7909_v17 = vld.sshfl [vmem:[#allocation1 + $0x10] sm:$0xff pattern:$0x73625140]  ;;  %1279 = vmatpush.bf16.msrb.mxu3 %v1248_v0 }
 0x191   : > { %2360 = vrot.lane.b32.xlu2 %v7620_v25, %s7291_s19  ;;  %3483 = vst [vmem:[#allocation1] ss:$4 sm:$0xff] %v7670_v1  ;;  %v7914_v36 = vld.sshfl [vmem:[#allocation1 + $0x20] sm:$0xff pattern:$0x73625140]  ;;  %2364 = vrot.lane.b32.xlu1 %v7634_v42, %s7291_s19  ;;  %v1251_v21 = vsel %vm476_vm0, %v1239_v20, 0  ;;  %v7928_v0 = vpop.permute.xlu0 %1474 }
 0x192   : > { %v7921_v5 = vld.sshfl [vmem:[#allocation1 + $0x28] sm:$0xff pattern:$0x73625140]  ;;  %v1254_v25 = vsel %vm476_vm0, %v1240_v35, 0 }
 0x193   : > { %6932 = vmatmul.msk.bf16.vlgmr.msra.gmra.mxu0 %vm549_vm2, %v7739_v40  ;;  %6934 = vmatmul.msk.bf16.vlgmr.msra.gmra.mxu1 %vm549_vm2, %v7811_v44  ;;  %3486 = vst [vmem:[#allocation1 + $0x20] ss:$4 sm:$0xff] %v3481_v14  ;;  %v7930_v42 = vpop.permute.xlu1 %1476 }
 0x194   : > { %1292 = vmatpush.bf16.msra.mxu0 %v1251_v21  ;;  %1305 = vmatpush.bf16.msra.mxu1 %v1254_v25  ;;  %v1483_v35 = vsel %vm9983_vm10, %v7928_v0, %v7930_v42  ;;  %v3608_v21 = vld [vmem:[#allocation2 + $0xa] sm:$0xf] }
 0x198   : > { %2483 = vrot.lane.b32.xlu0 %v7636_v51, %s7292_s26  ;;  %v7934_v40 = vld.sshfl [vmem:[#allocation1] sm:$0xff pattern:$0x73625140]  ;;  %v7936_v56 = vld.sshfl [vmem:[#allocation1 + $0x8] sm:$0xff pattern:$0x73625140] }
 0x199   : > { %2366 = vrot.lane.b32.xlu2 %v7638_v52, %s7291_s19  ;;  %v7943_v20 = vld.sshfl [vmem:[#allocation1 + $0x18] sm:$0xff pattern:$0x73625140]  ;;  %v7945_v14 = vld.sshfl [vmem:[#allocation1 + $0x10] sm:$0xff pattern:$0x73625140]  ;;  %2485 = vrot.lane.b32.xlu1 %v7641_v54, %s7292_s26  ;;  %v1360_v54 = vsel %vm9984_vm9, %v7843_v16, %v7850_v3 }
 0x19a   : > { %9989 = vst [vmem:[#allocation8_spill] sm:$0xff] %v7943_v20  ;;  %v7950_v51 = vld.sshfl [vmem:[#allocation1 + $0x20] sm:$0xff pattern:$0x73625140]  ;;  %v1495_v52 = vsel %vm476_vm0, %v1483_v35, 0  ;;  %v7960_v20 = vpop.permute.xlu2 %1478  ;;  %v1361_v35 = vsel %vm9984_vm9, %v7850_v3, %v7871_v31 }
 0x19b   : > { %9990 = vst [vmem:[#allocation9_spill] sm:$0xff] %v7945_v14  ;;  %v7952_v25 = vld.sshfl [vmem:[#allocation1 + $0x28] sm:$0xff pattern:$0x73625140]  ;;  %v1359_v14 = vsel %vm9984_vm9, %v7830_v49, %v7843_v16  ;;  %v1370_v16 = vsel %vm476_vm0, %v1360_v54, 0 }
 0x19c   : > { %3610 = vst [vmem:[#allocation1] ss:$4 sm:$0xff] %v7670_v1  ;;  %v1367_v49 = vsel %vm476_vm0, %v1359_v14, 0 }
 0x19d   : > { %9991 = vst [vmem:[#allocation10_spill] sm:$0xff] %v7950_v51  ;;  %6944 = vmatmul.msk.bf16.vlgmr.msra.gmra.mxu2 %vm549_vm2, %v7878_v12  ;;  %v7965_v51 = vpop.permute.xlu0 %1594 }
 0x19e   : > { %9992 = vst [vmem:[#allocation11_spill] sm:$0xff] %v7952_v25  ;;  %1536 = vmatpush.bf16.msra.mxu2 %v1495_v52 }
 0x19f   : > { %3613 = vst [vmem:[#allocation1 + $0x20] ss:$4 sm:$0xff] %v3608_v21  ;;  %6936 = vmatmul.msk.bf16.vlgmr.msra.gmra.mxu3 %vm549_vm2, %v7811_v44  ;;  %v7977_v21 = vpop.permute.xlu1 %1596 }
 0x1a0   : > { %v7967_v25 = vpop.f32.mrf.mxu2  ;;  %2489 = vrot.lane.b32.xlu0 %v7643_v24, %s7292_s26  ;;  %1388 = vmatpush.bf16.msra.mxu3 %v1367_v49  ;;  %v1373_v24 = vsel %vm476_vm0, %v1361_v35, 0 }
 0x1a1   : > { %2487 = vrot.lane.b32.xlu2 %v7647_v27, %s7292_s26  ;;  %2491 = vrot.lane.b32.xlu1 %v7666_v28, %s7292_s26  ;;  %v3735_v28 = vld [vmem:[#allocation2 + $0xa] sm:$0xf] }
 0x1a2   : > { %v8002_v49 = vpop.permute.xlu2 %1598 }
 0x1a3   : > { %v7982_v52 = vld.sshfl [vmem:[#allocation1] sm:$0xff pattern:$0x73625140]  ;;  %6937 = vmatmul.msk.bf16.vlgmr.msrb.gmra.mxu0 %vm549_vm2, %v7811_v44  ;;  %v7988_v3 = vld.sshfl [vmem:[#allocation1 + $0x8] sm:$0xff pattern:$0x73625140]  ;;  %6938 = vmatmul.msk.bf16.vlgmr.msrb.gmra.mxu1 %vm549_vm2, %v7811_v44 }
 0x1a4   : > { %v7990_v31 = vld.sshfl [vmem:[#allocation1 + $0x18] sm:$0xff pattern:$0x73625140]  ;;  %1401 = vmatpush.bf16.msrb.mxu0 %v1370_v16  ;;  %v7995_v27 = vld.sshfl [vmem:[#allocation1 + $0x10] sm:$0xff pattern:$0x73625140]  ;;  %1414 = vmatpush.bf16.msrb.mxu1 %v1373_v24 }
 0x1a5   : > { %9993 = vst [vmem:[#allocation12_spill] sm:$0xff] %v7990_v31  ;;  %v8004_v16 = vpop.permute.xlu0 %1600  ;;  %v8016_v44 = vld [vmem:[%s9940_s1 + $0x1c] sm:$0xf] }
 0x1a6   : > { %3737 = vst [vmem:[#allocation1] ss:$4 sm:$0xff] %v7670_v1  ;;  %v7998_v14 = vld.sshfl [vmem:[#allocation1 + $0x20] sm:$0xff pattern:$0x73625140]  ;;  %v1608_v1 = vsel %vm9967_vm11, %v7977_v21, %v8002_v49 }
 0x1a7   : > { %v8000_v54 = vld.sshfl [vmem:[#allocation1 + $0x28] sm:$0xff pattern:$0x73625140]  ;;  %v8018_v35 = vpop.permute.xlu1 %1602 }
 0x1a8   : > { %v605_v31 = vpop.f32.mrf.mxu2  ;;  %3740 = vst [vmem:[#allocation1 + $0x20] ss:$4 sm:$0xff] %v3735_v28  ;;  %2610 = vrot.lane.b32.xlu0 %v7674_v4, %s7293_s11  ;;  %v1619_v4 = vsel %vm476_vm0, %v1608_v1, 0  ;;  %v1482_v28 = vsel %vm9983_vm10, %v7923_v41, %v7928_v0 }
 0x1a9   : > { %2493 = vrot.lane.b32.xlu2 %v7668_v30, %s7292_s26  ;;  %2612 = vrot.lane.b32.xlu1 %v7677_v7, %s7293_s11  ;;  %v1481_v30 = vsel %vm9983_vm10, %v7890_v48, %v7923_v41  ;;  %v1379_v7 = vsel %vm476_vm0, %v7880_v62, 0 }
 0x1aa   : > { %v1489_v41 = vsel %vm476_vm0, %v1481_v30, 0 }
 0x1ad   : > { %6949 = vmatmul.msk.bf16.vlgmr.msrb.gmra.mxu2 %vm549_vm2, %v8016_v44  ;;  %v1722_v0 = vpop.permute.xlu0 %1721 }
 0x1ae   : > { %1650 = vmatpush.bf16.msrb.mxu2 %v1619_v4  ;;  %v8037_v4 = vpop.permute.xlu2 %1604 }
 0x1af   : > { %6941 = vmatmul.msk.bf16.vlgmr.msrb.gmra.mxu3 %vm549_vm2, %v7878_v12  ;;  %v8051_v62 = vpop.permute.xlu1 %1723 }
 0x1b0   : > { %v577_v31 = vpop.f32.mrf.mxu0  ;;  %v590_v24 = vpop.f32.mrf.mxu1  ;;  %2616 = vrot.lane.b32.xlu0 %v7679_v39, %s7293_s11  ;;  %1440 = vmatpush.bf16.msrb.mxu3 %v1379_v7  ;;  %v1492_v39 = vsel %vm476_vm0, %v1482_v28, 0  ;;  %v1734_v30 = vsel %vm9950_vm13, %v1722_v0, %v8051_v62 }
 0x1b1   : > { %v676_v1 = vpop.f32.mrf.mxu2  ;;  %2614 = vrot.lane.b32.xlu2 %v7681_v8, %s7293_s11  ;;  %2618 = vrot.lane.b32.xlu1 %v7701_v33, %s7293_s11 }
 0x1b2   : > { %v8041_v48 = vadd.f32 %v676_v1, %v590_v24 }
 0x1b3   : > { %6942 = vmatmul.msk.bf16.vlgmr.msra.gmra.mxu0 %vm549_vm2, %v7878_v12  ;;  %6943 = vmatmul.msk.bf16.vlgmr.msra.gmra.mxu1 %vm549_vm2, %v7878_v12  ;;  %v8062_v12 = vld [vmem:[%s9940_s1 + $0x20] sm:$0xf] }
 0x1b4   : > { %1510 = vmatpush.bf16.msra.mxu0 %v1489_v41  ;;  %1523 = vmatpush.bf16.msra.mxu1 %v1492_v39 }
 0x1b5   : > { %v8068_v7 = vpop.permute.xlu0 %1727 }
 0x1b6   : > { %v8066_v28 = vpop.permute.xlu2 %1725 }
 0x1b7   : > { %v8076_v1 = vpop.permute.xlu1 %1729 }
 0x1b8   : > { %v579_v8 = vpop.f32.mrf.mxu0  ;;  %v592_v24 = vpop.f32.mrf.mxu1  ;;  %2737 = vrot.lane.b32.xlu0 %v7706_v26, %s9948_s24  ;;  %v1743_v26 = vsel %vm476_vm0, %v1734_v30, 0 }
 0x1b9   : > { %v678_v33 = vpop.f32.mrf.mxu2  ;;  %2620 = vrot.lane.b32.xlu2 %v7704_v11, %s7293_s11  ;;  %2739 = vrot.lane.b32.xlu1 %v7709_v32, %s9948_s24  ;;  %v1484_v11 = vsel %vm9983_vm10, %v7930_v42, %v7960_v20  ;;  %v1607_v32 = vsel %vm9967_vm11, %v7965_v51, %v7977_v21  ;;  %v1501_v51 = vsel %vm476_vm0, %v7960_v20, 0  ;;  %vm3923_vm10 = vcmask 1047556  }
 0x1ba   : > { %v1498_v39 = vsel %vm476_vm0, %v1484_v11, 0  ;;  %v1616_v21 = vsel %vm476_vm0, %v1607_v32, 0  ;;  %v8112_v11 = vld [vmem:[%s9940_s1 + $0x24] sm:$0xf]  ;;  %v1609_v32 = vsel %vm9967_vm11, %v8002_v49, %v8004_v16 }
 0x1bb   : > { %v1622_v49 = vsel %vm476_vm0, %v1609_v32, 0  ;;  %v1736_v32 = vsel %vm9950_vm13, %v8066_v28, %v8068_v7 }
 0x1bd   : > { %6954 = vmatmul.msk.bf16.vlgmr.msra.gmra.mxu2 %vm549_vm2, %v8062_v12 }
 0x1be   : > { %1764 = vmatpush.bf16.msra.mxu2 %v1743_v26 }
 0x1bf   : > { %6946 = vmatmul.msk.bf16.vlgmr.msra.gmra.mxu3 %vm549_vm2, %v8016_v44  ;;  %v8105_v26 = vpop.permute.xlu1 %1850 }
 0x1c0   : > { %v629_v41 = vpop.f32.mrf.mxu0  ;;  %v663_v0 = vpop.f32.mrf.mxu1  ;;  %2743 = vrot.lane.b32.xlu0 %v7711_v37, %s9948_s24  ;;  %1549 = vmatpush.bf16.msra.mxu3 %v1498_v39 }
 0x1c1   : > { %v664_v8 = vadd.f32 %v663_v0, %v577_v31  ;;  %v780_v24 = vpop.f32.mrf.mxu2  ;;  %2741 = vrot.lane.b32.xlu2 %v7719_v46, %s9948_s24  ;;  %2745 = vrot.lane.b32.xlu1 %v7732_v38, %s9948_s24  ;;  %v1732_v46 = vpop.permute.xlu2 %1731 }
 0x1c2   : > { %v616_v37 = vpop.f32.mrf.mxu3  ;;  %v8099_v31 = vpop.permute.xlu0 %1848  ;;  %v1738_v20 = vsel %vm9950_vm13, %v8076_v1, %v1732_v46 }
 0x1c3   : > { %v8090_v42 = vadd.f32 %v780_v24, %v664_v8  ;;  %6947 = vmatmul.msk.bf16.vlgmr.msrb.gmra.mxu0 %vm549_vm2, %v8016_v44  ;;  %6948 = vmatmul.msk.bf16.vlgmr.msrb.gmra.mxu1 %vm549_vm2, %v8016_v44 }
 0x1c4   : > { %1562 = vmatpush.bf16.msrb.mxu0 %v1501_v51  ;;  %1637 = vmatpush.bf16.msrb.mxu1 %v1616_v21 }
 0x1c8   : > { %v631_v38 = vpop.f32.mrf.mxu0  ;;  %v665_v33 = vpop.f32.mrf.mxu1  ;;  %2864 = vrot.lane.b32.xlu0 %v7743_v2, %s9953_s18  ;;  %v1755_v2 = vsel %vm476_vm0, %v1738_v20, 0 }
 0x1c9   : > { %v782_v30 = vpop.f32.mrf.mxu2  ;;  %2747 = vrot.lane.b32.xlu2 %v7734_v58, %s9948_s24  ;;  %2866 = vrot.lane.b32.xlu1 %v7745_v6, %s9953_s18  ;;  %v1610_v58 = vsel %vm9967_vm11, %v8004_v16, %v8018_v35  ;;  %v8125_v39 = vpop.permute.xlu2 %1852  ;;  %v1611_v6 = vsel %vm9967_vm11, %v8018_v35, %v8037_v4  ;;  %s9956_s24 = smov 46   ;;  %vm9969_vm11 = vcmask 457728  }
 0x1ca   : > { %v618_v0 = vpop.f32.mrf.mxu3  ;;  %v8135_v46 = vpop.permute.xlu0 %1854 }
 0x1cd   : > { %6959 = vmatmul.msk.bf16.vlgmr.msrb.gmra.mxu2 %vm549_vm2, %v8112_v11 }
 0x1ce   : > { %1816 = vmatpush.bf16.msrb.mxu2 %v1755_v2 }
 0x1cf   : > { %6950 = vmatmul.msk.bf16.vlgmr.msrb.gmra.mxu3 %vm549_vm2, %v8016_v44  ;;  %v8144_v44 = vpop.permute.xlu1 %1856 }
 0x1d0   : > { %v702_v8 = vpop.f32.mrf.mxu0  ;;  %2870 = vrot.lane.b32.xlu0 %v7749_v61, %s9953_s18  ;;  %v715_v51 = vpop.f32.mrf.mxu1  ;;  %1663 = vmatpush.bf16.msrb.mxu3 %v1622_v49  ;;  %v1625_v61 = vsel %vm476_vm0, %v1610_v58, 0  ;;  %v1864_v30 = vsel %vm9955_vm14, %v8135_v46, %v8144_v44  ;;  %v1737_v58 = vsel %vm9950_vm13, %v8068_v7, %v8076_v1 }
 0x1d1   : > { %v703_v24 = vadd.f32 %v702_v8, %v616_v37  ;;  %v832_v21 = vpop.f32.mrf.mxu2  ;;  %2868 = vrot.lane.b32.xlu2 %v7751_v29, %s9953_s18  ;;  %v716_v16 = vadd.f32 %v715_v51, %v629_v41  ;;  %2872 = vrot.lane.b32.xlu1 %v7764_v19, %s9953_s18  ;;  %v1628_v29 = vsel %vm476_vm0, %v1611_v6, 0  ;;  %v8154_v33 = vpop.permute.xlu2 %1858  ;;  %v1879_v0 = vsel %vm476_vm0, %v1864_v30, 0 }
 0x1d2   : > { %v689_v35 = vpop.f32.mrf.mxu3 }
 0x1d3   : > { %6952 = vmatmul.msk.bf16.vlgmr.msra.gmra.mxu0 %vm549_vm2, %v8062_v12  ;;  %v8146_v4 = vadd.f32 %v832_v21, %v716_v16  ;;  %6953 = vmatmul.msk.bf16.vlgmr.msra.gmra.mxu1 %vm549_vm2, %v8062_v12  ;;  %v690_v41 = vadd.f32 %v689_v35, %v7967_v25  ;;  %v8164_v25 = vld [vmem:[%s9940_s1 + $0x28] sm:$0xf] }
 0x1d4   : > { %1676 = vmatpush.bf16.msra.mxu0 %v1625_v61  ;;  %1689 = vmatpush.bf16.msra.mxu1 %v1628_v29 }
 0x1d7   : > { %v8176_v2 = vpop.permute.xlu1 %1977 }
 0x1d8   : > { %v704_v19 = vpop.f32.mrf.mxu0  ;;  %2991 = vrot.lane.b32.xlu0 %v7777_v10, %s9951_s25  ;;  %v717_v37 = vpop.f32.mrf.mxu1 }
 0x1d9   : > { %v834_v38 = vpop.f32.mrf.mxu2  ;;  %2874 = vrot.lane.b32.xlu2 %v7766_v45, %s9953_s18  ;;  %2993 = vrot.lane.b32.xlu1 %v7783_v23, %s9951_s25  ;;  %v8168_v10 = vpop.permute.xlu0 %1975  ;;  %v1735_v45 = vsel %vm9950_vm13, %v8051_v62, %v8066_v28  ;;  %v1863_v37 = vsel %vm9955_vm14, %v8125_v39, %v8135_v46  ;;  %vm9960_vm13 = vcmask 138240   ;;  %s9961_s18 = smov 44  }
 0x1da   : > { %v691_v20 = vpop.f32.mrf.mxu3  ;;  %v1746_v62 = vsel %vm476_vm0, %v1735_v45, 0  ;;  %v8196_v7 = vpop.permute.xlu2 %1979  ;;  %v1876_v45 = vsel %vm476_vm0, %v1863_v37, 0 }
 0x1dd   : > { %6964 = vmatmul.msk.bf16.vlgmr.msra.gmra.mxu2 %vm549_vm2, %v8164_v25 }
 0x1de   : > { %1930 = vmatpush.bf16.msra.mxu2 %v1879_v0 }
 0x1df   : > { %6955 = vmatmul.msk.bf16.vlgmr.msra.gmra.mxu3 %vm549_vm2, %v8062_v12 }
 0x1e0   : > { %v806_v23 = vpop.f32.mrf.mxu0  ;;  %2997 = vrot.lane.b32.xlu0 %v7785_v43, %s9951_s25  ;;  %v819_v6 = vpop.f32.mrf.mxu1  ;;  %1777 = vmatpush.bf16.msra.mxu3 %v1746_v62  ;;  %v1749_v43 = vsel %vm476_vm0, %v1736_v32, 0 }
 0x1e1   : > { %v838_v8 = vadd.f32 %v806_v23, %v690_v41  ;;  %v941_v49 = vpop.f32.mrf.mxu2  ;;  %2995 = vrot.lane.b32.xlu2 %v7792_v50, %s9951_s25  ;;  %v839_v28 = vadd.f32 %v819_v6, %v703_v24  ;;  %2999 = vrot.lane.b32.xlu1 %v7800_v55, %s9951_s25  ;;  %v1752_v50 = vsel %vm476_vm0, %v1737_v58, 0  ;;  %v8204_v55 = vpop.permute.xlu0 %1981 }
 0x1e2   : > { %v793_v1 = vpop.f32.mrf.mxu3  ;;  %v1990_v35 = vsel %vm9964_vm15, %v8196_v7, %v8204_v55  ;;  %v8223_v41 = vpop.permute.xlu2 %1985 }
 0x1e3   : > { %6956 = vmatmul.msk.bf16.vlgmr.msrb.gmra.mxu0 %vm549_vm2, %v8062_v12  ;;  %v8198_v51 = vadd.f32 %v941_v49, %v839_v28  ;;  %6958 = vmatmul.msk.bf16.vlgmr.msrb.gmra.mxu1 %vm549_vm2, %v8112_v11  ;;  %v837_v24 = vadd.f32 %v793_v1, %v8041_v48  ;;  %v8206_v12 = vpop.permute.xlu1 %1983  ;;  %v2003_v29 = vsel %vm476_vm0, %v1990_v35, 0  ;;  %v1988_v49 = vsel %vm9964_vm15, %v8168_v10, %v8176_v2  ;;  %v9995_v10 = vld [vmem:[#allocation5_spill] sm:$0xff] }
 0x1e4   : > { %1790 = vmatpush.bf16.msrb.mxu0 %v1749_v43  ;;  %1803 = vmatpush.bf16.msrb.mxu1 %v1752_v50  ;;  %v9994_v43 = vld [vmem:[#allocation4_spill] sm:$0xff] }
 0x1e8   : > { %v808_v21 = vpop.f32.mrf.mxu0  ;;  %3118 = vrot.lane.b32.xlu0 %v7815_v13, %s9956_s24  ;;  %v821_v16 = vpop.f32.mrf.mxu1  ;;  %v1861_v13 = vsel %vm9955_vm14, %v8099_v31, %v8105_v26 }
 0x1e9   : > { %v943_v61 = vpop.f32.mrf.mxu2  ;;  %3001 = vrot.lane.b32.xlu2 %v7802_v15, %s9951_s25  ;;  %3120 = vrot.lane.b32.xlu1 %v7817_v22, %s9956_s24  ;;  %v1862_v15 = vsel %vm9955_vm14, %v8105_v26, %v8125_v39  ;;  %v8228_v19 = vpop.permute.xlu0 %2102  ;;  %v1870_v31 = vsel %vm476_vm0, %v1861_v13, 0 }
 0x1ea   : > { %v795_v48 = vpop.f32.mrf.mxu3  ;;  %v8253_v32 = vpop.permute.xlu2 %2106 }
 0x1eb   : > { %v8238_v0 = vpop.permute.xlu1 %2104 }
 0x1ec   : > { %v2116_v62 = vsel %vm9960_vm13, %v8238_v0, %v8253_v32 }
 0x1ed   : > { %6968 = vmatmul.msk.bf16.vlgmr.msrb.gmra.mxu2 %vm549_vm2, %v8164_v25  ;;  %v2127_v6 = vsel %vm476_vm0, %v2116_v62, 0 }
 0x1ee   : > { %2044 = vmatpush.bf16.msrb.mxu2 %v2003_v29 }
 0x1ef   : > { %6960 = vmatmul.msk.bf16.vlgmr.msrb.gmra.mxu3 %vm549_vm2, %v8112_v11 }
 0x1f0   : > { %v915_v22 = vpop.f32.mrf.mxu0  ;;  %3124 = vrot.lane.b32.xlu0 %v7822_v60, %s9956_s24  ;;  %v928_v30 = vpop.f32.mrf.mxu1  ;;  %1891 = vmatpush.bf16.msrb.mxu3 %v1870_v31  ;;  %v1873_v60 = vsel %vm476_vm0, %v1862_v15, 0 }
 0x1f1   : > { %v959_v38 = vadd.f32 %v915_v22, %v837_v24  ;;  %v1050_v20 = vpop.f32.mrf.mxu2  ;;  %3122 = vrot.lane.b32.xlu2 %v7825_v9, %s9956_s24  ;;  %v960_v26 = vadd.f32 %v928_v30, %v838_v8  ;;  %3126 = vrot.lane.b32.xlu1 %v7828_v57, %s9956_s24 }
 0x1f2   : > { %v902_v39 = vpop.f32.mrf.mxu3  ;;  %v8290_v24 = vpop.permute.xlu2 %2112 }
 0x1f3   : > { %6961 = vmatmul.msk.bf16.vlgmr.msra.gmra.mxu0 %vm549_vm2, %v8112_v11  ;;  %v8247_v46 = vadd.f32 %v1050_v20, %v960_v26  ;;  %6962 = vmatmul.msk.bf16.vlgmr.msra.gmra.mxu1 %vm549_vm2, %v8112_v11  ;;  %v958_v9 = vadd.f32 %v902_v39, %v8090_v42  ;;  %v8260_v11 = vpop.permute.xlu0 %2108  ;;  %v8267_v42 = vld [vmem:[%s9940_s1 + $0x2c] sm:$0xf]  ;;  %v1991_v20 = vsel %vm9964_vm15, %v8204_v55, %v8206_v12 }
 0x1f4   : > { %1904 = vmatpush.bf16.msra.mxu0 %v1873_v60  ;;  %1917 = vmatpush.bf16.msra.mxu1 %v1876_v45  ;;  %v1992_v60 = vsel %vm9964_vm15, %v8206_v12, %v8223_v41  ;;  %v2115_v45 = vsel %vm9960_vm13, %v8228_v19, %v8238_v0  ;;  %v2006_v55 = vsel %vm476_vm0, %v1991_v20, 0 }
 0x1f5   : > { %v2124_v0 = vsel %vm476_vm0, %v2115_v45, 0 }
 0x1f8   : > { %v917_v57 = vpop.f32.mrf.mxu0  ;;  %3245 = vrot.lane.b32.xlu0 %v7856_v63, %s9958_s16  ;;  %v930_v23 = vpop.f32.mrf.mxu1 }
 0x1f9   : > { %v1052_v58 = vpop.f32.mrf.mxu2  ;;  %3128 = vrot.lane.b32.xlu2 %v7834_v53, %s9956_s24  ;;  %3247 = vrot.lane.b32.xlu1 %v7858_v34, %s9958_s16  ;;  %v8271_v63 = vpop.permute.xlu1 %2110  ;;  %v1865_v53 = vsel %vm9955_vm14, %v8144_v44, %v8154_v33  ;;  %v1989_v34 = vsel %vm9964_vm15, %v8176_v2, %v8196_v7  ;;  %v9996_v2 = vld [vmem:[#allocation6_spill] sm:$0xff]  ;;  %v1997_v7 = vsel %vm476_vm0, %v1988_v49, 0  ;;  %vm9963_vm14 = vcmask 130048   ;;  %s9978_s24 = smov 36  }
 0x1fa   : > { %v904_v8 = vpop.f32.mrf.mxu3  ;;  %v1882_v1 = vsel %vm476_vm0, %v1865_v53, 0  ;;  %v2000_v48 = vsel %vm476_vm0, %v1989_v34, 0  ;;  %v2117_v34 = vsel %vm9960_vm13, %v8253_v32, %v8260_v11  ;;  %vm9968_vm15 = vcmask 48128  }
 0x1fb   : > { %v2230_v16 = vpop.permute.xlu0 %2229  ;;  %v2130_v32 = vsel %vm476_vm0, %v2117_v34, 0 }
 0x1fd   : > { %6973 = vmatmul.msk.bf16.vlgmr.msra.gmra.mxu2 %vm549_vm2, %v8267_v42 }
 0x1fe   : > { %2158 = vmatpush.bf16.msra.mxu2 %v2127_v6 }
 0x1ff   : > { %6965 = vmatmul.msk.bf16.vlgmr.msra.gmra.mxu3 %vm549_vm2, %v8164_v25 }
 0x200   : > { %v1024_v28 = vpop.f32.mrf.mxu0  ;;  %3251 = vrot.lane.b32.xlu0 %v9994_v43, %s9958_s16  ;;  %v1037_v44 = vpop.f32.mrf.mxu1  ;;  %1943 = vmatpush.bf16.msra.mxu3 %v1882_v1 }
 0x201   : > { %v1080_v50 = vadd.f32 %v1024_v28, %v958_v9  ;;  %v1159_v33 = vpop.f32.mrf.mxu2  ;;  %3249 = vrot.lane.b32.xlu2 %v9995_v10, %s9958_s16  ;;  %v1081_v21 = vadd.f32 %v1037_v44, %v959_v38  ;;  %3253 = vrot.lane.b32.xlu1 %v9996_v2, %s9958_s16  ;;  %v8305_v13 = vpop.permute.xlu1 %2231 }
 0x202   : > { %v954_v61 = vpop.f32.mrf.mxu3  ;;  %v2242_v31 = vsel %vm9963_vm14, %v2230_v16, %v8305_v13  ;;  %v8320_v38 = vpop.permute.xlu2 %2233 }
 0x203   : > { %6966 = vmatmul.msk.bf16.vlgmr.msrb.gmra.mxu0 %vm549_vm2, %v8164_v25  ;;  %v8299_v35 = vadd.f32 %v1159_v33, %v1081_v21  ;;  %6967 = vmatmul.msk.bf16.vlgmr.msrb.gmra.mxu1 %vm549_vm2, %v8164_v25  ;;  %v962_v29 = vadd.f32 %v954_v61, %v8146_v4  ;;  %v9997_v25 = vld [vmem:[#allocation7_spill] sm:$0xff]  ;;  %v8328_v26 = vpop.permute.xlu0 %2235  ;;  %v2243_v20 = vsel %vm9963_vm14, %v8305_v13, %v8320_v38 }
 0x204   : > { %2018 = vmatpush.bf16.msrb.mxu0 %v1997_v7  ;;  %2031 = vmatpush.bf16.msrb.mxu1 %v2000_v48  ;;  %v8316_v4 = vld [vmem:[%s9940_s1 + $0x30] sm:$0xf]  ;;  %v2254_v13 = vsel %vm476_vm0, %v2243_v20, 0 }
 0x208   : > { %v1026_v15 = vpop.f32.mrf.mxu0  ;;  %3372 = vrot.lane.b32.xlu0 %v7898_v59, %s9961_s18  ;;  %v1039_v22 = vpop.f32.mrf.mxu1  ;;  %v2251_v59 = vsel %vm476_vm0, %v2242_v31, 0 }
 0x209   : > { %v1161_v37 = vpop.f32.mrf.mxu2  ;;  %3255 = vrot.lane.b32.xlu2 %v9997_v25, %s9958_s16  ;;  %3374 = vrot.lane.b32.xlu1 %v7900_v47, %s9961_s18  ;;  %v8333_v47 = vpop.permute.xlu1 %2237  ;;  %s9965_s16 = smov 35   ;;  %v10001_v25 = vld [vmem:[#allocation11_spill] sm:$0xff] }
 0x20a   : > { %v956_v30 = vpop.f32.mrf.mxu3  ;;  %v2240_v58 = vpop.permute.xlu2 %2239  ;;  %v2245_v45 = vsel %vm9963_vm14, %v8328_v26, %v8333_v47 }
 0x20b   : > { %v8356_v62 = vpop.permute.xlu0 %2356  ;;  %v2246_v53 = vsel %vm9963_vm14, %v8333_v47, %v2240_v58 }
 0x20d   : > { %6978 = vmatmul.msk.bf16.vlgmr.msrb.gmra.mxu2 %vm549_vm2, %v8316_v4 }
 0x20e   : > { %2272 = vmatpush.bf16.msrb.mxu2 %v2251_v59 }
 0x20f   : > { %6970 = vmatmul.msk.bf16.vlgmr.msrb.gmra.mxu3 %vm549_vm2, %v8267_v42 }
 0x210   : > { %v1076_v39 = vpop.f32.mrf.mxu0  ;;  %3378 = vrot.lane.b32.xlu0 %v7907_v18, %s9961_s18  ;;  %v1146_v57 = vpop.f32.mrf.mxu1  ;;  %2057 = vmatpush.bf16.msrb.mxu3 %v2006_v55  ;;  %v2009_v18 = vsel %vm476_vm0, %v1992_v60, 0  ;;  %v10002_v55 = vld [vmem:[#allocation12_spill] sm:$0xff] }
 0x211   : > { %v1084_v9 = vadd.f32 %v1076_v39, %v962_v29  ;;  %v1268_v23 = vpop.f32.mrf.mxu2  ;;  %3376 = vrot.lane.b32.xlu2 %v7909_v17, %s9961_s18  ;;  %v1202_v12 = vadd.f32 %v1146_v57, %v1080_v50  ;;  %3380 = vrot.lane.b32.xlu1 %v7914_v36, %s9961_s18  ;;  %v8362_v49 = vpop.permute.xlu1 %2358  ;;  %v9998_v50 = vld [vmem:[#allocation8_spill] sm:$0xff]  ;;  %v2244_v39 = vsel %vm9963_vm14, %v8320_v38, %v8328_v26  ;;  %vm9970_vm14 = vcmask 56320  }
 0x212   : > { %v1063_v41 = vpop.f32.mrf.mxu3  ;;  %v8382_v43 = vpop.permute.xlu2 %2360  ;;  %v2257_v26 = vsel %vm476_vm0, %v2244_v39, 0 }
 0x213   : > { %6971 = vmatmul.msk.bf16.vlgmr.msra.gmra.mxu0 %vm549_vm2, %v8267_v42  ;;  %v8350_v19 = vadd.f32 %v1268_v23, %v1202_v12  ;;  %6972 = vmatmul.msk.bf16.vlgmr.msra.gmra.mxu1 %vm549_vm2, %v8267_v42  ;;  %v1083_v17 = vadd.f32 %v1063_v41, %v8198_v51  ;;  %v8369_v51 = vld [vmem:[%s9940_s1 + $0x34] sm:$0xf]  ;;  %v8392_v21 = vpop.permute.xlu0 %2362 }
 0x214   : > { %2070 = vmatpush.bf16.msra.mxu0 %v2009_v18  ;;  %2145 = vmatpush.bf16.msra.mxu1 %v2124_v0  ;;  %v3741_v0 = vld.sshfl [vmem:[#allocation1] sm:$0xff pattern:$0x73625140] }
 0x218   : > { %v1078_v36 = vpop.f32.mrf.mxu0  ;;  %3499 = vrot.lane.b32.xlu0 %v7934_v40, %s9978_s24  ;;  %v1148_v8 = vpop.f32.mrf.mxu1  ;;  %v2263_v40 = vsel %vm476_vm0, %v2246_v53, 0 }
 0x219   : > { %v1270_v6 = vpop.f32.mrf.mxu2  ;;  %3382 = vrot.lane.b32.xlu2 %v7921_v5, %s9961_s18  ;;  %3501 = vrot.lane.b32.xlu1 %v7936_v56, %s9978_s24  ;;  %v2118_v5 = vsel %vm9960_vm13, %v8260_v11, %v8271_v63  ;;  %v2119_v56 = vsel %vm9960_vm13, %v8271_v63, %v8290_v24  ;;  %v9999_v11 = vld [vmem:[#allocation9_spill] sm:$0xff]  ;;  %v10000_v63 = vld [vmem:[#allocation10_spill] sm:$0xff]  ;;  %v8401_v24 = vpop.permute.xlu1 %2364  ;;  %vm2368_vm13 = vcmask 64512   ;;  %s9976_s18 = smov 34  }
 0x21a   : > { %v1065_v28 = vpop.f32.mrf.mxu3  ;;  %v2136_v61 = vsel %vm476_vm0, %v2119_v56, 0  ;;  %v8411_v37 = vpop.permute.xlu2 %2366  ;;  %v2372_v31 = vsel %vm2368_vm13, %v8392_v21, %v8401_v24  ;;  %v2371_v56 = vsel %vm2368_vm13, %v8382_v43, %v8392_v21 }
 0x21b   : > { %v2387_v59 = vsel %vm476_vm0, %v2372_v31, 0  ;;  %v2369_v28 = vsel %vm2368_vm13, %v8356_v62, %v8362_v49 }
 0x21c   : > { %v2378_v62 = vsel %vm476_vm0, %v2369_v28, 0 }
 0x21d   : > { %6983 = vmatmul.msk.bf16.vlgmr.msra.gmra.mxu2 %vm549_vm2, %v8369_v51 }
 0x21e   : > { %2324 = vmatpush.bf16.msra.mxu2 %v2263_v40 }
 0x21f   : > { %6974 = vmatmul.msk.bf16.vlgmr.msra.gmra.mxu3 %vm549_vm2, %v8267_v42  ;;  %v2133_v42 = vsel %vm476_vm0, %v2118_v5, 0  ;;  %v3747_v5 = vld.sshfl [vmem:[#allocation1 + $0x18] sm:$0xff pattern:$0x73625140] }
 0x220   : > { %v1185_v1 = vpop.f32.mrf.mxu0  ;;  %3505 = vrot.lane.b32.xlu0 %v9998_v50, %s9978_s24  ;;  %v1198_v33 = vpop.f32.mrf.mxu1  ;;  %2171 = vmatpush.bf16.msra.mxu3 %v2130_v32  ;;  %v3745_v50 = vld.sshfl [vmem:[#allocation1 + $0x10] sm:$0xff pattern:$0x73625140] }
 0x221   : > { %v1205_v44 = vadd.f32 %v1185_v1, %v1083_v17  ;;  %v1320_v10 = vpop.f32.mrf.mxu2  ;;  %3503 = vrot.lane.b32.xlu2 %v9999_v11, %s9978_s24  ;;  %v1206_v2 = vadd.f32 %v1198_v33, %v1084_v9  ;;  %3507 = vrot.lane.b32.xlu1 %v10000_v63, %s9978_s24  ;;  %v8433_v60 = vpop.permute.xlu1 %2485  ;;  %v2384_v63 = vsel %vm476_vm0, %v2371_v56, 0 }
 0x222   : > { %v1172_v7 = vpop.f32.mrf.mxu3  ;;  %v8453_v47 = vpop.permute.xlu2 %2487 }
 0x223   : > { %6976 = vmatmul.msk.bf16.vlgmr.msrb.gmra.mxu0 %vm549_vm2, %v8316_v4  ;;  %v8403_v16 = vadd.f32 %v1320_v10, %v1206_v2  ;;  %6977 = vmatmul.msk.bf16.vlgmr.msrb.gmra.mxu1 %vm549_vm2, %v8316_v4  ;;  %v1204_v48 = vadd.f32 %v1172_v7, %v8247_v46  ;;  %v8421_v46 = vld [vmem:[%s9940_s1 + $0x38] sm:$0xf]  ;;  %v3749_v10 = vld.sshfl [vmem:[#allocation1 + $0x20] sm:$0xff pattern:$0x73625140] }
 0x224   : > { %2184 = vmatpush.bf16.msrb.mxu0 %v2133_v42  ;;  %2197 = vmatpush.bf16.msrb.mxu1 %v2136_v61 }
 0x228   : > { %v1187_v29 = vpop.f32.mrf.mxu0  ;;  %3626 = vrot.lane.b32.xlu0 %v7982_v52, %s9965_s16  ;;  %v1200_v15 = vpop.f32.mrf.mxu1 }
 0x229   : > { %v1322_v22 = vpop.f32.mrf.mxu2  ;;  %3509 = vrot.lane.b32.xlu2 %v10001_v25, %s9978_s24  ;;  %3628 = vrot.lane.b32.xlu1 %v7988_v3, %s9965_s16  ;;  %v8425_v52 = vpop.permute.xlu0 %2483  ;;  %s10018_s24 = smov 54  }
 0x22a   : > { %v1174_v30 = vpop.f32.mrf.mxu3  ;;  %v8478_v40 = vpop.permute.xlu2 %2493  ;;  %v2496_v20 = vsel %vm9970_vm14, %v8425_v52, %v8433_v60 }
 0x22d   : > { %6988 = vmatmul.msk.bf16.vlgmr.msrb.gmra.mxu2 %vm549_vm2, %v8421_v46 }
 0x22e   : > { %2438 = vmatpush.bf16.msrb.mxu2 %v2387_v59  ;;  %v2373_v59 = vsel %vm2368_vm13, %v8401_v24, %v8411_v37  ;;  %v2505_v37 = vsel %vm476_vm0, %v2496_v20, 0 }
 0x22f   : > { %6979 = vmatmul.msk.bf16.vlgmr.msrb.gmra.mxu3 %vm549_vm2, %v8316_v4 }
 0x230   : > { %v1294_v3 = vpop.f32.mrf.mxu0  ;;  %3632 = vrot.lane.b32.xlu0 %v10002_v55, %s9965_s16  ;;  %v1307_v57 = vpop.f32.mrf.mxu1  ;;  %2285 = vmatpush.bf16.msrb.mxu3 %v2254_v13 }
 0x231   : > { %v1326_v9 = vadd.f32 %v1294_v3, %v1204_v48  ;;  %v1429_v23 = vpop.f32.mrf.mxu2  ;;  %3630 = vrot.lane.b32.xlu2 %v7995_v27, %s9965_s16  ;;  %v1327_v38 = vadd.f32 %v1307_v57, %v1205_v44  ;;  %3634 = vrot.lane.b32.xlu1 %v7998_v14, %s9965_s16  ;;  %v2260_v27 = vsel %vm476_vm0, %v2245_v45, 0  ;;  %v8461_v14 = vpop.permute.xlu0 %2489  ;;  %v3751_v48 = vld.sshfl [vmem:[#allocation1 + $0x28] sm:$0xff pattern:$0x73625140]  ;;  %v2497_v3 = vsel %vm9970_vm14, %v8433_v60, %v8453_v47 }
 0x232   : > { %v1281_v12 = vpop.f32.mrf.mxu3  ;;  %v2498_v8 = vsel %vm9970_vm14, %v8453_v47, %v8461_v14  ;;  %v8505_v7 = vpop.permute.xlu2 %2614  ;;  %v2390_v45 = vsel %vm476_vm0, %v2373_v59, 0 }
 0x233   : > { %6980 = vmatmul.msk.bf16.vlgmr.msra.gmra.mxu0 %vm549_vm2, %v8316_v4  ;;  %v8455_v18 = vadd.f32 %v1429_v23, %v1327_v38  ;;  %6982 = vmatmul.msk.bf16.vlgmr.msra.gmra.mxu1 %vm549_vm2, %v8369_v51  ;;  %v1325_v41 = vadd.f32 %v1281_v12, %v8299_v35  ;;  %v8463_v4 = vpop.permute.xlu1 %2491  ;;  %v3743_v35 = vld.sshfl [vmem:[#allocation1 + $0x8] sm:$0xff pattern:$0x73625140]  ;;  %v2511_v53 = vsel %vm476_vm0, %v2498_v8, 0  ;;  %v2508_v38 = vsel %vm476_vm0, %v2497_v3, 0 }
 0x234   : > { %2298 = vmatpush.bf16.msra.mxu0 %v2257_v26  ;;  %2311 = vmatpush.bf16.msra.mxu1 %v2260_v27 }
 0x238   : > { %v1296_v17 = vpop.f32.mrf.mxu0  ;;  %3753 = vrot.lane.b32.xlu0 %v3741_v0, %s9976_s18  ;;  %v1309_v58 = vpop.f32.mrf.mxu1 }
 0x239   : > { %v1431_v36 = vpop.f32.mrf.mxu2  ;;  %3636 = vrot.lane.b32.xlu2 %v8000_v54, %s9965_s16  ;;  %3755 = vrot.lane.b32.xlu1 %v3743_v35, %s9976_s18  ;;  %v2370_v54 = vsel %vm2368_vm13, %v8362_v49, %v8382_v43  ;;  %v8483_v34 = vpop.permute.xlu0 %2610  ;;  %v8553_v17 = vld [vmem:[%s9940_s1 + $0x40] sm:$0xf]  ;;  %v2500_v35 = vsel %vm9970_vm14, %v8463_v4, %v8478_v40 }
 0x23a   : > { %v1283_v6 = vpop.f32.mrf.mxu3  ;;  %v2381_v43 = vsel %vm476_vm0, %v2370_v54, 0  ;;  %v8535_v57 = vpop.permute.xlu2 %2620  ;;  %v2499_v36 = vsel %vm9970_vm14, %v8461_v14, %v8463_v4  ;;  %v2517_v4 = vsel %vm476_vm0, %v2500_v35, 0  ;;  %vm9972_vm14 = vcmask 375808  }
 0x23b   : > { %v8492_v49 = vpop.permute.xlu1 %2612  ;;  %v2514_v54 = vsel %vm476_vm0, %v2499_v36, 0 }
 0x23c   : > { %v2624_v22 = vsel %vm9968_vm15, %v8492_v49, %v8505_v7  ;;  %v2623_v28 = vsel %vm9968_vm15, %v8483_v34, %v8492_v49 }
 0x23d   : > { %6992 = vmatmul.msk.bf16.vlgmr.msra.gmra.mxu2 %vm549_vm2, %v8421_v46  ;;  %v2635_v30 = vsel %vm476_vm0, %v2624_v22, 0  ;;  %v2632_v34 = vsel %vm476_vm0, %v2623_v28, 0 }
 0x23e   : > { %2552 = vmatpush.bf16.msra.mxu2 %v2511_v53 }
 0x23f   : > { %6984 = vmatmul.msk.bf16.vlgmr.msra.gmra.mxu3 %vm549_vm2, %v8369_v51 }
 0x240   : > { %v1403_v1 = vpop.f32.mrf.mxu0  ;;  %3759 = vrot.lane.b32.xlu0 %v3747_v5, %s9976_s18  ;;  %v1416_v44 = vpop.f32.mrf.mxu1  ;;  %2399 = vmatpush.bf16.msra.mxu3 %v2378_v62 }
 0x241   : > { %v1447_v32 = vadd.f32 %v1403_v1, %v1325_v41  ;;  %v1538_v33 = vpop.f32.mrf.mxu2  ;;  %3757 = vrot.lane.b32.xlu2 %v3745_v50, %s9976_s18  ;;  %v1448_v11 = vadd.f32 %v1416_v44, %v1326_v9  ;;  %3761 = vrot.lane.b32.xlu1 %v3749_v10, %s9976_s18  ;;  %v8510_v31 = vpop.permute.xlu0 %2616 }
 0x242   : > { %v1390_v21 = vpop.f32.mrf.mxu3 }
 0x243   : > { %6985 = vmatmul.msk.bf16.vlgmr.msrb.gmra.mxu0 %vm549_vm2, %v8369_v51  ;;  %v8499_v2 = vadd.f32 %v1538_v33, %v1448_v11  ;;  %6986 = vmatmul.msk.bf16.vlgmr.msrb.gmra.mxu1 %vm549_vm2, %v8369_v51  ;;  %v1446_v42 = vadd.f32 %v1390_v21, %v8350_v19  ;;  %v8516_v19 = vld [vmem:[%s9940_s1 + $0x3c] sm:$0xf]  ;;  %v8518_v51 = vpop.permute.xlu1 %2618  ;;  %v8594_v21 = vld [vmem:[%s9940_s1 + $0x44] sm:$0xf] }
 0x244   : > { %2412 = vmatpush.bf16.msrb.mxu0 %v2381_v43  ;;  %2425 = vmatpush.bf16.msrb.mxu1 %v2384_v63 }
 0x248   : > { %v1405_v61 = vpop.f32.mrf.mxu0  ;;  %v1418_v29 = vpop.f32.mrf.mxu1 }
 0x249   : > { %v1540_v15 = vpop.f32.mrf.mxu2  ;;  %3763 = vrot.lane.b32.xlu2 %v3751_v48, %s9976_s18  ;;  %v2738_v52 = vpop.permute.xlu0 %2737  ;;  %v2626_v61 = vsel %vm9968_vm15, %v8510_v31, %v8518_v51  ;;  %s7229_s18 = smul.u32 40, %s10107_s22 }
 0x24a   : > { %v1392_v25 = vpop.f32.mrf.mxu3  ;;  %v2627_v15 = vsel %vm9968_vm15, %v8518_v51, %v8535_v57 }
 0x24b   : > { %v8546_v47 = vpop.permute.xlu1 %2739 }
 0x24c   : > { %v2750_v0 = vsel %vm9969_vm11, %v2738_v52, %v8546_v47 }
 0x24d   : > { %6997 = vmatmul.msk.bf16.vlgmr.msrb.gmra.mxu2 %vm549_vm2, %v8516_v19 }
 0x24e   : > { %2666 = vmatpush.bf16.msrb.mxu2 %v2635_v30 }
 0x24f   : > { %6989 = vmatmul.msk.bf16.vlgmr.msrb.gmra.mxu3 %vm549_vm2, %v8421_v46 }
 0x250   : > { %v1512_v39 = vpop.f32.mrf.mxu0  ;;  %v1525_v13 = vpop.f32.mrf.mxu1  ;;  %2451 = vmatpush.bf16.msrb.mxu3 %v2390_v45 }
 0x251   : > { %v1568_v55 = vadd.f32 %v1512_v39, %v1446_v42  ;;  %v1652_v9 = vpop.f32.mrf.mxu2  ;;  %v1569_v24 = vadd.f32 %v1525_v13, %v1447_v32  ;;  %v8563_v8 = vpop.permute.xlu0 %2743  ;;  %v2625_v42 = vsel %vm9968_vm15, %v8505_v7, %v8510_v31  ;;  %v2641_v31 = vsel %vm476_vm0, %v2626_v61, 0 }
 0x252   : > { %v1442_v23 = vpop.f32.mrf.mxu3  ;;  %v2638_v22 = vsel %vm476_vm0, %v2625_v42, 0  ;;  %vm9971_vm15 = vcmask 449536  }
 0x253   : > { %6990 = vmatmul.msk.bf16.vlgmr.msra.gmra.mxu0 %vm549_vm2, %v8421_v46  ;;  %v8540_v60 = vadd.f32 %v1652_v9, %v1569_v24  ;;  %6991 = vmatmul.msk.bf16.vlgmr.msra.gmra.mxu1 %vm549_vm2, %v8421_v46  ;;  %v1450_v26 = vadd.f32 %v1442_v23, %v8403_v16  ;;  %v8555_v46 = vpop.permute.xlu2 %2741  ;;  %v2759_v16 = vsel %vm476_vm0, %v2750_v0, 0  ;;  %v8568_v6 = vpop.permute.xlu1 %2745 }
 0x254   : > { %2526 = vmatpush.bf16.msra.mxu0 %v2505_v37  ;;  %2539 = vmatpush.bf16.msra.mxu1 %v2508_v38  ;;  %v8634_v37 = vld [vmem:[%s9940_s1 + $0x48] sm:$0xf]  ;;  %v2751_v38 = vsel %vm9969_vm11, %v8546_v47, %v8555_v46 }
 0x255   : > { %v2762_v0 = vsel %vm476_vm0, %v2751_v38, 0 }
 0x258   : > { %v1514_v12 = vpop.f32.mrf.mxu0  ;;  %v1527_v27 = vpop.f32.mrf.mxu1 }
 0x259   : > { %v1654_v41 = vpop.f32.mrf.mxu2  ;;  %v8585_v44 = vpop.permute.xlu0 %2864  ;;  %v2752_v12 = vsel %vm9969_vm11, %v8555_v46, %v8563_v8 }
 0x25a   : > { %v1444_v58 = vpop.f32.mrf.mxu3  ;;  %v2753_v41 = vsel %vm9969_vm11, %v8563_v8, %v8568_v6  ;;  %v2765_v46 = vsel %vm476_vm0, %v2752_v12, 0 }
 0x25b   : > { %v2748_v32 = vpop.permute.xlu2 %2747  ;;  %v8589_v43 = vpop.permute.xlu1 %2866  ;;  %v2768_v8 = vsel %vm476_vm0, %v2753_v41, 0 }
 0x25c   : > { %v2754_v11 = vsel %vm9969_vm11, %v8568_v6, %v2748_v32  ;;  %vm9974_vm11 = vcmask 441344  }
 0x25d   : > { %7002 = vmatmul.msk.bf16.vlgmr.msra.gmra.mxu2 %vm549_vm2, %v8553_v17 }
 0x25e   : > { %2780 = vmatpush.bf16.msra.mxu2 %v2759_v16 }
 0x25f   : > { %6994 = vmatmul.msk.bf16.vlgmr.msra.gmra.mxu3 %vm549_vm2, %v8516_v19 }
 0x260   : > { %v1564_v53 = vpop.f32.mrf.mxu0  ;;  %v1639_v5 = vpop.f32.mrf.mxu1  ;;  %2565 = vmatpush.bf16.msra.mxu3 %v2514_v54 }
 0x261   : > { %v1572_v14 = vadd.f32 %v1564_v53, %v1450_v26  ;;  %v1766_v1 = vpop.f32.mrf.mxu2  ;;  %v1695_v56 = vadd.f32 %v1639_v5, %v1568_v55  ;;  %v8613_v59 = vpop.permute.xlu0 %2870 }
 0x262   : > { %v1551_v40 = vpop.f32.mrf.mxu3 }
 0x263   : > { %6995 = vmatmul.msk.bf16.vlgmr.msrb.gmra.mxu0 %vm549_vm2, %v8516_v19  ;;  %v8579_v62 = vadd.f32 %v1766_v1, %v1695_v56  ;;  %6996 = vmatmul.msk.bf16.vlgmr.msrb.gmra.mxu1 %vm549_vm2, %v8516_v19  ;;  %v1571_v50 = vadd.f32 %v1551_v40, %v8455_v18  ;;  %v2771_v18 = vsel %vm476_vm0, %v2754_v11, 0  ;;  %v8605_v48 = vpop.permute.xlu2 %2868  ;;  %v8618_v39 = vpop.permute.xlu1 %2872 }
 0x264   : > { %2578 = vmatpush.bf16.msrb.mxu0 %v2517_v4  ;;  %2653 = vmatpush.bf16.msrb.mxu1 %v2632_v34  ;;  %v2880_v24 = vsel %vm9971_vm15, %v8613_v59, %v8618_v39 }
 0x268   : > { %v1566_v33 = vpop.f32.mrf.mxu0  ;;  %v1641_v49 = vpop.f32.mrf.mxu1 }
 0x269   : > { %v1768_v10 = vpop.f32.mrf.mxu2  ;;  %v8636_v52 = vpop.permute.xlu0 %2991  ;;  %v2879_v49 = vsel %vm9971_vm15, %v8605_v48, %v8613_v59 }
 0x26a   : > { %v1553_v63 = vpop.f32.mrf.mxu3 }
 0x26b   : > { %v8626_v57 = vpop.permute.xlu2 %2874  ;;  %v8644_v26 = vpop.permute.xlu1 %2993 }
 0x26d   : > { %7007 = vmatmul.msk.bf16.vlgmr.msrb.gmra.mxu2 %vm549_vm2, %v8594_v21 }
 0x26e   : > { %2832 = vmatpush.bf16.msrb.mxu2 %v2771_v18 }
 0x26f   : > { %6998 = vmatmul.msk.bf16.vlgmr.msrb.gmra.mxu3 %vm549_vm2, %v8516_v19  ;;  %v2644_v19 = vsel %vm476_vm0, %v2627_v15, 0 }
 0x270   : > { %v1678_v29 = vpop.f32.mrf.mxu0  ;;  %v1691_v30 = vpop.f32.mrf.mxu1  ;;  %2679 = vmatpush.bf16.msrb.mxu3 %v2638_v22 }
 0x271   : > { %v1698_v25 = vadd.f32 %v1678_v29, %v1571_v50  ;;  %v1818_v7 = vpop.f32.mrf.mxu2  ;;  %v1699_v20 = vadd.f32 %v1691_v30, %v1572_v14  ;;  %v8664_v54 = vpop.permute.xlu0 %2997  ;;  %v2878_v50 = vsel %vm9971_vm15, %v8589_v43, %v8605_v48  ;;  %v2892_v48 = vsel %vm476_vm0, %v2879_v49, 0 }
 0x272   : > { %v1665_v51 = vpop.f32.mrf.mxu3 }
 0x273   : > { %7000 = vmatmul.msk.bf16.vlgmr.msra.gmra.mxu0 %vm549_vm2, %v8553_v17  ;;  %v8620_v3 = vadd.f32 %v1818_v7, %v1699_v20  ;;  %7001 = vmatmul.msk.bf16.vlgmr.msra.gmra.mxu1 %vm549_vm2, %v8553_v17  ;;  %v1697_v45 = vadd.f32 %v1665_v51, %v8499_v2  ;;  %v2895_v2 = vsel %vm476_vm0, %v2880_v24, 0  ;;  %v2996_v35 = vpop.permute.xlu2 %2995  ;;  %v8666_v14 = vpop.permute.xlu1 %2999 }
 0x274   : > { %2692 = vmatpush.bf16.msra.mxu0 %v2641_v31  ;;  %2705 = vmatpush.bf16.msra.mxu1 %v2644_v19  ;;  %v3006_v56 = vsel %vm9974_vm11, %v2996_v35, %v8664_v54  ;;  %v2881_v19 = vsel %vm9971_vm15, %v8618_v39, %v8626_v57 }
 0x275   : > { %v3019_v40 = vsel %vm476_vm0, %v3006_v56, 0 }
 0x278   : > { %v1680_v55 = vpop.f32.mrf.mxu0  ;;  %v1693_v13 = vpop.f32.mrf.mxu1 }
 0x279   : > { %v1820_v9 = vpop.f32.mrf.mxu2  ;;  %v8681_v32 = vpop.permute.xlu0 %3118  ;;  %v3005_v13 = vsel %vm9974_vm11, %v8644_v26, %v2996_v35 }
 0x27a   : > { %v1667_v23 = vpop.f32.mrf.mxu3  ;;  %v2898_v9 = vsel %vm476_vm0, %v2881_v19, 0 }
 0x27b   : > { %v8676_v34 = vpop.permute.xlu2 %3001  ;;  %v8689_v18 = vpop.permute.xlu1 %3120 }
 0x27d   : > { %7012 = vmatmul.msk.bf16.vlgmr.msra.gmra.mxu2 %vm549_vm2, %v8634_v37 }
 0x27e   : > { %2946 = vmatpush.bf16.msra.mxu2 %v2895_v2 }
 0x27f   : > { %7003 = vmatmul.msk.bf16.vlgmr.msra.gmra.mxu3 %vm549_vm2, %v8553_v17 }
 0x280   : > { %v1792_v27 = vpop.f32.mrf.mxu0  ;;  %v1805_v16 = vpop.f32.mrf.mxu1  ;;  %2793 = vmatpush.bf16.msra.mxu3 %v2762_v0 }
 0x281   : > { %v1824_v58 = vadd.f32 %v1792_v27, %v1697_v45  ;;  %v1932_v47 = vpop.f32.mrf.mxu2  ;;  %v1825_v36 = vadd.f32 %v1805_v16, %v1698_v25  ;;  %v8705_v20 = vpop.permute.xlu0 %3124  ;;  %v3004_v45 = vsel %vm9974_vm11, %v8636_v52, %v8644_v26  ;;  %v3016_v27 = vsel %vm476_vm0, %v3005_v13, 0 }
 0x282   : > { %v1779_v53 = vpop.f32.mrf.mxu3  ;;  %v3013_v57 = vsel %vm476_vm0, %v3004_v45, 0 }
 0x283   : > { %7004 = vmatmul.msk.bf16.vlgmr.msrb.gmra.mxu0 %vm549_vm2, %v8553_v17  ;;  %v8658_v28 = vadd.f32 %v1932_v47, %v1825_v36  ;;  %7006 = vmatmul.msk.bf16.vlgmr.msrb.gmra.mxu1 %vm549_vm2, %v8594_v21  ;;  %v1823_v6 = vadd.f32 %v1779_v53, %v8540_v60  ;;  %v2877_v60 = vsel %vm9971_vm15, %v8585_v44, %v8589_v43  ;;  %v2889_v43 = vsel %vm476_vm0, %v2878_v50, 0  ;;  %v8700_v22 = vpop.permute.xlu2 %3122  ;;  %v8712_v31 = vpop.permute.xlu1 %3126 }
 0x284   : > { %2806 = vmatpush.bf16.msrb.mxu0 %v2765_v46  ;;  %2819 = vmatpush.bf16.msrb.mxu1 %v2768_v8  ;;  %v2886_v10 = vsel %vm476_vm0, %v2877_v60, 0  ;;  %v3132_v59 = vsel %vm9972_vm14, %v8689_v18, %v8700_v22  ;;  %vm9973_vm15 = vcmask 367616   ;;  %v8746_v46 = vld [vmem:[%s9940_s1 + $0x50] sm:$0xf]  ;;  %v3007_v53 = vsel %vm9974_vm11, %v8664_v54, %v8666_v14 }
 0x285   : > { %v3143_v51 = vsel %vm476_vm0, %v3132_v59, 0  ;;  %v3022_v56 = vsel %vm476_vm0, %v3007_v53, 0 }
 0x288   : > { %v1794_v17 = vpop.f32.mrf.mxu0  ;;  %v1807_v5 = vpop.f32.mrf.mxu1 }
 0x289   : > { %v1934_v1 = vpop.f32.mrf.mxu2  ;;  %v3246_v52 = vpop.permute.xlu0 %3245 }
 0x28a   : > { %v1781_v4 = vpop.f32.mrf.mxu3  ;;  %v3131_v1 = vsel %vm9972_vm14, %v8681_v32, %v8689_v18 }
 0x28b   : > { %v8728_v38 = vpop.permute.xlu2 %3128  ;;  %v8739_v0 = vpop.permute.xlu1 %3247  ;;  %v3140_v32 = vsel %vm476_vm0, %v3131_v1, 0 }
 0x28c   : > { %v3258_v36 = vsel %vm9973_vm15, %v3246_v52, %v8739_v0 }
 0x28d   : > { %7016 = vmatmul.msk.bf16.vlgmr.msrb.gmra.mxu2 %vm549_vm2, %v8634_v37 }
 0x28e   : > { %3060 = vmatpush.bf16.msrb.mxu2 %v3019_v40 }
 0x28f   : > { %7008 = vmatmul.msk.bf16.vlgmr.msrb.gmra.mxu3 %vm549_vm2, %v8594_v21 }
 0x290   : > { %v1906_v33 = vpop.f32.mrf.mxu0  ;;  %v1919_v11 = vpop.f32.mrf.mxu1  ;;  %2907 = vmatpush.bf16.msrb.mxu3 %v2886_v10 }
 0x291   : > { %v1950_v44 = vadd.f32 %v1906_v33, %v1823_v6  ;;  %v2046_v63 = vpop.f32.mrf.mxu2  ;;  %v1951_v42 = vadd.f32 %v1919_v11, %v1824_v58  ;;  %v8756_v8 = vpop.permute.xlu0 %3251  ;;  %v3008_v6 = vsel %vm9974_vm11, %v8666_v14, %v8676_v34  ;;  %vm9981_vm11 = vcmask 285696  }
 0x292   : > { %v1893_v61 = vpop.f32.mrf.mxu3  ;;  %v3025_v14 = vsel %vm476_vm0, %v3008_v6, 0 }
 0x293   : > { %7009 = vmatmul.msk.bf16.vlgmr.msra.gmra.mxu0 %vm549_vm2, %v8594_v21  ;;  %v8694_v29 = vadd.f32 %v2046_v63, %v1951_v42  ;;  %7010 = vmatmul.msk.bf16.vlgmr.msra.gmra.mxu1 %vm549_vm2, %v8594_v21  ;;  %v1949_v15 = vadd.f32 %v1893_v61, %v8579_v62  ;;  %v8710_v21 = vld [vmem:[%s9940_s1 + $0x4c] sm:$0xf]  ;;  %v8761_v17 = vpop.permute.xlu1 %3253 }
 0x294   : > { %2920 = vmatpush.bf16.msra.mxu0 %v2889_v43  ;;  %2933 = vmatpush.bf16.msra.mxu1 %v2892_v48  ;;  %v8787_v43 = vld [vmem:[%s9940_s1 + $0x54] sm:$0xf]  ;;  %v3133_v48 = vsel %vm9972_vm14, %v8700_v22, %v8705_v20 }
 0x295   : > { %v3146_v59 = vsel %vm476_vm0, %v3133_v48, 0 }
 0x298   : > { %v1908_v25 = vpop.f32.mrf.mxu0  ;;  %v1921_v30 = vpop.f32.mrf.mxu1 }
 0x299   : > { %v2048_v7 = vpop.f32.mrf.mxu2  ;;  %v8778_v10 = vpop.permute.xlu0 %3372 }
 0x29a   : > { %v1895_v62 = vpop.f32.mrf.mxu3  ;;  %v3135_v7 = vsel %vm9972_vm14, %v8712_v31, %v8728_v38 }
 0x29b   : > { %v8782_v42 = vpop.permute.xlu1 %3374 }
 0x29d   : > { %7021 = vmatmul.msk.bf16.vlgmr.msra.gmra.mxu2 %vm549_vm2, %v8710_v21 }
 0x29e   : > { %3174 = vmatpush.bf16.msra.mxu2 %v3143_v51 }
 0x29f   : > { %7013 = vmatmul.msk.bf16.vlgmr.msra.gmra.mxu3 %vm549_vm2, %v8634_v37 }
 0x2a0   : > { %v2020_v55 = vpop.f32.mrf.mxu0  ;;  %v2033_v23 = vpop.f32.mrf.mxu1  ;;  %2959 = vmatpush.bf16.msra.mxu3 %v2898_v9 }
 0x2a1   : > { %v2076_v24 = vadd.f32 %v2020_v55, %v1949_v15  ;;  %v2160_v2 = vpop.f32.mrf.mxu2  ;;  %v2077_v39 = vadd.f32 %v2033_v23, %v1950_v44  ;;  %v3134_v15 = vsel %vm9972_vm14, %v8705_v20, %v8712_v31  ;;  %v3379_v45 = vpop.permute.xlu0 %3378  ;;  %vm9975_vm14 = vcmask 359424  }
 0x2a2   : > { %v1945_v12 = vpop.f32.mrf.mxu3  ;;  %v3149_v20 = vsel %vm476_vm0, %v3134_v15, 0 }
 0x2a3   : > { %7014 = vmatmul.msk.bf16.vlgmr.msrb.gmra.mxu0 %vm549_vm2, %v8634_v37  ;;  %v8733_v26 = vadd.f32 %v2160_v2, %v2077_v39  ;;  %7015 = vmatmul.msk.bf16.vlgmr.msrb.gmra.mxu1 %vm549_vm2, %v8634_v37  ;;  %v1953_v41 = vadd.f32 %v1945_v12, %v8620_v3  ;;  %v8748_v37 = vpop.permute.xlu2 %3249  ;;  %v3267_v3 = vsel %vm476_vm0, %v3258_v36, 0  ;;  %v8809_v55 = vpop.permute.xlu1 %3380 }
 0x2a4   : > { %3034 = vmatpush.bf16.msrb.mxu0 %v3013_v57  ;;  %3047 = vmatpush.bf16.msrb.mxu1 %v3016_v27  ;;  %v3388_v39 = vsel %vm9975_vm14, %v3379_v45, %v8809_v55  ;;  %v8824_v57 = vld [vmem:[%s9940_s1 + $0x58] sm:$0xf]  ;;  %v3259_v27 = vsel %vm9973_vm15, %v8739_v0, %v8748_v37 }
 0x2a5   : > { %v3270_v36 = vsel %vm476_vm0, %v3259_v27, 0 }
 0x2a8   : > { %v2022_v58 = vpop.f32.mrf.mxu0  ;;  %v2035_v16 = vpop.f32.mrf.mxu1 }
 0x2a9   : > { %v2162_v47 = vpop.f32.mrf.mxu2  ;;  %v8826_v12 = vpop.permute.xlu0 %3499  ;;  %v3260_v58 = vsel %vm9973_vm15, %v8748_v37, %v8756_v8 }
 0x2aa   : > { %v1947_v35 = vpop.f32.mrf.mxu3  ;;  %v3261_v47 = vsel %vm9973_vm15, %v8756_v8, %v8761_v17  ;;  %v3273_v37 = vsel %vm476_vm0, %v3260_v58, 0 }
 0x2ab   : > { %v3256_v49 = vpop.permute.xlu2 %3255  ;;  %v3276_v8 = vsel %vm476_vm0, %v3261_v47, 0 }
 0x2ac   : > { %v3262_v18 = vsel %vm9973_vm15, %v8761_v17, %v3256_v49  ;;  %vm9982_vm15 = vcmask 293888  }
 0x2ad   : > { %7026 = vmatmul.msk.bf16.vlgmr.msrb.gmra.mxu2 %vm549_vm2, %v8746_v46 }
 0x2ae   : > { %3288 = vmatpush.bf16.msrb.mxu2 %v3267_v3 }
 0x2af   : > { %7018 = vmatmul.msk.bf16.vlgmr.msrb.gmra.mxu3 %vm549_vm2, %v8710_v21 }
 0x2b0   : > { %v2072_v5 = vpop.f32.mrf.mxu0  ;;  %v2147_v4 = vpop.f32.mrf.mxu1  ;;  %3073 = vmatpush.bf16.msrb.mxu3 %v3022_v56 }
 0x2b1   : > { %v2080_v54 = vadd.f32 %v2072_v5, %v1953_v41  ;;  %v2274_v40 = vpop.f32.mrf.mxu2  ;;  %v2203_v60 = vadd.f32 %v2147_v4, %v2076_v24  ;;  %v8834_v41 = vpop.permute.xlu1 %3501 }
 0x2b2   : > { %v2059_v34 = vpop.f32.mrf.mxu3  ;;  %v8854_v56 = vpop.permute.xlu0 %3505 }
 0x2b3   : > { %7019 = vmatmul.msk.bf16.vlgmr.msra.gmra.mxu0 %vm549_vm2, %v8710_v21  ;;  %v8772_v50 = vadd.f32 %v2274_v40, %v2203_v60  ;;  %7020 = vmatmul.msk.bf16.vlgmr.msra.gmra.mxu1 %vm549_vm2, %v8710_v21  ;;  %v2079_v33 = vadd.f32 %v2059_v34, %v8658_v28  ;;  %v3279_v28 = vsel %vm476_vm0, %v3262_v18, 0  ;;  %v8798_v25 = vpop.permute.xlu2 %3376 }
 0x2b4   : > { %3086 = vmatpush.bf16.msra.mxu0 %v3025_v14  ;;  %3161 = vmatpush.bf16.msra.mxu1 %v3140_v32 }
 0x2b8   : > { %v2074_v44 = vpop.f32.mrf.mxu0  ;;  %v2149_v11 = vpop.f32.mrf.mxu1 }
 0x2b9   : > { %v2276_v63 = vpop.f32.mrf.mxu2  ;;  %v3387_v44 = vsel %vm9975_vm14, %v8798_v25, %v3379_v45  ;;  %v8892_v45 = vld [vmem:[%s9940_s1 + $0x5c] sm:$0xf] }
 0x2ba   : > { %v2061_v61 = vpop.f32.mrf.mxu3  ;;  %v3627_v48 = vpop.permute.xlu0 %3626 }
 0x2bb   : > { %v8817_v38 = vpop.permute.xlu2 %3382 }
 0x2bd   : > { %7031 = vmatmul.msk.bf16.vlgmr.msra.gmra.mxu2 %vm549_vm2, %v8787_v43 }
 0x2be   : > { %3340 = vmatpush.bf16.msra.mxu2 %v3279_v28 }
 0x2bf   : > { %7022 = vmatmul.msk.bf16.vlgmr.msra.gmra.mxu3 %vm549_vm2, %v8710_v21  ;;  %v3152_v21 = vsel %vm476_vm0, %v3135_v7, 0 }
 0x2c0   : > { %v2186_v30 = vpop.f32.mrf.mxu0  ;;  %v2199_v51 = vpop.f32.mrf.mxu1  ;;  %3187 = vmatpush.bf16.msra.mxu3 %v3146_v59 }
 0x2c1   : > { %v2206_v62 = vadd.f32 %v2186_v30, %v2079_v33  ;;  %v2326_v22 = vpop.f32.mrf.mxu2  ;;  %v2207_v19 = vadd.f32 %v2199_v51, %v2080_v54  ;;  %v8856_v54 = vpop.permute.xlu1 %3507  ;;  %v3386_v33 = vsel %vm9975_vm14, %v8782_v42, %v8798_v25  ;;  %v3400_v25 = vsel %vm476_vm0, %v3387_v44, 0 }
 0x2c2   : > { %v2173_v13 = vpop.f32.mrf.mxu3 }
 0x2c3   : > { %7024 = vmatmul.msk.bf16.vlgmr.msrb.gmra.mxu0 %vm549_vm2, %v8746_v46  ;;  %v8811_v31 = vadd.f32 %v2326_v22, %v2207_v19  ;;  %7025 = vmatmul.msk.bf16.vlgmr.msrb.gmra.mxu1 %vm549_vm2, %v8746_v46  ;;  %v2205_v9 = vadd.f32 %v2173_v13, %v8694_v29  ;;  %v3403_v29 = vsel %vm476_vm0, %v3388_v39, 0  ;;  %v3504_v6 = vpop.permute.xlu2 %3503  ;;  %v3389_v13 = vsel %vm9975_vm14, %v8809_v55, %v8817_v38 }
 0x2c4   : > { %3200 = vmatpush.bf16.msrb.mxu0 %v3149_v20  ;;  %3213 = vmatpush.bf16.msrb.mxu1 %v3152_v21  ;;  %v3514_v60 = vsel %vm9982_vm15, %v3504_v6, %v8854_v56  ;;  %v8902_v21 = vpop.permute.xlu0 %3632 }
 0x2c5   : > { %v3527_v34 = vsel %vm476_vm0, %v3514_v60, 0 }
 0x2c8   : > { %v2188_v24 = vpop.f32.mrf.mxu0  ;;  %v2201_v23 = vpop.f32.mrf.mxu1 }
 0x2c9   : > { %v2328_v2 = vpop.f32.mrf.mxu2  ;;  %v3629_v28 = vpop.permute.xlu1 %3628  ;;  %v3513_v23 = vsel %vm9982_vm15, %v8834_v41, %v3504_v6  ;;  %v3515_v6 = vsel %vm9982_vm15, %v8854_v56, %v8856_v54 }
 0x2ca   : > { %v2175_v52 = vpop.f32.mrf.mxu3  ;;  %v3406_v2 = vsel %vm476_vm0, %v3389_v13, 0 }
 0x2cb   : > { %v8866_v32 = vpop.permute.xlu2 %3509 }
 0x2cd   : > { %7036 = vmatmul.msk.bf16.vlgmr.msrb.gmra.mxu2 %vm549_vm2, %v8824_v57 }
 0x2ce   : > { %3454 = vmatpush.bf16.msrb.mxu2 %v3403_v29 }
 0x2cf   : > { %7027 = vmatmul.msk.bf16.vlgmr.msrb.gmra.mxu3 %vm549_vm2, %v8746_v46 }
 0x2d0   : > { %v2300_v16 = vpop.f32.mrf.mxu0  ;;  %v2313_v3 = vpop.f32.mrf.mxu1  ;;  %3301 = vmatpush.bf16.msrb.mxu3 %v3270_v36 }
 0x2d1   : > { %v2332_v35 = vadd.f32 %v2300_v16, %v2205_v9  ;;  %v2440_v0 = vpop.f32.mrf.mxu2  ;;  %v2333_v53 = vadd.f32 %v2313_v3, %v2206_v62  ;;  %v8894_v20 = vpop.permute.xlu1 %3634  ;;  %v3512_v9 = vsel %vm9982_vm15, %v8826_v12, %v8834_v41  ;;  %v3524_v41 = vsel %vm476_vm0, %v3513_v23, 0 }
 0x2d2   : > { %v2287_v5 = vpop.f32.mrf.mxu3  ;;  %v3521_v38 = vsel %vm476_vm0, %v3512_v9, 0  ;;  %v3754_v36 = vpop.permute.xlu0 %3753 }
 0x2d3   : > { %7028 = vmatmul.msk.bf16.vlgmr.msra.gmra.mxu0 %vm549_vm2, %v8746_v46  ;;  %v8848_v1 = vadd.f32 %v2440_v0, %v2333_v53  ;;  %7030 = vmatmul.msk.bf16.vlgmr.msra.gmra.mxu1 %vm549_vm2, %v8787_v43  ;;  %v2331_v17 = vadd.f32 %v2287_v5, %v8733_v26  ;;  %v3385_v26 = vsel %vm9975_vm14, %v8778_v10, %v8782_v42  ;;  %v3397_v42 = vsel %vm476_vm0, %v3386_v33, 0  ;;  %v8885_v59 = vpop.permute.xlu2 %3630 }
 0x2d4   : > { %3314 = vmatpush.bf16.msra.mxu0 %v3273_v37  ;;  %3327 = vmatpush.bf16.msra.mxu1 %v3276_v8  ;;  %v3394_v11 = vsel %vm476_vm0, %v3385_v26, 0  ;;  %v3640_v19 = vsel %vm9981_vm11, %v3629_v28, %v8885_v59  ;;  %vm9980_vm14 = vcmask 277504   ;;  %v3516_v8 = vsel %vm9982_vm15, %v8856_v54, %v8866_v32 }
 0x2d5   : > { %vm3922_vm15 = vcmask 1044344  }
 0x2d6   : > { %vm3924_vm9 = vmor %vm3923_vm10, %vm3922_vm15 }
 0x2d8   : > { %v2302_v46 = vpop.f32.mrf.mxu0  ;;  %v2315_v4 = vpop.f32.mrf.mxu1 }
 0x2d9   : > { %v2442_v40 = vpop.f32.mrf.mxu2  ;;  %v8921_v47 = vpop.permute.xlu1 %3755  ;;  %v3639_v46 = vsel %vm9981_vm11, %v3627_v48, %v3629_v28  ;;  %v3530_v4 = vsel %vm476_vm0, %v3515_v6, 0  ;;  %v3642_v48 = vsel %vm9981_vm11, %v8902_v21, %v8894_v20 }
 0x2da   : > { %v2289_v14 = vpop.f32.mrf.mxu3  ;;  %v3766_v53 = vsel %vm9980_vm14, %v3754_v36, %v8921_v47  ;;  %v3648_v32 = vsel %vm476_vm0, %v3639_v46, 0 }
 0x2db   : > { %v3637_v12 = vpop.permute.xlu2 %3636 }
 0x2dd   : > { %7040 = vmatmul.msk.bf16.vlgmr.msra.gmra.mxu2 %vm549_vm2, %v8824_v57 }
 0x2de   : > { %3568 = vmatpush.bf16.msra.mxu2 %v3527_v34  ;;  %v3533_v34 = vsel %vm476_vm0, %v3516_v8, 0 }
 0x2df   : > { %7032 = vmatmul.msk.bf16.vlgmr.msra.gmra.mxu3 %vm549_vm2, %v8787_v43 }
 0x2e0   : > { %v2414_v49 = vpop.f32.mrf.mxu0  ;;  %v2427_v18 = vpop.f32.mrf.mxu1  ;;  %3415 = vmatpush.bf16.msra.mxu3 %v3394_v11 }
 0x2e1   : > { %v2458_v63 = vadd.f32 %v2414_v49, %v2331_v17  ;;  %v2554_v61 = vpop.f32.mrf.mxu2  ;;  %v2459_v10 = vadd.f32 %v2427_v18, %v2332_v35  ;;  %v3762_v49 = vpop.permute.xlu1 %3761 }
 0x2e2   : > { %v2401_v15 = vpop.f32.mrf.mxu3 }
 0x2e3   : > { %7033 = vmatmul.msk.bf16.vlgmr.msrb.gmra.mxu0 %vm549_vm2, %v8787_v43  ;;  %v8879_v30 = vadd.f32 %v2554_v61, %v2459_v10  ;;  %7034 = vmatmul.msk.bf16.vlgmr.msrb.gmra.mxu1 %vm549_vm2, %v8787_v43  ;;  %v2457_v7 = vadd.f32 %v2401_v15, %v8772_v50  ;;  %v3651_v50 = vsel %vm476_vm0, %v3640_v19, 0  ;;  %v8936_v5 = vpop.permute.xlu2 %3757  ;;  %v8958_v10 = vld [vmem:[%s9940_s1 + $0x64] sm:$0xf] }
 0x2e4   : > { %3428 = vmatpush.bf16.msrb.mxu0 %v3397_v42  ;;  %3441 = vmatpush.bf16.msrb.mxu1 %v3400_v25  ;;  %v3643_v25 = vsel %vm9981_vm11, %v8894_v20, %v3637_v12 }
 0x2e8   : > { %v2416_v62 = vpop.f32.mrf.mxu0  ;;  %v2429_v51 = vpop.f32.mrf.mxu1 }
 0x2e9   : > { %v2556_v22 = vpop.f32.mrf.mxu2 }
 0x2ea   : > { %v2403_v43 = vpop.f32.mrf.mxu3 }
 0x2eb   : > { %v3764_v44 = vpop.permute.xlu2 %3763 }
 0x2ec   : > { %v3770_v61 = vsel %vm9980_vm14, %v3762_v49, %v3764_v44 }
 0x2ed   : > { %7045 = vmatmul.msk.bf16.vlgmr.msrb.gmra.mxu2 %vm549_vm2, %v8892_v45  ;;  %v3787_v42 = vsel %vm476_vm0, %v3770_v61, 0 }
 0x2ee   : > { %3682 = vmatpush.bf16.msrb.mxu2 %v3651_v50 }
 0x2ef   : > { %7037 = vmatmul.msk.bf16.vlgmr.msrb.gmra.mxu3 %vm549_vm2, %v8824_v57 }
 0x2f0   : > { %v2528_v24 = vpop.f32.mrf.mxu0  ;;  %v2541_v52 = vpop.f32.mrf.mxu1  ;;  %3467 = vmatpush.bf16.msrb.mxu3 %v3406_v2  ;;  %v3859_v2 = vld [vmem:[%s9942_s3] sm:$0xff] }
 0x2f1   : > { %v2584_v39 = vadd.f32 %v2528_v24, %v2457_v7  ;;  %v2668_v29 = vpop.f32.mrf.mxu2  ;;  %v2585_v55 = vadd.f32 %v2541_v52, %v2458_v63  ;;  %v7059_v24 = vld [vmem:[%s9940_s1 + $0x68] sm:$0xf]  ;;  %3862 = vperm.xlu0 %7266, %v3859_v2  }
 0x2f2   : > { %v2453_v27 = vpop.f32.mrf.mxu3 }
 0x2f3   : > { %7038 = vmatmul.msk.bf16.vlgmr.msra.gmra.mxu0 %vm549_vm2, %v8824_v57  ;;  %v8915_v58 = vadd.f32 %v2668_v29, %v2585_v55  ;;  %7039 = vmatmul.msk.bf16.vlgmr.msra.gmra.mxu1 %vm549_vm2, %v8824_v57  ;;  %v2461_v16 = vadd.f32 %v2453_v27, %v8811_v31  ;;  %v8928_v57 = vld [vmem:[%s9940_s1 + $0x60] sm:$0xf]  ;;  %v3775_v31 = vsel %vm476_vm0, %v3766_v53, 0 }
 0x2f4   : > { %3542 = vmatpush.bf16.msra.mxu0 %v3521_v38  ;;  %3555 = vmatpush.bf16.msra.mxu1 %v3524_v41 }
 0x2f8   : > { %v2530_v35 = vpop.f32.mrf.mxu0  ;;  %v2543_v3 = vpop.f32.mrf.mxu1 }
 0x2f9   : > { %v2670_v0 = vpop.f32.mrf.mxu2 }
 0x2fa   : > { %v2455_v37 = vpop.f32.mrf.mxu3 }
 0x2fd   : > { %7050 = vmatmul.msk.bf16.vlgmr.msra.gmra.mxu2 %vm549_vm2, %v8928_v57 }
 0x2fe   : > { %3796 = vmatpush.bf16.msra.mxu2 %v3775_v31 }
 0x2ff   : > { %7042 = vmatmul.msk.bf16.vlgmr.msra.gmra.mxu3 %vm549_vm2, %v8892_v45 }
 0x300   : > { %v2580_v17 = vpop.f32.mrf.mxu0  ;;  %v2655_v60 = vpop.f32.mrf.mxu1  ;;  %3581 = vmatpush.bf16.msra.mxu3 %v3530_v4 }
 0x301   : > { %v2588_v40 = vadd.f32 %v2580_v17, %v2461_v16  ;;  %v2782_v14 = vpop.f32.mrf.mxu2  ;;  %v2711_v56 = vadd.f32 %v2655_v60, %v2584_v39  ;;  %v3760_v39 = vpop.permute.xlu0 %3759 }
 0x302   : > { %v2567_v26 = vpop.f32.mrf.mxu3  ;;  %v3768_v52 = vsel %vm9980_vm14, %v8936_v5, %v3760_v39  ;;  %v3769_v55 = vsel %vm9980_vm14, %v3760_v39, %v3762_v49 }
 0x303   : > { %7043 = vmatmul.msk.bf16.vlgmr.msrb.gmra.mxu0 %vm549_vm2, %v8892_v45  ;;  %v8948_v54 = vadd.f32 %v2782_v14, %v2711_v56  ;;  %7044 = vmatmul.msk.bf16.vlgmr.msrb.gmra.mxu1 %vm549_vm2, %v8892_v45  ;;  %v2587_v33 = vadd.f32 %v2567_v26, %v8848_v1  ;;  %v3641_v1 = vsel %vm9981_vm11, %v8885_v59, %v8902_v21  ;;  %v3657_v59 = vsel %vm476_vm0, %v3642_v48, 0 }
 0x304   : > { %3594 = vmatpush.bf16.msrb.mxu0 %v3533_v34  ;;  %3669 = vmatpush.bf16.msrb.mxu1 %v3648_v32  ;;  %v3654_v7 = vsel %vm476_vm0, %v3641_v1, 0  ;;  %v3784_v3 = vsel %vm476_vm0, %v3769_v55, 0 }
 0x308   : > { %v2582_v11 = vpop.f32.mrf.mxu0  ;;  %v2657_v63 = vpop.f32.mrf.mxu1 }
 0x309   : > { %v2784_v18 = vpop.f32.mrf.mxu2 }
 0x30a   : > { %v2569_v28 = vpop.f32.mrf.mxu3 }
 0x30d   : > { %7055 = vmatmul.msk.bf16.vlgmr.msrb.gmra.mxu2 %vm549_vm2, %v8958_v10 }
 0x30e   : > { %3848 = vmatpush.bf16.msrb.mxu2 %v3787_v42 }
 0x30f   : > { %7046 = vmatmul.msk.bf16.vlgmr.msrb.gmra.mxu3 %vm549_vm2, %v8892_v45  ;;  %v3660_v45 = vsel %vm476_vm0, %v3643_v25, 0 }
 0x310   : > { %v2694_v15 = vpop.f32.mrf.mxu0  ;;  %v2707_v51 = vpop.f32.mrf.mxu1  ;;  %3695 = vmatpush.bf16.msrb.mxu3 %v3654_v7 }
 0x311   : > { %v2714_v62 = vadd.f32 %v2694_v15, %v2587_v33  ;;  %v2834_v22 = vpop.f32.mrf.mxu2  ;;  %v2715_v19 = vadd.f32 %v2707_v51, %v2588_v40 }
 0x312   : > { %v2681_v43 = vpop.f32.mrf.mxu3 }
 0x313   : > { %7048 = vmatmul.msk.bf16.vlgmr.msra.gmra.mxu0 %vm549_vm2, %v8928_v57  ;;  %v8977_v50 = vadd.f32 %v2834_v22, %v2715_v19  ;;  %7049 = vmatmul.msk.bf16.vlgmr.msra.gmra.mxu1 %vm549_vm2, %v8928_v57  ;;  %v2713_v20 = vadd.f32 %v2681_v43, %v8879_v30  ;;  %v3767_v30 = vsel %vm9980_vm14, %v8921_v47, %v8936_v5  ;;  %v3781_v47 = vsel %vm476_vm0, %v3768_v52, 0 }
 0x314   : > { %3708 = vmatpush.bf16.msra.mxu0 %v3657_v59  ;;  %3721 = vmatpush.bf16.msra.mxu1 %v3660_v45  ;;  %v3778_v38 = vsel %vm476_vm0, %v3767_v30, 0  ;;  %vm3895_vm0 = vcmask 904192   ;;  %vm3898_vm14 = vcmask 441348  }
 0x318   : > { %v2696_v13 = vpop.f32.mrf.mxu0  ;;  %v2709_v21 = vpop.f32.mrf.mxu1 }
 0x319   : > { %v2836_v9 = vpop.f32.mrf.mxu2 }
 0x31a   : > { %v2683_v23 = vpop.f32.mrf.mxu3 }
 0x31d   : > { %7060 = vmatmul.msk.bf16.vlgmr.msra.gmra.mxu2 %vm549_vm2, %v7059_v24 }
 0x31f   : > { %7051 = vmatmul.msk.bf16.vlgmr.msra.gmra.mxu3 %vm549_vm2, %v8928_v57 }
 0x320   : > { %v2808_v29 = vpop.f32.mrf.mxu0  ;;  %v2821_v27 = vpop.f32.mrf.mxu1  ;;  %3809 = vmatpush.bf16.msra.mxu3 %v3778_v38 }
 0x321   : > { %v2840_v12 = vadd.f32 %v2808_v29, %v2713_v20  ;;  %v2948_v41 = vpop.f32.mrf.mxu2  ;;  %v2841_v16 = vadd.f32 %v2821_v27, %v2714_v62 }
 0x322   : > { %v2795_v36 = vpop.f32.mrf.mxu3 }
 0x323   : > { %7052 = vmatmul.msk.bf16.vlgmr.msrb.gmra.mxu0 %vm549_vm2, %v8928_v57  ;;  %v2968_v35 = vadd.f32 %v2948_v41, %v2841_v16  ;;  %7054 = vmatmul.msk.bf16.vlgmr.msrb.gmra.mxu1 %vm549_vm2, %v8958_v10  ;;  %v2839_v0 = vadd.f32 %v2795_v36, %v8915_v58 }
 0x324   : > { %3822 = vmatpush.bf16.msrb.mxu0 %v3781_v47  ;;  %3835 = vmatpush.bf16.msrb.mxu1 %v3784_v3 }
 0x328   : > { %v2810_v53 = vpop.f32.mrf.mxu0  ;;  %v2823_v37 = vpop.f32.mrf.mxu1 }
 0x329   : > { %v2950_v31 = vpop.f32.mrf.mxu2 }
 0x32a   : > { %v2797_v6 = vpop.f32.mrf.mxu3 }
 0x32d   : > { %7064 = vmatmul.msk.bf16.vlgmr.msrb.gmra.mxu2 %vm549_vm2, %v7059_v24 }
 0x32f   : > { %7056 = vmatmul.msk.bf16.vlgmr.msrb.gmra.mxu3 %vm549_vm2, %v8958_v10 }
 0x330   : > { %v2922_v57 = vpop.f32.mrf.mxu0  ;;  %v2935_v8 = vpop.f32.mrf.mxu1 }
 0x331   : > { %v2966_v5 = vadd.f32 %v2922_v57, %v2839_v0  ;;  %v3062_v17 = vpop.f32.mrf.mxu2  ;;  %v2967_v46 = vadd.f32 %v2935_v8, %v2840_v12 }
 0x332   : > { %v2909_v4 = vpop.f32.mrf.mxu3 }
 0x333   : > { %7057 = vmatmul.msk.bf16.vlgmr.msra.gmra.mxu0 %vm549_vm2, %v8958_v10  ;;  %v3094_v58 = vadd.f32 %v3062_v17, %v2967_v46  ;;  %7058 = vmatmul.msk.bf16.vlgmr.msra.gmra.mxu1 %vm549_vm2, %v8958_v10  ;;  %v2965_v40 = vadd.f32 %v2909_v4, %v8948_v54 }
 0x338   : > { %v2924_v60 = vpop.f32.mrf.mxu0  ;;  %v2937_v14 = vpop.f32.mrf.mxu1 }
 0x339   : > { %v3064_v56 = vpop.f32.mrf.mxu2 }
 0x33a   : > { %v2911_v34 = vpop.f32.mrf.mxu3 }
 0x33f   : > { %7061 = vmatmul.msk.bf16.vlgmr.msra.gmra.mxu3 %vm549_vm2, %v7059_v24 }
 0x340   : > { %v3036_v26 = vpop.f32.mrf.mxu0  ;;  %v3049_v33 = vpop.f32.mrf.mxu1 }
 0x341   : > { %v3092_v32 = vadd.f32 %v3036_v26, %v2965_v40  ;;  %v3176_v49 = vpop.f32.mrf.mxu2  ;;  %v3093_v44 = vadd.f32 %v3049_v33, %v2966_v5 }
 0x342   : > { %v2961_v11 = vpop.f32.mrf.mxu3 }
 0x343   : > { %7062 = vmatmul.msk.bf16.vlgmr.msrb.gmra.mxu0 %vm549_vm2, %v7059_v24  ;;  %v3220_v63 = vadd.f32 %v3176_v49, %v3093_v44  ;;  %7063 = vmatmul.msk.bf16.vlgmr.msrb.gmra.mxu1 %vm549_vm2, %v7059_v24  ;;  %v2969_v18 = vadd.f32 %v2961_v11, %v8977_v50  ;;  %vm3897_vm2 = vcmask 1044024  }
 0x344   : > { %vm3899_vm11 = vmor %vm3898_vm14, %vm3897_vm2  ;;  %vm10017_vm2 = vcmask 220160  }
 0x348   : > { %v3038_v54 = vpop.f32.mrf.mxu0  ;;  %v3051_v61 = vpop.f32.mrf.mxu1 }
 0x349   : > { %v3178_v10 = vpop.f32.mrf.mxu2 }
 0x34a   : > { %v2963_v28 = vpop.f32.mrf.mxu3 }
 0x350   : > { %v3088_v42 = vpop.f32.mrf.mxu0  ;;  %v3163_v48 = vpop.f32.mrf.mxu1 }
 0x351   : > { %v3096_v1 = vadd.f32 %v3088_v42, %v2969_v18  ;;  %v3290_v15 = vpop.f32.mrf.mxu2  ;;  %v3219_v25 = vadd.f32 %v3163_v48, %v3092_v32 }
 0x352   : > { %v3075_v7 = vpop.f32.mrf.mxu3 }
 0x353   : > { %v3346_v62 = vadd.f32 %v3290_v15, %v3219_v25  ;;  %v3095_v51 = vadd.f32 %v3075_v7, %v2968_v35 }
 0x358   : > { %v3090_v22 = vpop.f32.mrf.mxu0  ;;  %v3165_v19 = vpop.f32.mrf.mxu1 }
 0x359   : > { %v3292_v59 = vpop.f32.mrf.mxu2 }
 0x35a   : > { %v3077_v43 = vpop.f32.mrf.mxu3 }
 0x360   : > { %v3202_v45 = vpop.f32.mrf.mxu0  ;;  %v3215_v13 = vpop.f32.mrf.mxu1 }
 0x361   : > { %v3222_v20 = vadd.f32 %v3202_v45, %v3095_v51  ;;  %v3342_v50 = vpop.f32.mrf.mxu2  ;;  %v3223_v21 = vadd.f32 %v3215_v13, %v3096_v1 }
 0x362   : > { %v3189_v9 = vpop.f32.mrf.mxu3 }
 0x363   : > { %v3350_v24 = vadd.f32 %v3342_v50, %v3223_v21  ;;  %v3221_v23 = vadd.f32 %v3189_v9, %v3094_v58  ;;  %v3863_v21 = vpop.permute.xlu0 %3862 }
 0x368   : > { %v3204_v2 = vpop.f32.mrf.mxu0  ;;  %v3217_v39 = vpop.f32.mrf.mxu1 }
 0x369   : > { %v3344_v30 = vpop.f32.mrf.mxu2 }
 0x36a   : > { %v3191_v52 = vpop.f32.mrf.mxu3 }
 0x36b   : > { %v3875_v52 = vld [vmem:[%s9944_s5] sm:$0x1f] }
 0x370   : > { %v3316_v29 = vpop.f32.mrf.mxu0  ;;  %v3329_v38 = vpop.f32.mrf.mxu1 }
 0x371   : > { %v3348_v55 = vadd.f32 %v3316_v29, %v3221_v23  ;;  %v3456_v12 = vpop.f32.mrf.mxu2  ;;  %v3349_v27 = vadd.f32 %v3329_v38, %v3222_v20 }
 0x372   : > { %v3303_v41 = vpop.f32.mrf.mxu3 }
 0x373   : > { %v3476_v16 = vadd.f32 %v3456_v12, %v3349_v27  ;;  %v3347_v47 = vadd.f32 %v3303_v41, %v3220_v63 }
 0x378   : > { %v3318_v36 = vpop.f32.mrf.mxu0  ;;  %v3331_v35 = vpop.f32.mrf.mxu1 }
 0x379   : > { %v3458_v3 = vpop.f32.mrf.mxu2 }
 0x37a   : > { %v3305_v0 = vpop.f32.mrf.mxu3 }
 0x380   : > { %v3430_v53 = vpop.f32.mrf.mxu0  ;;  %v3443_v37 = vpop.f32.mrf.mxu1 }
 0x381   : > { %v3570_v31 = vpop.f32.mrf.mxu2  ;;  %v3475_v15 = vadd.f32 %v3443_v37, %v3348_v55  ;;  %v3474_v19 = vadd.f32 %v3430_v53, %v3347_v47  ;;  %v3877_v37 = vperm.slane %v3875_v52, 0 }
 0x382   : > { %v3417_v6 = vpop.f32.mrf.mxu3 }
 0x383   : > { %v3473_v42 = vadd.f32 %v3417_v6, %v3346_v62  ;;  %v3602_v59 = vadd.f32 %v3570_v31, %v3475_v15  ;;  %v3878_v31 = vperm.slane %v3875_v52, 1 }
 0x388   : > { %v3432_v57 = vpop.f32.mrf.mxu0  ;;  %v3445_v5 = vpop.f32.mrf.mxu1 }
 0x389   : > { %v3572_v8 = vpop.f32.mrf.mxu2 }
 0x38a   : > { %v3419_v17 = vpop.f32.mrf.mxu3 }
 0x390   : > { %v3544_v46 = vpop.f32.mrf.mxu0  ;;  %v3557_v4 = vpop.f32.mrf.mxu1 }
 0x391   : > { %v3684_v58 = vpop.f32.mrf.mxu2  ;;  %v3600_v1 = vadd.f32 %v3544_v46, %v3473_v42  ;;  %v3601_v13 = vadd.f32 %v3557_v4, %v3474_v19 }
 0x392   : > { %v3469_v40 = vpop.f32.mrf.mxu3 }
 0x393   : > { %v3477_v43 = vadd.f32 %v3469_v40, %v3350_v24  ;;  %v3728_v38 = vadd.f32 %v3684_v58, %v3601_v13  ;;  %v3879_v24 = vperm.slane %v3875_v52, 2 }
 0x398   : > { %v3546_v60 = vpop.f32.mrf.mxu0  ;;  %v3559_v14 = vpop.f32.mrf.mxu1 }
 0x399   : > { %v3686_v56 = vpop.f32.mrf.mxu2 }
 0x39a   : > { %v3471_v34 = vpop.f32.mrf.mxu3  ;;  %v3881_v56 = vperm.slane %v3875_v52, 4 }
 0x3a0   : > { %v3596_v26 = vpop.f32.mrf.mxu0  ;;  %v3671_v32 = vpop.f32.mrf.mxu1 }
 0x3a1   : > { %v3798_v33 = vpop.f32.mrf.mxu2  ;;  %v3727_v51 = vadd.f32 %v3671_v32, %v3600_v1  ;;  %v3604_v50 = vadd.f32 %v3596_v26, %v3477_v43 }
 0x3a2   : > { %v3583_v49 = vpop.f32.mrf.mxu3 }
 0x3a3   : > { %v3603_v45 = vadd.f32 %v3583_v49, %v3476_v16  ;;  %v3854_v20 = vadd.f32 %v3798_v33, %v3727_v51  ;;  %v3880_v16 = vperm.slane %v3875_v52, 3  ;;  %v10003_v33 = vmov 0  }
 0x3a4   : > { %3896 = vst.msk [vmem:[#allocation3] sm:$0xf] %vm3895_vm0, %v10003_v33  ;;  %vm3927_vm0 = vcmask 580612  }
 0x3a5   : > { %v3865_v29 = vadd.f32 %v3863_v21, %v3854_v20  ;;  %3900 = vst.msk [vmem:[#allocation3 + $0x14] sm:$0xff] %vm3899_vm11, %v10003_v33  ;;  %vm3928_vm10 = vmor %vm3927_vm0, %vm484_vm3  ;;  %vm10013_vm11 = vcmask 228352  }
 0x3a6   : > { %vm10015_vm14 = vmmov %vm10013_vm11 }
 0x3a7   : > { %v3870_v3 = vmax.f32 %v3865_v29, 0.0  ;;  %v7065_v29 = vld [vmem:[%s9941_s2 + $0x4] sm:$0xf]  ;;  %vm10016_vm15 = vmmov %vm10013_vm11 }
 0x3a8   : > { %v3598_v44 = vpop.f32.mrf.mxu0  ;;  %v3673_v11 = vpop.f32.mrf.mxu1  ;;  %vm10019_vm0 = vmmov %vm10013_vm11 }
 0x3a9   : > { %v3800_v63 = vpop.f32.mrf.mxu2  ;;  %v3887_v58 = vmul.f32 %v3877_v37, %v3870_v3 }
 0x3aa   : > { %v3585_v18 = vpop.f32.mrf.mxu3 }
 0x3b0   : > { %v3710_v54 = vpop.f32.mrf.mxu0  ;;  %v3723_v61 = vpop.f32.mrf.mxu1 }
 0x3b1   : > { %v3850_v10 = vpop.f32.mrf.mxu2  ;;  %v3730_v23 = vadd.f32 %v3710_v54, %v3603_v45  ;;  %v3731_v39 = vadd.f32 %v3723_v61, %v3604_v50 }
 0x3b2   : > { %v3697_v28 = vpop.f32.mrf.mxu3 }
 0x3b3   : > { %v3729_v9 = vadd.f32 %v3697_v28, %v3602_v59  ;;  %v3858_v47 = vadd.f32 %v3850_v10, %v3731_v39 }
 0x3b5   : > { %v3869_v8 = vadd.f32 %v3863_v21, %v3858_v47 }
 0x3b7   : > { %v3874_v14 = vmax.f32 %v3869_v8, 0.0 }
 0x3b8   : > { %v3712_v48 = vpop.f32.mrf.mxu0  ;;  %v3725_v25 = vpop.f32.mrf.mxu1 }
 0x3b9   : > { %v3852_v7 = vpop.f32.mrf.mxu2  ;;  %v3891_v26 = vmul.f32 %v3881_v56, %v3874_v14 }
 0x3ba   : > { %v3699_v22 = vpop.f32.mrf.mxu3 }
 0x3bb   : > { %v3894_v32 = vpack.c.bf16 %v3891_v26, %v3891_v26 }
 0x3c0   : > { %v3824_v2 = vpop.f32.mrf.mxu0  ;;  %v3837_v30 = vpop.f32.mrf.mxu1 }
 0x3c1   : > { %v3856_v62 = vadd.f32 %v3824_v2, %v3729_v9  ;;  %v3857_v55 = vadd.f32 %v3837_v30, %v3730_v23 }
 0x3c2   : > { %v3811_v27 = vpop.f32.mrf.mxu3 }
 0x3c3   : > { %v3867_v12 = vadd.f32 %v3863_v21, %v3856_v62  ;;  %v3868_v41 = vadd.f32 %v3863_v21, %v3857_v55  ;;  %v3855_v36 = vadd.f32 %v3811_v27, %v3728_v38 }
 0x3c5   : > { %v3872_v35 = vmax.f32 %v3867_v12, 0.0  ;;  %v3873_v0 = vmax.f32 %v3868_v41, 0.0  ;;  %v3866_v53 = vadd.f32 %v3863_v21, %v3855_v36 }
 0x3c7   : > { %v3889_v6 = vmul.f32 %v3879_v24, %v3872_v35  ;;  %v3890_v57 = vmul.f32 %v3880_v16, %v3873_v0  ;;  %v3871_v17 = vmax.f32 %v3866_v53, 0.0 }
 0x3c8   : > { %v3826_v5 = vpop.f32.mrf.mxu0  ;;  %v3839_v46 = vpop.f32.mrf.mxu1 }
 0x3c9   : > { %v3893_v4 = vpack.c.bf16 %v3890_v57, %v3889_v6  ;;  %v3888_v40 = vmul.f32 %v3878_v31, %v3871_v17 }
 0x3ca   : > { %v3813_v60 = vpop.f32.mrf.mxu3 }
 0x3cb   : > { %3906 = vrot.lane.b32.xlu2 %v3893_v4, %s7276_s27  ;;  %v3892_v34 = vpack.c.bf16 %v3888_v40, %v3887_v58  ;;  %v3930_v4 = vld [vmem:[%s9941_s2] sm:$0xf] }
 0x3cd   : > { %3904 = vrot.lane.b32.xlu1 %v3892_v34, %s7276_s27 }
 0x3d5   : > { %3908 = vrot.lane.b32.xlu1 %v3894_v32, %s7276_s27 }
 0x425   : > { %v3907_v49 = vpop.permute.xlu2 %3906 }
 0x426   : > { %v3911_v11 = vrot.slane %v3907_v49, 4 }
 0x43f   : > { %v3905_v44 = vpop.permute.xlu1 %3904 }
 0x440   : > { %v3910_v63 = vrot.slane %v3905_v44, 4 }
 0x442   : > { %v3913_v18 = vsel %vm497_vm12, %v3910_v63, %v3905_v44  ;;  %v3915_v54 = vsel %vm484_vm3, %v3910_v63, %v3911_v11  ;;  %v7076_v63 = vld [vmem:[%s9941_s2 + $0x8] sm:$0xf] }
 0x443   : > { %v3916_v61 = vsel %vm497_vm12, %v3915_v54, %v3907_v49  ;;  %3925 = vst.msk [vmem:[#allocation3] sm:$0xff] %vm3924_vm9, %v3913_v18 }
 0x444   : > { %3926 = vst [vmem:[#allocation3 + $0x8] sm:$0xff] %v3916_v61  ;;  %v3941_v10 = vunpack.c.l.b16 %v3916_v61  ;;  %v3942_v59 = vunpack.c.h.b16 %v3916_v61 }
 0x446   : > { %v9029_v28 = vpack.c.b16 %v3941_v10, %v3941_v10  ;;  %v9046_v20 = vpack.c.b16 %v3942_v59, %v3942_v59 }
 0x447   : > { %v3909_v42 = vpop.permute.xlu1 %3908 }
 0x448   : > { %v3912_v1 = vrot.slane %v3909_v42, 4  ;;  %3953 = vrot.lane.b32.xlu1 %v9029_v28, %s7277_s28  ;;  %v4060_v5 = vsel %vm484_vm3, %v9046_v20, 0  ;;  %v4057_v8 = vsel %vm484_vm3, %v9029_v28, 0 }
 0x44a   : > { %v3931_v48 = vld [vmem:[#allocation3] sm:$0xff]  ;;  %v3917_v15 = vsel %vm484_vm3, %v3911_v11, %v3912_v1 }
 0x44b   : > { %v3939_v25 = vunpack.c.l.b16 %v3931_v48  ;;  %v3940_v7 = vunpack.c.h.b16 %v3931_v48  ;;  %v3918_v51 = vsel %vm497_vm12, %v3917_v15, %v3909_v42  ;;  %vm10004_vm12 = vcmask 875520  }
 0x44c   : > { %3929 = vst.msk [vmem:[#allocation3 + $0x10] sm:$0xff] %vm3928_vm10, %v3918_v51  ;;  %vm10020_vm10 = vmmov %vm10019_vm0 }
 0x44d   : > { %v9036_v22 = vpack.c.b16 %v3939_v25, %v3939_v25  ;;  %v9038_v19 = vpack.c.b16 %v3940_v7, %v3940_v7 }
 0x44f   : > { %3951 = vrot.lane.b32.xlu0 %v9038_v19, %s7277_s28  ;;  %3949 = vrot.lane.b32.xlu2 %v9036_v22, %s7277_s28  ;;  %v4054_v52 = vsel %vm484_vm3, %v9038_v19, 0  ;;  %v4051_v35 = vsel %vm484_vm3, %v9036_v22, 0 }
 0x450   : > { %4132 = vrot.lane.b32.xlu1 %v9036_v22, %s7278_s29 }
 0x453   : > { %v3933_v43 = vld [vmem:[#allocation3 + $0x10] sm:$0xf] }
 0x454   : > { %v3943_v45 = vunpack.c.l.b16 %v3933_v43  ;;  %v4862_v21 = vld [vmem:[#allocation3 + $0x10] sm:$0xff] }
 0x455   : > { %v4870_v9 = vunpack.c.l.b16 %v4862_v21  ;;  %v4871_v55 = vunpack.c.h.b16 %v4862_v21 }
 0x456   : > { %v9048_v13 = vpack.c.b16 %v3943_v45, %v3943_v45 }
 0x457   : > { %3955 = vrot.lane.b32.xlu2 %v9046_v20, %s7277_s28  ;;  %v9122_v23 = vpack.c.b16 %v4870_v9, %v4870_v9  ;;  %v9152_v0 = vpack.c.b16 %v4871_v55, %v4871_v55  ;;  %v7082_v55 = vld [vmem:[%s9941_s2 + $0xc] sm:$0xf] }
 0x458   : > { %3957 = vrot.lane.b32.xlu0 %v9048_v13, %s7277_s28  ;;  %4138 = vrot.lane.b32.xlu1 %v9046_v20, %s7278_s29  ;;  %v4063_v53 = vsel %vm484_vm3, %v9048_v13, 0  ;;  %s10023_s28 = smov 46  }
 0x45f   : > { %4134 = vrot.lane.b32.xlu2 %v9038_v19, %s7278_s29 }
 0x460   : > { %4136 = vrot.lane.b32.xlu0 %v9029_v28, %s7278_s29  ;;  %4238 = vrot.lane.b32.xlu1 %v9038_v19, %s7279_s30 }
 0x467   : > { %4140 = vrot.lane.b32.xlu2 %v9048_v13, %s7278_s29  ;;  %s9929_s29 = scalar_lea.vmem %s9945_s6, %s7229_s18 }
 0x468   : > { %4236 = vrot.lane.b32.xlu0 %v9036_v22, %s7279_s30  ;;  %4244 = vrot.lane.b32.xlu1 %v9048_v13, %s7279_s30 }
 0x46f   : > { %4240 = vrot.lane.b32.xlu2 %v9029_v28, %s7279_s30 }
 0x470   : > { %4242 = vrot.lane.b32.xlu0 %v9046_v20, %s7279_s30  ;;  %4344 = vrot.lane.b32.xlu1 %v9029_v28, %s7280_s7 }
 0x477   : > { %4340 = vrot.lane.b32.xlu2 %v9036_v22, %s7280_s7 }
 0x478   : > { %4342 = vrot.lane.b32.xlu0 %v9038_v19, %s7280_s7  ;;  %4444 = vrot.lane.b32.xlu1 %v9036_v22, %s7281_s8 }
 0x47f   : > { %4346 = vrot.lane.b32.xlu2 %v9046_v20, %s7280_s7 }
 0x480   : > { %4348 = vrot.lane.b32.xlu0 %v9048_v13, %s7280_s7  ;;  %4450 = vrot.lane.b32.xlu1 %v9046_v20, %s7281_s8  ;;  %s10028_s7 = smov 45  }
 0x487   : > { %4446 = vrot.lane.b32.xlu2 %v9038_v19, %s7281_s8 }
 0x488   : > { %4448 = vrot.lane.b32.xlu0 %v9029_v28, %s7281_s8  ;;  %4550 = vrot.lane.b32.xlu1 %v9038_v19, %s7282_s9 }
 0x48f   : > { %4452 = vrot.lane.b32.xlu2 %v9048_v13, %s7281_s8  ;;  %s10033_s8 = smov 44  }
 0x490   : > { %4548 = vrot.lane.b32.xlu0 %v9036_v22, %s7282_s9  ;;  %4556 = vrot.lane.b32.xlu1 %v9048_v13, %s7282_s9 }
 0x497   : > { %4552 = vrot.lane.b32.xlu2 %v9029_v28, %s7282_s9 }
 0x498   : > { %4554 = vrot.lane.b32.xlu0 %v9046_v20, %s7282_s9  ;;  %4656 = vrot.lane.b32.xlu1 %v9029_v28, %s7283_s10 }
 0x49f   : > { %4652 = vrot.lane.b32.xlu2 %v9036_v22, %s7283_s10 }
 0x4a0   : > { %4654 = vrot.lane.b32.xlu0 %v9038_v19, %s7283_s10  ;;  %4756 = vrot.lane.b32.xlu1 %v9036_v22, %s7284_s13 }
 0x4a7   : > { %4658 = vrot.lane.b32.xlu2 %v9046_v20, %s7283_s10 }
 0x4a8   : > { %4660 = vrot.lane.b32.xlu0 %v9048_v13, %s7283_s10  ;;  %4762 = vrot.lane.b32.xlu1 %v9046_v20, %s7284_s13 }
 0x4a9   : > { %v3950_v50 = vpop.permute.xlu2 %3949 }
 0x4af   : > { %4758 = vrot.lane.b32.xlu2 %v9038_v19, %s7284_s13 }
 0x4b0   : > { %4760 = vrot.lane.b32.xlu0 %v9029_v28, %s7284_s13  ;;  %4880 = vrot.lane.b32.xlu1 %v9038_v19, %s7285_s14 }
 0x4b1   : > { %v3956_v2 = vpop.permute.xlu2 %3955 }
 0x4b7   : > { %4764 = vrot.lane.b32.xlu2 %v9048_v13, %s7284_s13  ;;  %s10038_s13 = smov 36  }
 0x4b8   : > { %4878 = vrot.lane.b32.xlu0 %v9036_v22, %s7285_s14  ;;  %4886 = vrot.lane.b32.xlu1 %v9122_v23, %s7285_s14 }
 0x4b9   : > { %v4135_v12 = vpop.permute.xlu2 %4134 }
 0x4ba   : > { %v3954_v39 = vpop.permute.xlu1 %3953 }
 0x4bb   : > { %v3961_v62 = vsel %vm544_vm1, %v3954_v39, %v3956_v2 }
 0x4bc   : > { %v3974_v30 = vsel %vm484_vm3, %v3961_v62, 0 }
 0x4bd   : > { %4015 = vmatpush.bf16.msra.mxu1 %v3974_v30 }
 0x4bf   : > { %4882 = vrot.lane.b32.xlu2 %v9029_v28, %s7285_s14 }
 0x4c0   : > { %4884 = vrot.lane.b32.xlu0 %v9046_v20, %s7285_s14  ;;  %4987 = vrot.lane.b32.xlu1 %v9038_v19, %s7286_s17 }
 0x4c1   : > { %4085 = vmatpush.bf16.msrb.mxu1 %v4054_v52  ;;  %v3952_v38 = vpop.permute.xlu0 %3951  ;;  %v4141_v17 = vpop.permute.xlu2 %4140 }
 0x4c2   : > { %7068 = vmatmul.msk.bf16.vlgmr.msra.gmra.mxu1 %vm2368_vm13, %v7065_v29  ;;  %v3959_v24 = vsel %vm544_vm1, %v3950_v50, %v3952_v38  ;;  %v3960_v27 = vsel %vm544_vm1, %v3952_v38, %v3954_v39  ;;  %v4133_v41 = vpop.permute.xlu1 %4132  ;;  %v4162_v58 = vsel %vm484_vm3, %v4141_v17, 0 }
 0x4c3   : > { %v3971_v16 = vsel %vm484_vm3, %v3960_v27, 0  ;;  %v3968_v47 = vsel %vm484_vm3, %v3959_v24, 0  ;;  %v4142_v36 = vsel %vm748_vm4, %v4133_v41, %v4135_v12 }
 0x4c4   : > { %3989 = vmatpush.bf16.msrb.mxu3 %v3968_v47  ;;  %4002 = vmatpush.bf16.msra.mxu0 %v3971_v16  ;;  %v4150_v3 = vsel %vm484_vm3, %v4142_v36, 0 }
 0x4c5   : > { %4171 = vmatpush.bf16.msra.mxu1 %v4150_v3 }
 0x4c7   : > { %7066 = vmatmul.msk.bf16.vlgmr.msrb.gmra.mxu3 %vm2368_vm13, %v7065_v29  ;;  %4888 = vrot.lane.b32.xlu2 %v9152_v0, %s7285_s14 }
 0x4c8   : > { %4072 = vmatpush.bf16.msrb.mxu0 %v4051_v35  ;;  %4985 = vrot.lane.b32.xlu0 %v9036_v22, %s7286_s17 }
 0x4c9   : > { %7067 = vmatmul.msk.bf16.vlgmr.msra.gmra.mxu0 %vm2368_vm13, %v7065_v29  ;;  %4993 = vrot.lane.b32.xlu1 %v9122_v23, %s7286_s17  ;;  %v4241_v49 = vpop.permute.xlu2 %4240 }
 0x4ca   : > { %v3958_v37 = vpop.permute.xlu0 %3957  ;;  %v4139_v46 = vpop.permute.xlu1 %4138 }
 0x4cb   : > { %v3962_v31 = vsel %vm544_vm1, %v3956_v2, %v3958_v37  ;;  %v3980_v6 = vsel %vm484_vm3, %v3958_v37, 0  ;;  %v4145_v34 = vsel %vm748_vm4, %v4139_v46, %v4141_v17  ;;  %vm10005_vm1 = vmmov %vm10004_vm12 }
 0x4cc   : > { %4124 = vmatpush.bf16.msra.mxu0 %v4063_v53  ;;  %v3977_v57 = vsel %vm484_vm3, %v3962_v31, 0  ;;  %4041 = vmatpush.bf16.msra.mxu3 %v3980_v6  ;;  %v4159_v33 = vsel %vm484_vm3, %v4145_v34, 0  ;;  %v7088_v31 = vld [vmem:[%s9941_s2 + $0x10] sm:$0xf] }
 0x4cd   : > { %4028 = vmatpush.bf16.msra.mxu2 %v3977_v57 }
 0x4cf   : > { %4989 = vrot.lane.b32.xlu2 %v9029_v28, %s7286_s17 }
 0x4d0   : > { %4111 = vmatpush.bf16.msrb.mxu3 %v4060_v5  ;;  %4991 = vrot.lane.b32.xlu0 %v9046_v20, %s7286_s17 }
 0x4d1   : > { %4098 = vmatpush.bf16.msrb.mxu2 %v4057_v8  ;;  %5094 = vrot.lane.b32.xlu1 %v9038_v19, %s7287_s20  ;;  %v4341_v42 = vpop.permute.xlu2 %4340 }
 0x4d2   : > { %7069 = vmatmul.msk.bf16.vlgmr.msra.gmra.mxu2 %vm2368_vm13, %v7065_v29  ;;  %7072 = vmatmul.msk.bf16.vlgmr.msrb.gmra.mxu1 %vm2368_vm13, %v3930_v4  ;;  %v4137_v40 = vpop.permute.xlu0 %4136  ;;  %v4239_v32 = vpop.permute.xlu1 %4238 }
 0x4d3   : > { %4223 = vmatpush.bf16.msrb.mxu1 %v4162_v58  ;;  %v4143_v60 = vsel %vm748_vm4, %v4135_v12, %v4137_v40  ;;  %v4144_v56 = vsel %vm748_vm4, %v4137_v40, %v4139_v46  ;;  %v4247_v1 = vsel %vm870_vm5, %v4239_v32, %v4241_v49  ;;  %vm10006_vm4 = vmmov %vm10005_vm1 }
 0x4d4   : > { %v4153_v14 = vsel %vm484_vm3, %v4143_v60, 0  ;;  %v4156_v26 = vsel %vm484_vm3, %v4144_v56, 0  ;;  %v4257_v25 = vsel %vm484_vm3, %v4247_v1, 0 }
 0x4d5   : > { %4184 = vmatpush.bf16.msra.mxu2 %v4153_v14  ;;  %v7094_v14 = vld [vmem:[%s9941_s2 + $0x14] sm:$0xf] }
 0x4d7   : > { %4995 = vrot.lane.b32.xlu2 %v9152_v0, %s7286_s17  ;;  %7070 = vmatmul.msk.bf16.vlgmr.msra.gmra.mxu3 %vm2368_vm13, %v7065_v29 }
 0x4d8   : > { %4197 = vmatpush.bf16.msra.mxu3 %v4156_v26  ;;  %5092 = vrot.lane.b32.xlu0 %v9036_v22, %s7287_s20 }
 0x4d9   : > { %7071 = vmatmul.msk.bf16.vlgmr.msrb.gmra.mxu0 %vm2368_vm13, %v3930_v4  ;;  %5100 = vrot.lane.b32.xlu1 %v9122_v23, %s7287_s20  ;;  %v4347_v43 = vpop.permute.xlu2 %4346 }
 0x4da   : > { %4210 = vmatpush.bf16.msrb.mxu0 %v4159_v33  ;;  %v4237_v44 = vpop.permute.xlu0 %4236  ;;  %v4245_v61 = vpop.permute.xlu1 %4244 }
 0x4db   : > { %v4246_v11 = vsel %vm870_vm5, %v4237_v44, %v4239_v32  ;;  %v4266_v13 = vsel %vm484_vm3, %v4245_v61, 0 }
 0x4dc   : > { %v4254_v18 = vsel %vm484_vm3, %v4246_v11, 0 }
 0x4df   : > { %5096 = vrot.lane.b32.xlu2 %v9029_v28, %s7287_s20 }
 0x4e0   : > { %5098 = vrot.lane.b32.xlu0 %v9046_v20, %s7287_s20 }
 0x4e1   : > { %5201 = vrot.lane.b32.xlu1 %v9038_v19, %s7288_s23  ;;  %v4447_v38 = vpop.permute.xlu2 %4446 }
 0x4e2   : > { %7073 = vmatmul.msk.bf16.vlgmr.msrb.gmra.mxu2 %vm2368_vm13, %v3930_v4  ;;  %v4243_v54 = vpop.permute.xlu0 %4242  ;;  %7077 = vmatmul.msk.bf16.vlgmr.msra.gmra.mxu1 %vm2368_vm13, %v7076_v63  ;;  %v4345_v59 = vpop.permute.xlu1 %4344 }
 0x4e3   : > { %4275 = vmatpush.bf16.msrb.mxu2 %v4254_v18  ;;  %v4249_v10 = vsel %vm870_vm5, %v4243_v54, %v4245_v61  ;;  %v4248_v15 = vsel %vm870_vm5, %v4241_v49, %v4243_v54  ;;  %v4352_v45 = vsel %vm992_vm6, %v4345_v59, %v4347_v43  ;;  %vm10007_vm5 = vmmov %vm10005_vm1 }
 0x4e4   : > { %v4263_v48 = vsel %vm484_vm3, %v4249_v10, 0  ;;  %v4260_v7 = vsel %vm484_vm3, %v4248_v15, 0  ;;  %v4364_v50 = vsel %vm484_vm3, %v4352_v45, 0 }
 0x4e5   : > { %4314 = vmatpush.bf16.msra.mxu1 %v4263_v48 }
 0x4e7   : > { %5102 = vrot.lane.b32.xlu2 %v9152_v0, %s7287_s20  ;;  %7074 = vmatmul.msk.bf16.vlgmr.msrb.gmra.mxu3 %vm2368_vm13, %v3930_v4  ;;  %s10043_s20 = smov 35  }
 0x4e8   : > { %4288 = vmatpush.bf16.msrb.mxu3 %v4257_v25  ;;  %5199 = vrot.lane.b32.xlu0 %v9036_v22, %s7288_s23 }
 0x4e9   : > { %7075 = vmatmul.msk.bf16.vlgmr.msra.gmra.mxu0 %vm2368_vm13, %v3930_v4  ;;  %5207 = vrot.lane.b32.xlu1 %v9122_v23, %s7288_s23  ;;  %v4453_v6 = vpop.permute.xlu2 %4452 }
 0x4ea   : > { %4301 = vmatpush.bf16.msra.mxu0 %v4260_v7  ;;  %v4343_v51 = vpop.permute.xlu0 %4342  ;;  %v4445_v30 = vpop.permute.xlu1 %4444  ;;  %v4474_v4 = vsel %vm484_vm3, %v4453_v6, 0 }
 0x4eb   : > { %v4350_v9 = vsel %vm992_vm6, %v4341_v42, %v4343_v51  ;;  %v4351_v2 = vsel %vm992_vm6, %v4343_v51, %v4345_v59  ;;  %v4454_v16 = vsel %vm1114_vm7, %v4445_v30, %v4447_v38  ;;  %v7100_v42 = vld [vmem:[%s9941_s2 + $0x18] sm:$0xf] }
 0x4ec   : > { %v4358_v39 = vsel %vm484_vm3, %v4350_v9, 0  ;;  %v4361_v62 = vsel %vm484_vm3, %v4351_v2, 0  ;;  %v4462_v36 = vsel %vm484_vm3, %v4454_v16, 0  ;;  %v5841_v59 = vld [vmem:[#allocation3 + $0x4] sm:$0xff] }
 0x4ed   : > { %v5848_v45 = vunpack.c.h.b16 %v5841_v59 }
 0x4ef   : > { %5203 = vrot.lane.b32.xlu2 %v9029_v28, %s7288_s23  ;;  %v9354_v9 = vpack.c.b16 %v5848_v45, %v5848_v45 }
 0x4f0   : > { %5205 = vrot.lane.b32.xlu0 %v9046_v20, %s7288_s23 }
 0x4f1   : > { %5308 = vrot.lane.b32.xlu1 %v9038_v19, %s7289_s12  ;;  %v4553_v58 = vpop.permute.xlu2 %4552 }
 0x4f2   : > { %7078 = vmatmul.msk.bf16.vlgmr.msra.gmra.mxu2 %vm2368_vm13, %v7076_v63  ;;  %v4349_v21 = vpop.permute.xlu0 %4348  ;;  %7081 = vmatmul.msk.bf16.vlgmr.msrb.gmra.mxu1 %vm2368_vm13, %v7076_v63  ;;  %v4451_v41 = vpop.permute.xlu1 %4450 }
 0x4f3   : > { %4327 = vmatpush.bf16.msra.mxu2 %v4266_v13  ;;  %4405 = vmatpush.bf16.msrb.mxu1 %v4364_v50  ;;  %v4353_v29 = vsel %vm992_vm6, %v4347_v43, %v4349_v21  ;;  %v4370_v47 = vsel %vm484_vm3, %v4349_v21, 0  ;;  %v4457_v8 = vsel %vm1114_vm7, %v4451_v41, %v4453_v6  ;;  %vm10008_vm6 = vcmask 867328  }
 0x4f4   : > { %v4367_v24 = vsel %vm484_vm3, %v4353_v29, 0  ;;  %v4471_v17 = vsel %vm484_vm3, %v4457_v8, 0  ;;  %vm10012_vm9 = vmmov %vm10008_vm6 }
 0x4f7   : > { %5209 = vrot.lane.b32.xlu2 %v9152_v0, %s7288_s23  ;;  %7079 = vmatmul.msk.bf16.vlgmr.msra.gmra.mxu3 %vm2368_vm13, %v7076_v63 }
 0x4f8   : > { %4379 = vmatpush.bf16.msra.mxu3 %v4358_v39  ;;  %5306 = vrot.lane.b32.xlu0 %v9036_v22, %s7289_s12 }
 0x4f9   : > { %7080 = vmatmul.msk.bf16.vlgmr.msrb.gmra.mxu0 %vm2368_vm13, %v7076_v63  ;;  %5314 = vrot.lane.b32.xlu1 %v9122_v23, %s7289_s12  ;;  %v4653_v32 = vpop.permute.xlu2 %4652 }
 0x4fa   : > { %4392 = vmatpush.bf16.msrb.mxu0 %v4361_v62  ;;  %v4449_v52 = vpop.permute.xlu0 %4448  ;;  %v4551_v53 = vpop.permute.xlu1 %4550 }
 0x4fb   : > { %v4455_v12 = vsel %vm1114_vm7, %v4447_v38, %v4449_v52  ;;  %v4456_v3 = vsel %vm1114_vm7, %v4449_v52, %v4451_v41  ;;  %v4559_v40 = vsel %vm1236_vm8, %v4551_v53, %v4553_v58  ;;  %vm10010_vm7 = vmmov %vm10008_vm6 }
 0x4fc   : > { %v4465_v27 = vsel %vm484_vm3, %v4455_v12, 0  ;;  %v4468_v57 = vsel %vm484_vm3, %v4456_v3, 0  ;;  %v4569_v56 = vsel %vm484_vm3, %v4559_v40, 0 }
 0x4ff   : > { %5310 = vrot.lane.b32.xlu2 %v9029_v28, %s7289_s12 }
 0x500   : > { %5312 = vrot.lane.b32.xlu0 %v9046_v20, %s7289_s12 }
 0x501   : > { %5415 = vrot.lane.b32.xlu1 %v9038_v19, %s7290_s15  ;;  %v4659_v61 = vpop.permute.xlu2 %4658 }
 0x502   : > { %7083 = vmatmul.msk.bf16.vlgmr.msrb.gmra.mxu2 %vm2368_vm13, %v7082_v55  ;;  %7086 = vmatmul.msk.bf16.vlgmr.msra.gmra.mxu1 %vm2368_vm13, %v7082_v55  ;;  %v4549_v35 = vpop.permute.xlu0 %4548  ;;  %v4557_v60 = vpop.permute.xlu1 %4556 }
 0x503   : > { %4418 = vmatpush.bf16.msrb.mxu2 %v4367_v24  ;;  %4496 = vmatpush.bf16.msra.mxu1 %v4465_v27  ;;  %v4558_v37 = vsel %vm1236_vm8, %v4549_v35, %v4551_v53  ;;  %v4578_v34 = vsel %vm484_vm3, %v4557_v60, 0 }
 0x504   : > { %v4566_v5 = vsel %vm484_vm3, %v4558_v37, 0 }
 0x507   : > { %5316 = vrot.lane.b32.xlu2 %v9152_v0, %s7289_s12  ;;  %7084 = vmatmul.msk.bf16.vlgmr.msrb.gmra.mxu3 %vm2368_vm13, %v7082_v55 }
 0x508   : > { %4431 = vmatpush.bf16.msrb.mxu3 %v4370_v47  ;;  %5413 = vrot.lane.b32.xlu0 %v9036_v22, %s7290_s15 }
 0x509   : > { %7085 = vmatmul.msk.bf16.vlgmr.msra.gmra.mxu0 %vm2368_vm13, %v7082_v55  ;;  %5421 = vrot.lane.b32.xlu1 %v9122_v23, %s7290_s15  ;;  %v4759_v43 = vpop.permute.xlu2 %4758 }
 0x50a   : > { %4483 = vmatpush.bf16.msra.mxu0 %v4462_v36  ;;  %v4555_v46 = vpop.permute.xlu0 %4554  ;;  %v4657_v63 = vpop.permute.xlu1 %4656 }
 0x50b   : > { %v4560_v33 = vsel %vm1236_vm8, %v4553_v58, %v4555_v46  ;;  %v4561_v49 = vsel %vm1236_vm8, %v4555_v46, %v4557_v60  ;;  %v4664_v7 = vsel %vm10007_vm5, %v4657_v63, %v4659_v61  ;;  %vm10011_vm8 = vmmov %vm10008_vm6 }
 0x50c   : > { %v4572_v44 = vsel %vm484_vm3, %v4560_v33, 0  ;;  %v4575_v11 = vsel %vm484_vm3, %v4561_v49, 0 }
 0x50f   : > { %5417 = vrot.lane.b32.xlu2 %v9029_v28, %s7290_s15 }
 0x510   : > { %5419 = vrot.lane.b32.xlu0 %v9046_v20, %s7290_s15 }
 0x511   : > { %5522 = vrot.lane.b32.xlu1 %v9038_v19, %s7291_s19 }
 0x512   : > { %7087 = vmatmul.msk.bf16.vlgmr.msra.gmra.mxu2 %vm2368_vm13, %v7082_v55  ;;  %7091 = vmatmul.msk.bf16.vlgmr.msrb.gmra.mxu1 %vm2368_vm13, %v7088_v31  ;;  %v4655_v26 = vpop.permute.xlu0 %4654  ;;  %v4757_v25 = vpop.permute.xlu1 %4756 }
 0x513   : > { %4509 = vmatpush.bf16.msra.mxu2 %v4468_v57  ;;  %4587 = vmatpush.bf16.msrb.mxu1 %v4566_v5  ;;  %v4662_v54 = vsel %vm10004_vm12, %v4653_v32, %v4655_v26  ;;  %v4663_v15 = vsel %vm10006_vm4, %v4655_v26, %v4657_v63  ;;  %v4766_v52 = vsel %vm10010_vm7, %v4757_v25, %v4759_v43  ;;  %v7112_v25 = vld [vmem:[%s9941_s2 + $0x20] sm:$0xf]  ;;  %vm10021_vm12 = vmmov %vm10017_vm2 }
 0x514   : > { %v4670_v1 = vsel %vm484_vm3, %v4662_v54, 0  ;;  %v4673_v51 = vsel %vm484_vm3, %v4663_v15, 0  ;;  %v4774_v41 = vsel %vm484_vm3, %v4766_v52, 0 }
 0x517   : > { %5423 = vrot.lane.b32.xlu2 %v9152_v0, %s7290_s15  ;;  %7089 = vmatmul.msk.bf16.vlgmr.msra.gmra.mxu3 %vm2368_vm13, %v7088_v31  ;;  %s10009_s15 = smov 56  }
 0x518   : > { %4522 = vmatpush.bf16.msra.mxu3 %v4471_v17  ;;  %5520 = vrot.lane.b32.xlu0 %v9036_v22, %s7291_s19 }
 0x519   : > { %7090 = vmatmul.msk.bf16.vlgmr.msrb.gmra.mxu0 %vm2368_vm13, %v7088_v31  ;;  %5528 = vrot.lane.b32.xlu1 %v9122_v23, %s7291_s19 }
 0x51a   : > { %4535 = vmatpush.bf16.msrb.mxu0 %v4474_v4  ;;  %v4661_v18 = vpop.permute.xlu0 %4660  ;;  %v4763_v50 = vpop.permute.xlu1 %4762 }
 0x51b   : > { %v4665_v10 = vsel %vm10005_vm1, %v4659_v61, %v4661_v18  ;;  %v4682_v39 = vsel %vm484_vm3, %v4661_v18, 0  ;;  %vm10022_vm1 = vmmov %vm10017_vm2 }
 0x51c   : > { %v4679_v48 = vsel %vm484_vm3, %v4665_v10, 0  ;;  %vm10024_vm4 = vmmov %vm10022_vm1 }
 0x51d   : > { %vm10025_vm5 = vmmov %vm10022_vm1 }
 0x51f   : > { %5524 = vrot.lane.b32.xlu2 %v9029_v28, %s7291_s19 }
 0x520   : > { %5526 = vrot.lane.b32.xlu0 %v9046_v20, %s7291_s19 }
 0x521   : > { %5629 = vrot.lane.b32.xlu1 %v9038_v19, %s7292_s26 }
 0x522   : > { %7092 = vmatmul.msk.bf16.vlgmr.msrb.gmra.mxu2 %vm2368_vm13, %v7088_v31  ;;  %7096 = vmatmul.msk.bf16.vlgmr.msra.gmra.mxu1 %vm2368_vm13, %v7094_v14  ;;  %v4761_v13 = vpop.permute.xlu0 %4760  ;;  %v4881_v35 = vpop.permute.xlu1 %4880 }
 0x523   : > { %4600 = vmatpush.bf16.msrb.mxu2 %v4569_v56  ;;  %4639 = vmatpush.bf16.msra.mxu1 %v4578_v34  ;;  %v4768_v2 = vsel %vm10008_vm6, %v4761_v13, %v4763_v50  ;;  %v4767_v38 = vsel %vm10011_vm8, %v4759_v43, %v4761_v13  ;;  %vm10026_vm6 = vcmask 211968  }
 0x524   : > { %v4780_v62 = vsel %vm484_vm3, %v4768_v2, 0  ;;  %v4777_v47 = vsel %vm484_vm3, %v4767_v38, 0  ;;  %vm10027_vm7 = vmmov %vm10026_vm6 }
 0x525   : > { %vm10029_vm8 = vmmov %vm10026_vm6 }
 0x527   : > { %5530 = vrot.lane.b32.xlu2 %v9152_v0, %s7291_s19  ;;  %7093 = vmatmul.msk.bf16.vlgmr.msrb.gmra.mxu3 %vm2368_vm13, %v7088_v31  ;;  %v7106_v31 = vld [vmem:[%s9941_s2 + $0x1c] sm:$0xf] }
 0x528   : > { %4613 = vmatpush.bf16.msrb.mxu3 %v4572_v44  ;;  %5627 = vrot.lane.b32.xlu0 %v9036_v22, %s7292_s26 }
 0x529   : > { %7095 = vmatmul.msk.bf16.vlgmr.msra.gmra.mxu0 %vm2368_vm13, %v7094_v14  ;;  %5635 = vrot.lane.b32.xlu1 %v9122_v23, %s7292_s26 }
 0x52a   : > { %4626 = vmatpush.bf16.msra.mxu0 %v4575_v11  ;;  %v4879_v12 = vpop.permute.xlu0 %4878  ;;  %v4887_v56 = vpop.permute.xlu1 %4886 }
 0x52b   : > { %v4890_v26 = vsel %vm10015_vm14, %v4879_v12, %v4881_v35  ;;  %vm10032_vm14 = vcmask 146432  }
 0x52c   : > { %v4899_v63 = vsel %vm484_vm3, %v4890_v26, 0 }
 0x52f   : > { %5631 = vrot.lane.b32.xlu2 %v9029_v28, %s7292_s26 }
 0x530   : > { %5633 = vrot.lane.b32.xlu0 %v9046_v20, %s7292_s26 }
 0x531   : > { %5736 = vrot.lane.b32.xlu1 %v9038_v19, %s7293_s11  ;;  %v4676_v19 = vsel %vm484_vm3, %v4664_v7, 0 }
 0x532   : > { %7097 = vmatmul.msk.bf16.vlgmr.msra.gmra.mxu2 %vm2368_vm13, %v7094_v14  ;;  %7101 = vmatmul.msk.bf16.vlgmr.msrb.gmra.mxu1 %vm2368_vm13, %v7100_v42  ;;  %v4885_v4 = vpop.permute.xlu0 %4884 }
 0x533   : > { %4691 = vmatpush.bf16.msra.mxu2 %v4670_v1  ;;  %4730 = vmatpush.bf16.msrb.mxu1 %v4679_v48  ;;  %v4893_v13 = vsel %vm10019_vm0, %v4885_v4, %v4887_v56 }
 0x537   : > { %5637 = vrot.lane.b32.xlu2 %v9152_v0, %s7292_s26  ;;  %7098 = vmatmul.msk.bf16.vlgmr.msra.gmra.mxu3 %vm2368_vm13, %v7094_v14 }
 0x538   : > { %4704 = vmatpush.bf16.msra.mxu3 %v4673_v51  ;;  %5734 = vrot.lane.b32.xlu0 %v9036_v22, %s7293_s11  ;;  %v5843_v22 = vld [vmem:[#allocation3 + $0x14] sm:$0xff] }
 0x539   : > { %7099 = vmatmul.msk.bf16.vlgmr.msrb.gmra.mxu0 %vm2368_vm13, %v7094_v14  ;;  %5742 = vrot.lane.b32.xlu1 %v9122_v23, %s7293_s11  ;;  %v5847_v23 = vunpack.c.l.b16 %v5841_v59  ;;  %v5851_v30 = vunpack.c.l.b16 %v5843_v22  ;;  %v5852_v58 = vunpack.c.h.b16 %v5843_v22 }
 0x53a   : > { %4717 = vmatpush.bf16.msrb.mxu0 %v4676_v19  ;;  %v4986_v18 = vpop.permute.xlu0 %4985 }
 0x53b   : > { %v9368_v55 = vpack.c.b16 %v5847_v23, %v5847_v23  ;;  %v9371_v27 = vpack.c.b16 %v5851_v30, %v5851_v30  ;;  %v9404_v34 = vpack.c.b16 %v5852_v58, %v5852_v58  ;;  %v4908_v23 = vsel %vm484_vm3, %v4893_v13, 0 }
 0x53f   : > { %v9352_v21 = vpop.f32.mrf.mxu1  ;;  %5738 = vrot.lane.b32.xlu2 %v9029_v28, %s7293_s11  ;;  %v4765_v28 = vpop.permute.xlu2 %4764 }
 0x540   : > { %5740 = vrot.lane.b32.xlu0 %v9046_v20, %s7293_s11  ;;  %v5842_v20 = vld [vmem:[#allocation3 + $0xc] sm:$0xff]  ;;  %v4786_v49 = vsel %vm484_vm3, %v4765_v28, 0 }
 0x541   : > { %5861 = vrot.lane.b32.xlu1 %v9354_v9, %s10009_s15  ;;  %v5849_v16 = vunpack.c.l.b16 %v5842_v20  ;;  %v5850_v36 = vunpack.c.h.b16 %v5842_v20 }
 0x542   : > { %7102 = vmatmul.msk.bf16.vlgmr.msrb.gmra.mxu2 %vm2368_vm13, %v7100_v42  ;;  %7105 = vmatmul.msk.bf16.vlgmr.msra.gmra.mxu1 %vm2368_vm13, %v7100_v42 }
 0x543   : > { %4743 = vmatpush.bf16.msrb.mxu2 %v4682_v39  ;;  %4821 = vmatpush.bf16.msra.mxu1 %v4780_v62  ;;  %v9383_v53 = vpack.c.b16 %v5849_v16, %v5849_v16  ;;  %v9389_v6 = vpack.c.b16 %v5850_v36, %v5850_v36  ;;  %v9454_v36 = vld [vmem:[%s9941_s2 + $0x24] sm:$0xf] }
 0x546   : > { %v4004_v29 = vpop.f32.mrf.mxu0 }
 0x547   : > { %v4019_v24 = vpop.f32.mrf.mxu1  ;;  %5744 = vrot.lane.b32.xlu2 %v9152_v0, %s7293_s11  ;;  %7103 = vmatmul.msk.bf16.vlgmr.msrb.gmra.mxu3 %vm2368_vm13, %v7100_v42  ;;  %v4769_v0 = vsel %vm10012_vm9, %v4763_v50, %v4765_v28  ;;  %v4883_v57 = vpop.permute.xlu2 %4882  ;;  %s10014_s11 = smov 55   ;;  %vm10030_vm9 = vmmov %vm10026_vm6 }
 0x548   : > { %4795 = vmatpush.bf16.msrb.mxu3 %v4774_v41  ;;  %5859 = vrot.lane.b32.xlu0 %v9368_v55, %s10009_s15  ;;  %v4891_v8 = vsel %vm10013_vm11, %v4881_v35, %v4883_v57  ;;  %v4783_v46 = vsel %vm484_vm3, %v4769_v0, 0  ;;  %v4892_v10 = vsel %vm10016_vm15, %v4883_v57, %v4885_v4  ;;  %v4992_v50 = vpop.permute.xlu0 %4991  ;;  %vm10031_vm11 = vmmov %vm10026_vm6 }
 0x549   : > { %7104 = vmatmul.msk.bf16.vlgmr.msra.gmra.mxu0 %vm2368_vm13, %v7100_v42  ;;  %5867 = vrot.lane.b32.xlu1 %v9371_v27, %s10009_s15  ;;  %v4902_v40 = vsel %vm484_vm3, %v4891_v8, 0  ;;  %v4988_v42 = vpop.permute.xlu1 %4987  ;;  %v4905_v7 = vsel %vm484_vm3, %v4892_v10, 0  ;;  %vm10034_vm15 = vmmov %vm10032_vm14 }
 0x54a   : > { %4808 = vmatpush.bf16.msra.mxu0 %v4777_v47  ;;  %v3991_v3 = vpop.f32.mrf.mxu3  ;;  %v4997_v48 = vsel %vm10017_vm2, %v4986_v18, %v4988_v42  ;;  %vm10035_vm2 = vmmov %vm10032_vm14 }
 0x54b   : > { %v5006_v19 = vsel %vm484_vm3, %v4997_v48, 0  ;;  %vm10036_vm0 = vmmov %vm10035_vm2 }
 0x54e   : > { %v4006_v37 = vpop.f32.mrf.mxu0 }
 0x54f   : > { %v4087_v5 = vpop.f32.mrf.mxu1  ;;  %5863 = vrot.lane.b32.xlu2 %v9383_v53, %s10009_s15  ;;  %v4889_v11 = vpop.permute.xlu2 %4888 }
 0x550   : > { %v9394_v17 = vadd.f32 %v4087_v5, %v4004_v29  ;;  %5865 = vrot.lane.b32.xlu0 %v9389_v6, %s10009_s15  ;;  %v4894_v22 = vsel %vm10020_vm10, %v4887_v56, %v4889_v11  ;;  %v5093_v24 = vpop.permute.xlu0 %5092  ;;  %vm10037_vm10 = vcmask 138240  }
 0x551   : > { %5968 = vrot.lane.b32.xlu1 %v9354_v9, %s10014_s11  ;;  %v4994_v28 = vpop.permute.xlu1 %4993  ;;  %v4911_v52 = vsel %vm484_vm3, %v4894_v22, 0 }
 0x552   : > { %7107 = vmatmul.msk.bf16.vlgmr.msra.gmra.mxu2 %vm2368_vm13, %v7106_v31  ;;  %v3993_v60 = vpop.f32.mrf.mxu3  ;;  %7110 = vmatmul.msk.bf16.vlgmr.msrb.gmra.mxu1 %vm2368_vm13, %v7106_v31  ;;  %v5000_v4 = vsel %vm10025_vm5, %v4992_v50, %v4994_v28  ;;  %vm10042_vm5 = vcmask 130048  }
 0x553   : > { %4834 = vmatpush.bf16.msra.mxu2 %v4783_v46  ;;  %4933 = vmatpush.bf16.msrb.mxu1 %v4902_v40 }
 0x555   : > { %v4030_v14 = vpop.f32.mrf.mxu2 }
 0x556   : > { %v4074_v32 = vpop.f32.mrf.mxu0 }
 0x557   : > { %v4089_v33 = vpop.f32.mrf.mxu1  ;;  %v4075_v44 = vadd.f32 %v4074_v32, %v3991_v3  ;;  %5869 = vrot.lane.b32.xlu2 %v9404_v34, %s10009_s15  ;;  %7108 = vmatmul.msk.bf16.vlgmr.msra.gmra.mxu3 %vm2368_vm13, %v7106_v31  ;;  %v4990_v59 = vpop.permute.xlu2 %4989  ;;  %s10048_s15 = smov 34  }
 0x558   : > { %4847 = vmatpush.bf16.msra.mxu3 %v4786_v49  ;;  %5966 = vrot.lane.b32.xlu0 %v9368_v55, %s10014_s11  ;;  %v4998_v12 = vsel %vm10021_vm12, %v4988_v42, %v4990_v59  ;;  %v4999_v5 = vsel %vm10024_vm4, %v4990_v59, %v4992_v50  ;;  %v5099_v56 = vpop.permute.xlu0 %5098  ;;  %vm10039_vm12 = vmmov %vm10036_vm0 }
 0x559   : > { %7109 = vmatmul.msk.bf16.vlgmr.msrb.gmra.mxu0 %vm2368_vm13, %v7106_v31  ;;  %5974 = vrot.lane.b32.xlu1 %v9371_v27, %s10014_s11  ;;  %v5009_v35 = vsel %vm484_vm3, %v4998_v12, 0  ;;  %v5095_v37 = vpop.permute.xlu1 %5094  ;;  %v5012_v40 = vsel %vm484_vm3, %v4999_v5, 0 }
 0x55a   : > { %4920 = vmatpush.bf16.msrb.mxu0 %v4899_v63  ;;  %v4043_v54 = vpop.f32.mrf.mxu3 }
 0x55d   : > { %v4032_v61 = vpop.f32.mrf.mxu2 }
 0x55e   : > { %v4076_v1 = vpop.f32.mrf.mxu0 }
 0x55f   : > { %5970 = vrot.lane.b32.xlu2 %v9383_v53, %s10014_s11  ;;  %v4173_v15 = vpop.f32.mrf.mxu1  ;;  %v4996_v38 = vpop.permute.xlu2 %4995 }
 0x560   : > { %5972 = vrot.lane.b32.xlu0 %v9389_v6, %s10014_s11  ;;  %v9428_v51 = vadd.f32 %v4173_v15, %v4075_v44  ;;  %v5001_v16 = vsel %vm10022_vm1, %v4994_v28, %v4996_v38  ;;  %v5104_v44 = vsel %vm10026_vm6, %v5093_v24, %v5095_v37  ;;  %v5200_v48 = vpop.permute.xlu0 %5199  ;;  %vm10040_vm1 = vmmov %vm10037_vm10 }
 0x561   : > { %6075 = vrot.lane.b32.xlu1 %v9354_v9, %s10018_s24  ;;  %v5018_v0 = vsel %vm484_vm3, %v5001_v16, 0  ;;  %v5101_v49 = vpop.permute.xlu1 %5100  ;;  %v5113_v10 = vsel %vm484_vm3, %v5104_v44, 0  ;;  %vm10041_vm4 = vmmov %vm10040_vm1 }
 0x562   : > { %7111 = vmatmul.msk.bf16.vlgmr.msrb.gmra.mxu2 %vm2368_vm13, %v7106_v31  ;;  %v4045_v43 = vpop.f32.mrf.mxu3  ;;  %7115 = vmatmul.msk.bf16.vlgmr.msra.gmra.mxu1 %vm2368_vm13, %v7112_v25  ;;  %v5107_v63 = vsel %vm10027_vm7, %v5099_v56, %v5101_v49  ;;  %vm10044_vm6 = vmmov %vm10040_vm1 }
 0x563   : > { %4946 = vmatpush.bf16.msrb.mxu2 %v4905_v7  ;;  %5027 = vmatpush.bf16.msra.mxu1 %v5006_v19  ;;  %v5122_v1 = vsel %vm484_vm3, %v5107_v63, 0  ;;  %vm10045_vm7 = vmmov %vm10040_vm1 }
 0x565   : > { %v4100_v45 = vpop.f32.mrf.mxu2 }
 0x566   : > { %v4101_v2 = vadd.f32 %v4100_v45, %v9352_v21  ;;  %v4126_v39 = vpop.f32.mrf.mxu0 }
 0x567   : > { %v4127_v62 = vadd.f32 %v4126_v39, %v4043_v54  ;;  %5976 = vrot.lane.b32.xlu2 %v9404_v34, %s10014_s11  ;;  %7113 = vmatmul.msk.bf16.vlgmr.msrb.gmra.mxu3 %vm2368_vm13, %v7112_v25  ;;  %v4175_v30 = vpop.f32.mrf.mxu1  ;;  %v5097_v46 = vpop.permute.xlu2 %5096  ;;  %v9488_v54 = vld [vmem:[%s9941_s2 + $0x28] sm:$0xf] }
 0x568   : > { %4959 = vmatpush.bf16.msrb.mxu3 %v4908_v23  ;;  %6073 = vrot.lane.b32.xlu0 %v9368_v55, %s10018_s24  ;;  %v5105_v7 = vsel %vm10029_vm8, %v5095_v37, %v5097_v46  ;;  %v5106_v19 = vsel %vm10030_vm9, %v5097_v46, %v5099_v56  ;;  %v5206_v30 = vpop.permute.xlu0 %5205  ;;  %vm10046_vm8 = vmmov %vm10042_vm5 }
 0x569   : > { %7114 = vmatmul.msk.bf16.vlgmr.msra.gmra.mxu0 %vm2368_vm13, %v7112_v25  ;;  %6081 = vrot.lane.b32.xlu1 %v9371_v27, %s10018_s24  ;;  %v5202_v43 = vpop.permute.xlu1 %5201  ;;  %v5116_v13 = vsel %vm484_vm3, %v5105_v7, 0  ;;  %vm10047_vm9 = vmmov %vm10042_vm5 }
 0x56a   : > { %4972 = vmatpush.bf16.msra.mxu0 %v4911_v52  ;;  %v4113_v21 = vpop.f32.mrf.mxu3 }
 0x56b   : > { %v4114_v29 = vadd.f32 %v4113_v21, %v4030_v14 }
 0x56d   : > { %v4102_v20 = vpop.f32.mrf.mxu2 }
 0x56e   : > { %v4128_v41 = vpop.f32.mrf.mxu0 }
 0x56f   : > { %6077 = vrot.lane.b32.xlu2 %v9383_v53, %s10018_s24  ;;  %v4225_v47 = vpop.f32.mrf.mxu1  ;;  %v5103_v61 = vpop.permute.xlu2 %5102 }
 0x570   : > { %6079 = vrot.lane.b32.xlu0 %v9389_v6, %s10018_s24  ;;  %v9460_v3 = vadd.f32 %v4225_v47, %v4127_v62  ;;  %v5108_v28 = vsel %vm10031_vm11, %v5101_v49, %v5103_v61  ;;  %v5307_v37 = vpop.permute.xlu0 %5306  ;;  %vm10049_vm11 = vmmov %vm10042_vm5 }
 0x571   : > { %6182 = vrot.lane.b32.xlu1 %v9354_v9, %s10023_s28  ;;  %v5125_v20 = vsel %vm484_vm3, %v5108_v28, 0  ;;  %v5208_v38 = vpop.permute.xlu1 %5207 }
 0x572   : > { %7116 = vmatmul.msk.bf16.vlgmr.msra.gmra.mxu2 %vm2368_vm13, %v7112_v25  ;;  %v4115_v31 = vpop.f32.mrf.mxu3  ;;  %7120 = vmatmul.msk.bf16.vlgmr.msrb.gmra.mxu1 %vm2368_vm13, %v9454_v36 }
 0x573   : > { %5040 = vmatpush.bf16.msra.mxu2 %v5009_v35  ;;  %5079 = vmatpush.bf16.msrb.mxu1 %v5018_v0 }
 0x575   : > { %v4186_v57 = vpop.f32.mrf.mxu2 }
 0x576   : > { %v4230_v8 = vadd.f32 %v4186_v57, %v9394_v17  ;;  %v4212_v58 = vpop.f32.mrf.mxu0  ;;  %v5015_v17 = vsel %vm484_vm3, %v5000_v4, 0 }
 0x577   : > { %v4232_v60 = vadd.f32 %v4212_v58, %v4114_v29  ;;  %6083 = vrot.lane.b32.xlu2 %v9404_v34, %s10018_s24  ;;  %7117 = vmatmul.msk.bf16.vlgmr.msra.gmra.mxu3 %vm2368_vm13, %v7112_v25  ;;  %v4227_v14 = vpop.f32.mrf.mxu1  ;;  %v5204_v22 = vpop.permute.xlu2 %5203 }
 0x578   : > { %5053 = vmatpush.bf16.msra.mxu3 %v5012_v40  ;;  %6180 = vrot.lane.b32.xlu0 %v9368_v55, %s10023_s28  ;;  %v5213_v21 = vsel %vm10032_vm14, %v5204_v22, %v5206_v30  ;;  %v5212_v0 = vsel %vm10035_vm2, %v5202_v43, %v5204_v22  ;;  %v7130_v14 = vld [vmem:[%s9941_s2 + $0x2c] sm:$0xf]  ;;  %v5313_v49 = vpop.permute.xlu0 %5312  ;;  %vm10050_vm14 = vmmov %vm10042_vm5 }
 0x579   : > { %7119 = vmatmul.msk.bf16.vlgmr.msrb.gmra.mxu0 %vm2368_vm13, %v9454_v36  ;;  %6188 = vrot.lane.b32.xlu1 %v9371_v27, %s10023_s28  ;;  %v5226_v24 = vsel %vm484_vm3, %v5213_v21, 0  ;;  %v5309_v46 = vpop.permute.xlu1 %5308 }
 0x57a   : > { %5066 = vmatpush.bf16.msrb.mxu0 %v5015_v17  ;;  %v4199_v26 = vpop.f32.mrf.mxu3 }
 0x57b   : > { %v4231_v32 = vadd.f32 %v4199_v26, %v4101_v2 }
 0x57d   : > { %v4188_v33 = vpop.f32.mrf.mxu2 }
 0x57e   : > { %v4214_v11 = vpop.f32.mrf.mxu0 }
 0x57f   : > { %6184 = vrot.lane.b32.xlu2 %v9383_v53, %s10023_s28  ;;  %v4316_v18 = vpop.f32.mrf.mxu1  ;;  %v5210_v47 = vpop.permute.xlu2 %5209 }
 0x580   : > { %6186 = vrot.lane.b32.xlu0 %v9389_v6, %s10023_s28  ;;  %v9495_v42 = vadd.f32 %v4316_v18, %v4232_v60  ;;  %v5214_v60 = vsel %vm10036_vm0, %v5206_v30, %v5208_v38 }
 0x581   : > { %6289 = vrot.lane.b32.xlu1 %v9354_v9, %s10028_s7  ;;  %v5229_v33 = vsel %vm484_vm3, %v5214_v60, 0  ;;  %v5315_v61 = vpop.permute.xlu1 %5314 }
 0x582   : > { %7121 = vmatmul.msk.bf16.vlgmr.msrb.gmra.mxu2 %vm2368_vm13, %v9454_v36  ;;  %v4201_v15 = vpop.f32.mrf.mxu3  ;;  %7125 = vmatmul.msk.bf16.vlgmr.msra.gmra.mxu1 %vm2368_vm13, %v9488_v54 }
 0x583   : > { %5134 = vmatpush.bf16.msrb.mxu2 %v5113_v10  ;;  %5173 = vmatpush.bf16.msra.mxu1 %v5122_v1  ;;  %v5318_v1 = vsel %vm10040_vm1, %v5307_v37, %v5309_v46 }
 0x585   : > { %v4277_v25 = vpop.f32.mrf.mxu2 }
 0x586   : > { %v4333_v59 = vadd.f32 %v4277_v25, %v9428_v51  ;;  %v4303_v45 = vpop.f32.mrf.mxu0  ;;  %v5119_v51 = vsel %vm484_vm3, %v5106_v19, 0  ;;  %v5327_v19 = vsel %vm484_vm3, %v5318_v1, 0 }
 0x587   : > { %v4335_v50 = vadd.f32 %v4303_v45, %v4231_v32  ;;  %6190 = vrot.lane.b32.xlu2 %v9404_v34, %s10023_s28  ;;  %7122 = vmatmul.msk.bf16.vlgmr.msrb.gmra.mxu3 %vm2368_vm13, %v9454_v36  ;;  %v4318_v2 = vpop.f32.mrf.mxu1  ;;  %v5311_v56 = vpop.permute.xlu2 %5310 }
 0x588   : > { %5147 = vmatpush.bf16.msrb.mxu3 %v5116_v13  ;;  %6287 = vrot.lane.b32.xlu0 %v9368_v55, %s10028_s7  ;;  %v5319_v26 = vsel %vm10037_vm10, %v5309_v46, %v5311_v56 }
 0x589   : > { %7123 = vmatmul.msk.bf16.vlgmr.msra.gmra.mxu0 %vm2368_vm13, %v9454_v36  ;;  %6295 = vrot.lane.b32.xlu1 %v9371_v27, %s10028_s7  ;;  %v5211_v36 = vsel %vm10034_vm15, %v5200_v48, %v5202_v43  ;;  %v5330_v11 = vsel %vm484_vm3, %v5319_v26, 0  ;;  %v5416_v2 = vpop.permute.xlu1 %5415  ;;  %vm10051_vm15 = vcmask 56320  }
 0x58a   : > { %5160 = vmatpush.bf16.msra.mxu0 %v5119_v51  ;;  %v4290_v39 = vpop.f32.mrf.mxu3  ;;  %v5220_v57 = vsel %vm484_vm3, %v5211_v36, 0  ;;  %vm10052_vm2 = vmmov %vm10051_vm15 }
 0x58b   : > { %v4334_v23 = vadd.f32 %v4290_v39, %v4230_v8  ;;  %vm10053_vm0 = vmmov %vm10052_vm2 }
 0x58c   : > { %vm10054_vm10 = vmmov %vm10053_vm0 }
 0x58d   : > { %v4279_v62 = vpop.f32.mrf.mxu2  ;;  %vm10056_vm1 = vmmov %vm10053_vm0 }
 0x58e   : > { %v4305_v52 = vpop.f32.mrf.mxu0 }
 0x58f   : > { %6291 = vrot.lane.b32.xlu2 %v9383_v53, %s10028_s7  ;;  %v4407_v29 = vpop.f32.mrf.mxu1 }
 0x590   : > { %6293 = vrot.lane.b32.xlu0 %v9389_v6, %s10028_s7  ;;  %v9526_v12 = vadd.f32 %v4407_v29, %v4335_v50  ;;  %v5320_v50 = vsel %vm10041_vm4, %v5311_v56, %v5313_v49 }
 0x591   : > { %6396 = vrot.lane.b32.xlu1 %v9354_v9, %s10033_s8  ;;  %v5333_v62 = vsel %vm484_vm3, %v5320_v50, 0 }
 0x592   : > { %7126 = vmatmul.msk.bf16.vlgmr.msra.gmra.mxu2 %vm2368_vm13, %v9488_v54  ;;  %v4292_v41 = vpop.f32.mrf.mxu3  ;;  %7129 = vmatmul.msk.bf16.vlgmr.msrb.gmra.mxu1 %vm2368_vm13, %v9488_v54 }
 0x593   : > { %5186 = vmatpush.bf16.msra.mxu2 %v5125_v20  ;;  %5267 = vmatpush.bf16.msrb.mxu1 %v5226_v24  ;;  %v5321_v20 = vsel %vm10044_vm6, %v5313_v49, %v5315_v61  ;;  %vm10059_vm6 = vcmask 457728  }
 0x595   : > { %v4329_v16 = vpop.f32.mrf.mxu2 }
 0x596   : > { %v4337_v35 = vadd.f32 %v4329_v16, %v9460_v3  ;;  %v4394_v31 = vpop.f32.mrf.mxu0  ;;  %v5223_v3 = vsel %vm484_vm3, %v5212_v0, 0  ;;  %v5422_v0 = vpop.permute.xlu1 %5421 }
 0x597   : > { %v4438_v5 = vadd.f32 %v4394_v31, %v4334_v23  ;;  %6297 = vrot.lane.b32.xlu2 %v9404_v34, %s10028_s7  ;;  %7127 = vmatmul.msk.bf16.vlgmr.msra.gmra.mxu3 %vm2368_vm13, %v9488_v54  ;;  %v4409_v8 = vpop.f32.mrf.mxu1  ;;  %v7136_v23 = vld [vmem:[%s9941_s2 + $0x30] sm:$0xf] }
 0x598   : > { %5241 = vmatpush.bf16.msra.mxu3 %v5220_v57  ;;  %6394 = vrot.lane.b32.xlu0 %v9368_v55, %s10033_s8 }
 0x599   : > { %7128 = vmatmul.msk.bf16.vlgmr.msrb.gmra.mxu0 %vm2368_vm13, %v9488_v54  ;;  %6402 = vrot.lane.b32.xlu1 %v9371_v27, %s10033_s8  ;;  %v5215_v54 = vsel %vm10039_vm12, %v5208_v38, %v5210_v47  ;;  %v5336_v47 = vsel %vm484_vm3, %v5321_v20, 0  ;;  %vm10055_vm12 = vcmask 48128  }
 0x59a   : > { %5254 = vmatpush.bf16.msrb.mxu0 %v5223_v3  ;;  %v4381_v4 = vpop.f32.mrf.mxu3  ;;  %v5232_v15 = vsel %vm484_vm3, %v5215_v54, 0  ;;  %vm10057_vm4 = vmmov %vm10055_vm12 }
 0x59b   : > { %v4437_v58 = vadd.f32 %v4381_v4, %v4333_v59  ;;  %v5317_v59 = vpop.permute.xlu2 %5316 }
 0x59c   : > { %v5322_v41 = vsel %vm10045_vm7, %v5315_v61, %v5317_v59  ;;  %vm10060_vm7 = vmmov %vm10057_vm4 }
 0x59d   : > { %v4331_v40 = vpop.f32.mrf.mxu2  ;;  %v5339_v37 = vsel %vm484_vm3, %v5322_v41, 0 }
 0x59e   : > { %v4396_v17 = vpop.f32.mrf.mxu0  ;;  %v9615_v40 = vld [vmem:[%s9941_s2 + $0x34] sm:$0xf] }
 0x59f   : > { %6398 = vrot.lane.b32.xlu2 %v9383_v53, %s10033_s8  ;;  %v4498_v32 = vpop.f32.mrf.mxu1  ;;  %v5523_v17 = vpop.permute.xlu1 %5522 }
 0x5a0   : > { %6400 = vrot.lane.b32.xlu0 %v9389_v6, %s10033_s8  ;;  %v9559_v44 = vadd.f32 %v4498_v32, %v4438_v5 }
 0x5a1   : > { %6503 = vrot.lane.b32.xlu1 %v9354_v9, %s10038_s13 }
 0x5a2   : > { %7131 = vmatmul.msk.bf16.vlgmr.msrb.gmra.mxu2 %vm2368_vm13, %v7130_v14  ;;  %v4383_v63 = vpop.f32.mrf.mxu3  ;;  %7134 = vmatmul.msk.bf16.vlgmr.msra.gmra.mxu1 %vm2368_vm13, %v7130_v14 }
 0x5a3   : > { %5280 = vmatpush.bf16.msrb.mxu2 %v5229_v33  ;;  %5361 = vmatpush.bf16.msra.mxu1 %v5330_v11  ;;  %v5418_v28 = vpop.permute.xlu2 %5417 }
 0x5a4   : > { %v5426_v8 = vsel %vm10046_vm8, %v5416_v2, %v5418_v28  ;;  %vm10061_vm8 = vmmov %vm10057_vm4 }
 0x5a5   : > { %v4420_v18 = vpop.f32.mrf.mxu2  ;;  %v5437_v60 = vsel %vm484_vm3, %v5426_v8, 0 }
 0x5a6   : > { %v4440_v10 = vadd.f32 %v4420_v18, %v9495_v42  ;;  %v4485_v48 = vpop.f32.mrf.mxu0  ;;  %v5414_v42 = vpop.permute.xlu0 %5413 }
 0x5a7   : > { %v4541_v25 = vadd.f32 %v4485_v48, %v4437_v58  ;;  %6404 = vrot.lane.b32.xlu2 %v9404_v34, %s10033_s8  ;;  %7132 = vmatmul.msk.bf16.vlgmr.msrb.gmra.mxu3 %vm2368_vm13, %v7130_v14  ;;  %v4500_v7 = vpop.f32.mrf.mxu1  ;;  %v5425_v22 = vsel %vm10042_vm5, %v5414_v42, %v5416_v2  ;;  %v7148_v42 = vld [vmem:[%s9941_s2 + $0x38] sm:$0xf]  ;;  %vm10058_vm5 = vmmov %vm10057_vm4 }
 0x5a8   : > { %5293 = vmatpush.bf16.msrb.mxu3 %v5232_v15  ;;  %6501 = vrot.lane.b32.xlu0 %v9368_v55, %s10038_s13  ;;  %v5434_v52 = vsel %vm484_vm3, %v5425_v22, 0 }
 0x5a9   : > { %7133 = vmatmul.msk.bf16.vlgmr.msra.gmra.mxu0 %vm2368_vm13, %v7130_v14  ;;  %6509 = vrot.lane.b32.xlu1 %v9371_v27, %s10038_s13 }
 0x5aa   : > { %5348 = vmatpush.bf16.msra.mxu0 %v5327_v19  ;;  %v4433_v43 = vpop.f32.mrf.mxu3 }
 0x5ab   : > { %v4441_v45 = vadd.f32 %v4433_v43, %v4337_v35  ;;  %v5424_v5 = vpop.permute.xlu2 %5423 }
 0x5ac   : > { %v5429_v4 = vsel %vm10047_vm9, %v5422_v0, %v5424_v5  ;;  %vm10062_vm9 = vmmov %vm10059_vm6 }
 0x5ad   : > { %v4422_v13 = vpop.f32.mrf.mxu2  ;;  %v5446_v56 = vsel %vm484_vm3, %v5429_v4, 0 }
 0x5ae   : > { %v4487_v51 = vpop.f32.mrf.mxu0  ;;  %v5420_v38 = vpop.permute.xlu0 %5419 }
 0x5af   : > { %6505 = vrot.lane.b32.xlu2 %v9383_v53, %s10038_s13  ;;  %v4589_v39 = vpop.f32.mrf.mxu1  ;;  %v5427_v33 = vsel %vm10049_vm11, %v5418_v28, %v5420_v38  ;;  %v5428_v63 = vsel %vm10050_vm14, %v5420_v38, %v5422_v0  ;;  %vm10063_vm11 = vmmov %vm10059_vm6 }
 0x5b0   : > { %6507 = vrot.lane.b32.xlu0 %v9389_v6, %s10038_s13  ;;  %v9589_v30 = vadd.f32 %v4589_v39, %v4541_v25  ;;  %v5440_v54 = vsel %vm484_vm3, %v5427_v33, 0  ;;  %v5529_v25 = vpop.permute.xlu1 %5528  ;;  %vm10064_vm14 = vmmov %vm10059_vm6 }
 0x5b1   : > { %6610 = vrot.lane.b32.xlu1 %v9354_v9, %s10043_s20 }
 0x5b2   : > { %7135 = vmatmul.msk.bf16.vlgmr.msra.gmra.mxu2 %vm2368_vm13, %v7130_v14  ;;  %v4435_v21 = vpop.f32.mrf.mxu3  ;;  %7139 = vmatmul.msk.bf16.vlgmr.msrb.gmra.mxu1 %vm2368_vm13, %v7136_v23 }
 0x5b3   : > { %5374 = vmatpush.bf16.msra.mxu2 %v5333_v62  ;;  %5455 = vmatpush.bf16.msrb.mxu1 %v5434_v52  ;;  %v5525_v11 = vpop.permute.xlu2 %5524 }
 0x5b4   : > { %v5533_v51 = vsel %vm2368_vm13, %v5523_v17, %v5525_v11 }
 0x5b5   : > { %v4511_v29 = vpop.f32.mrf.mxu2  ;;  %v5544_v28 = vsel %vm484_vm3, %v5533_v51, 0 }
 0x5b6   : > { %v4543_v24 = vadd.f32 %v4511_v29, %v9526_v12  ;;  %v4537_v16 = vpop.f32.mrf.mxu0  ;;  %v5521_v3 = vpop.permute.xlu0 %5520 }
 0x5b7   : > { %v4545_v36 = vadd.f32 %v4537_v16, %v4441_v45  ;;  %6511 = vrot.lane.b32.xlu2 %v9404_v34, %s10038_s13  ;;  %7137 = vmatmul.msk.bf16.vlgmr.msra.gmra.mxu3 %vm2368_vm13, %v7136_v23  ;;  %v4591_v35 = vpop.f32.mrf.mxu1  ;;  %v5532_v7 = vsel %vm2368_vm13, %v5521_v3, %v5523_v17 }
 0x5b8   : > { %5387 = vmatpush.bf16.msra.mxu3 %v5336_v47  ;;  %6608 = vrot.lane.b32.xlu0 %v9368_v55, %s10043_s20 }
 0x5b9   : > { %7138 = vmatmul.msk.bf16.vlgmr.msrb.gmra.mxu0 %vm2368_vm13, %v7136_v23  ;;  %6616 = vrot.lane.b32.xlu1 %v9371_v27, %s10043_s20 }
 0x5ba   : > { %5400 = vmatpush.bf16.msrb.mxu0 %v5339_v37  ;;  %v4524_v12 = vpop.f32.mrf.mxu3 }
 0x5bb   : > { %v4544_v31 = vadd.f32 %v4524_v12, %v4440_v10  ;;  %v5531_v43 = vpop.permute.xlu2 %5530 }
 0x5bc   : > { %v5536_v16 = vsel %vm2368_vm13, %v5529_v25, %v5531_v43 }
 0x5bd   : > { %v4513_v57 = vpop.f32.mrf.mxu2  ;;  %v5553_v35 = vsel %vm484_vm3, %v5536_v16, 0 }
 0x5be   : > { %v4539_v46 = vpop.f32.mrf.mxu0  ;;  %v5527_v10 = vpop.permute.xlu0 %5526 }
 0x5bf   : > { %6612 = vrot.lane.b32.xlu2 %v9383_v53, %s10043_s20  ;;  %v4641_v58 = vpop.f32.mrf.mxu1  ;;  %v5535_v19 = vsel %vm2368_vm13, %v5527_v10, %v5529_v25  ;;  %v5534_v39 = vsel %vm2368_vm13, %v5525_v11, %v5527_v10  ;;  %v7154_v11 = vld [vmem:[%s9941_s2 + $0x3c] sm:$0xf] }
 0x5c0   : > { %6614 = vrot.lane.b32.xlu0 %v9389_v6, %s10043_s20  ;;  %v9621_v14 = vadd.f32 %v4641_v58, %v4545_v36  ;;  %v5550_v13 = vsel %vm484_vm3, %v5535_v19, 0 }
 0x5c1   : > { %6717 = vrot.lane.b32.xlu1 %v9354_v9, %s10048_s15 }
 0x5c2   : > { %7140 = vmatmul.msk.bf16.vlgmr.msrb.gmra.mxu2 %vm2368_vm13, %v7136_v23  ;;  %v4526_v26 = vpop.f32.mrf.mxu3  ;;  %7144 = vmatmul.msk.bf16.vlgmr.msra.gmra.mxu1 %vm2368_vm13, %v9615_v40 }
 0x5c3   : > { %5468 = vmatpush.bf16.msrb.mxu2 %v5437_v60  ;;  %5507 = vmatpush.bf16.msra.mxu1 %v5446_v56  ;;  %v5632_v29 = vpop.permute.xlu2 %5631 }
 0x5c5   : > { %v4602_v32 = vpop.f32.mrf.mxu2 }
 0x5c6   : > { %v4646_v49 = vadd.f32 %v4602_v32, %v9559_v44  ;;  %v4628_v18 = vpop.f32.mrf.mxu0  ;;  %v5443_v44 = vsel %vm484_vm3, %v5428_v63, 0 }
 0x5c7   : > { %v4648_v9 = vadd.f32 %v4628_v18, %v4544_v31  ;;  %6618 = vrot.lane.b32.xlu2 %v9404_v34, %s10043_s20  ;;  %7141 = vmatmul.msk.bf16.vlgmr.msrb.gmra.mxu3 %vm2368_vm13, %v7136_v23  ;;  %v4643_v61 = vpop.f32.mrf.mxu1  ;;  %v5630_v23 = vpop.permute.xlu1 %5629 }
 0x5c8   : > { %5481 = vmatpush.bf16.msrb.mxu3 %v5440_v54  ;;  %6715 = vrot.lane.b32.xlu0 %v9368_v55, %s10048_s15  ;;  %v5640_v46 = vsel %vm10053_vm0, %v5630_v23, %v5632_v29 }
 0x5c9   : > { %7143 = vmatmul.msk.bf16.vlgmr.msra.gmra.mxu0 %vm2368_vm13, %v9615_v40  ;;  %6723 = vrot.lane.b32.xlu1 %v9371_v27, %s10048_s15  ;;  %v5541_v27 = vsel %vm484_vm3, %v5532_v7, 0  ;;  %v5651_v17 = vsel %vm484_vm3, %v5640_v46, 0 }
 0x5ca   : > { %5494 = vmatpush.bf16.msra.mxu0 %v5443_v44  ;;  %v4615_v1 = vpop.f32.mrf.mxu3 }
 0x5cb   : > { %v4647_v48 = vadd.f32 %v4615_v1, %v4543_v24  ;;  %v5638_v5 = vpop.permute.xlu2 %5637 }
 0x5cd   : > { %v4604_v15 = vpop.f32.mrf.mxu2 }
 0x5ce   : > { %v4630_v59 = vpop.f32.mrf.mxu0 }
 0x5cf   : > { %6719 = vrot.lane.b32.xlu2 %v9383_v53, %s10048_s15  ;;  %v4732_v55 = vpop.f32.mrf.mxu1  ;;  %v5628_v53 = vpop.permute.xlu0 %5627 }
 0x5d0   : > { %6721 = vrot.lane.b32.xlu0 %v9389_v6, %s10048_s15  ;;  %v9654_v45 = vadd.f32 %v4732_v55, %v4648_v9  ;;  %v6820_v6 = vld [vmem:[%s9943_s4] sm:$0xff]  ;;  %v5636_v0 = vpop.permute.xlu1 %5635  ;;  %v5639_v8 = vsel %vm10052_vm2, %v5628_v53, %v5630_v23  ;;  %vm10066_vm2 = vcmask 449536  }
 0x5d1   : > { %v5643_v25 = vsel %vm10056_vm1, %v5636_v0, %v5638_v5  ;;  %vm10067_vm0 = vmmov %vm10066_vm2 }
 0x5d2   : > { %7145 = vmatmul.msk.bf16.vlgmr.msra.gmra.mxu2 %vm2368_vm13, %v9615_v40  ;;  %v4617_v50 = vpop.f32.mrf.mxu3  ;;  %7149 = vmatmul.msk.bf16.vlgmr.msrb.gmra.mxu1 %vm2368_vm13, %v7148_v42  ;;  %vm10070_vm1 = vmmov %vm10067_vm0 }
 0x5d3   : > { %5562 = vmatpush.bf16.msra.mxu2 %v5541_v27  ;;  %5601 = vmatpush.bf16.msrb.mxu1 %v5550_v13  ;;  %v5739_v63 = vpop.permute.xlu2 %5738 }
 0x5d5   : > { %v4693_v2 = vpop.f32.mrf.mxu2 }
 0x5d6   : > { %v4749_v22 = vadd.f32 %v4693_v2, %v9589_v30  ;;  %v4719_v62 = vpop.f32.mrf.mxu0  ;;  %v5547_v30 = vsel %vm484_vm3, %v5534_v39, 0 }
 0x5d7   : > { %v4751_v52 = vadd.f32 %v4719_v62, %v4647_v48  ;;  %6725 = vrot.lane.b32.xlu2 %v9404_v34, %s10048_s15  ;;  %7146 = vmatmul.msk.bf16.vlgmr.msra.gmra.mxu3 %vm2368_vm13, %v9615_v40  ;;  %v4734_v21 = vpop.f32.mrf.mxu1  ;;  %v5634_v41 = vpop.permute.xlu0 %5633 }
 0x5d8   : > { %5575 = vmatpush.bf16.msra.mxu3 %v5544_v28  ;;  %6823 = vperm.xlu0 %7266, %v6820_v6   ;;  %v5641_v47 = vsel %vm10051_vm15, %v5632_v29, %v5634_v41  ;;  %v5737_v26 = vpop.permute.xlu1 %5736  ;;  %v7160_v28 = vld [vmem:[%s9941_s2 + $0x40] sm:$0xf]  ;;  %vm10065_vm15 = vmmov %vm10059_vm6 }
 0x5d9   : > { %7147 = vmatmul.msk.bf16.vlgmr.msrb.gmra.mxu0 %vm2368_vm13, %v9615_v40  ;;  %v5654_v12 = vsel %vm484_vm3, %v5641_v47, 0  ;;  %v5648_v40 = vsel %vm484_vm3, %v5639_v8, 0  ;;  %v5747_v54 = vsel %vm10055_vm12, %v5737_v26, %v5739_v63  ;;  %vm10069_vm12 = vmmov %vm10067_vm0 }
 0x5da   : > { %5588 = vmatpush.bf16.msrb.mxu0 %v5547_v30  ;;  %v4706_v20 = vpop.f32.mrf.mxu3  ;;  %v5758_v1 = vsel %vm484_vm3, %v5747_v54, 0 }
 0x5db   : > { %v4750_v38 = vadd.f32 %v4706_v20, %v4646_v49  ;;  %v5642_v49 = vsel %vm10054_vm10, %v5634_v41, %v5636_v0  ;;  %v5745_v13 = vpop.permute.xlu2 %5744  ;;  %vm10068_vm10 = vmmov %vm10067_vm0 }
 0x5dc   : > { %v5657_v61 = vsel %vm484_vm3, %v5642_v49, 0 }
 0x5dd   : > { %v4695_v24 = vpop.f32.mrf.mxu2 }
 0x5de   : > { %v4721_v34 = vpop.f32.mrf.mxu0 }
 0x5df   : > { %v4823_v36 = vpop.f32.mrf.mxu1  ;;  %v5735_v4 = vpop.permute.xlu0 %5734 }
 0x5e0   : > { %v9676_v37 = vadd.f32 %v4823_v36, %v4751_v52  ;;  %v5743_v7 = vpop.permute.xlu1 %5742  ;;  %v5746_v19 = vsel %vm10057_vm4, %v5735_v4, %v5737_v26  ;;  %vm10071_vm4 = vcmask 441344  }
 0x5e1   : > { %v5755_v53 = vsel %vm484_vm3, %v5746_v19, 0  ;;  %v5750_v34 = vsel %vm10061_vm8, %v5743_v7, %v5745_v13  ;;  %vm10075_vm8 = vcmask 375808  }
 0x5e2   : > { %7150 = vmatmul.msk.bf16.vlgmr.msrb.gmra.mxu2 %vm2368_vm13, %v7148_v42  ;;  %v4708_v31 = vpop.f32.mrf.mxu3  ;;  %7153 = vmatmul.msk.bf16.vlgmr.msra.gmra.mxu1 %vm2368_vm13, %v7148_v42 }
 0x5e3   : > { %5614 = vmatpush.bf16.msrb.mxu2 %v5553_v35  ;;  %5695 = vmatpush.bf16.msra.mxu1 %v5654_v12  ;;  %v5864_v30 = vpop.permute.xlu2 %5863  ;;  %v5767_v31 = vsel %vm484_vm3, %v5750_v34, 0 }
 0x5e5   : > { %v4745_v57 = vpop.f32.mrf.mxu2 }
 0x5e6   : > { %v4753_v3 = vadd.f32 %v4745_v57, %v9621_v14  ;;  %v4810_v58 = vpop.f32.mrf.mxu0 }
 0x5e7   : > { %v4854_v60 = vadd.f32 %v4810_v58, %v4750_v38  ;;  %7151 = vmatmul.msk.bf16.vlgmr.msrb.gmra.mxu3 %vm2368_vm13, %v7148_v42  ;;  %v4825_v56 = vpop.f32.mrf.mxu1  ;;  %v5741_v10 = vpop.permute.xlu0 %5740 }
 0x5e8   : > { %5669 = vmatpush.bf16.msrb.mxu3 %v5648_v40  ;;  %v5862_v6 = vpop.permute.xlu1 %5861  ;;  %v5749_v24 = vsel %vm10060_vm7, %v5741_v10, %v5743_v7  ;;  %vm10074_vm7 = vmmov %vm10071_vm4 }
 0x5e9   : > { %7152 = vmatmul.msk.bf16.vlgmr.msra.gmra.mxu0 %vm2368_vm13, %v7148_v42  ;;  %v5660_v42 = vsel %vm484_vm3, %v5643_v25, 0  ;;  %v5764_v36 = vsel %vm484_vm3, %v5749_v24, 0 }
 0x5ea   : > { %5682 = vmatpush.bf16.msra.mxu0 %v5651_v17  ;;  %v4797_v32 = vpop.f32.mrf.mxu3 }
 0x5eb   : > { %v4853_v33 = vadd.f32 %v4797_v32, %v4749_v22  ;;  %v5748_v22 = vsel %vm10058_vm5, %v5739_v63, %v5741_v10  ;;  %vm10072_vm5 = vmmov %vm10071_vm4 }
 0x5ec   : > { %v5761_v52 = vsel %vm484_vm3, %v5748_v22, 0 }
 0x5ed   : > { %v4747_v14 = vpop.f32.mrf.mxu2 }
 0x5ee   : > { %v4812_v18 = vpop.f32.mrf.mxu0 }
 0x5ef   : > { %v4935_v9 = vpop.f32.mrf.mxu1  ;;  %v5860_v50 = vpop.permute.xlu0 %5859 }
 0x5f0   : > { %v9694_v44 = vadd.f32 %v4935_v9, %v4854_v60  ;;  %v5871_v23 = vsel %vm10059_vm6, %v5860_v50, %v5862_v6  ;;  %v5868_v12 = vpop.permute.xlu1 %5867  ;;  %v7166_v60 = vld [vmem:[%s9941_s2 + $0x44] sm:$0xf]  ;;  %vm10073_vm6 = vmmov %vm10071_vm4 }
 0x5f1   : > { %v5880_v29 = vsel %vm484_vm3, %v5871_v23, 0 }
 0x5f2   : > { %7155 = vmatmul.msk.bf16.vlgmr.msra.gmra.mxu2 %vm2368_vm13, %v7154_v11  ;;  %v4799_v48 = vpop.f32.mrf.mxu3  ;;  %7158 = vmatmul.msk.bf16.vlgmr.msrb.gmra.mxu1 %vm2368_vm13, %v7154_v11 }
 0x5f3   : > { %5708 = vmatpush.bf16.msra.mxu2 %v5657_v61  ;;  %5789 = vmatpush.bf16.msrb.mxu1 %v5758_v1 }
 0x5f5   : > { %v4836_v15 = vpop.f32.mrf.mxu2 }
 0x5f6   : > { %v4856_v59 = vadd.f32 %v4836_v15, %v9654_v45  ;;  %v4922_v55 = vpop.f32.mrf.mxu0 }
 0x5f7   : > { %v4978_v43 = vadd.f32 %v4922_v55, %v4853_v33  ;;  %7156 = vmatmul.msk.bf16.vlgmr.msra.gmra.mxu3 %vm2368_vm13, %v7154_v11  ;;  %v4937_v27 = vpop.f32.mrf.mxu1  ;;  %v5866_v41 = vpop.permute.xlu0 %5865 }
 0x5f8   : > { %5721 = vmatpush.bf16.msra.mxu3 %v5660_v42  ;;  %v5969_v32 = vpop.permute.xlu1 %5968  ;;  %v5873_v49 = vsel %vm10064_vm14, %v5864_v30, %v5866_v41  ;;  %v5874_v18 = vsel %vm10065_vm15, %v5866_v41, %v5868_v12  ;;  %vm10078_vm14 = vmmov %vm10075_vm8  ;;  %vm10079_vm15 = vcmask 367616  }
 0x5f9   : > { %7157 = vmatmul.msk.bf16.vlgmr.msrb.gmra.mxu0 %vm2368_vm13, %v7154_v11  ;;  %v5886_v9 = vsel %vm484_vm3, %v5873_v49, 0  ;;  %v5889_v48 = vsel %vm484_vm3, %v5874_v18, 0 }
 0x5fa   : > { %5776 = vmatpush.bf16.msrb.mxu0 %v5755_v53  ;;  %v4849_v2 = vpop.f32.mrf.mxu3 }
 0x5fb   : > { %v4857_v51 = vadd.f32 %v4849_v2, %v4753_v3  ;;  %v5872_v3 = vsel %vm10062_vm9, %v5862_v6, %v5864_v30  ;;  %vm10076_vm9 = vmmov %vm10071_vm4 }
 0x5fc   : > { %v5883_v56 = vsel %vm484_vm3, %v5872_v3, 0 }
 0x5fd   : > { %v4838_v45 = vpop.f32.mrf.mxu2 }
 0x5fe   : > { %v4924_v39 = vpop.f32.mrf.mxu0 }
 0x5ff   : > { %v5029_v62 = vpop.f32.mrf.mxu1  ;;  %v5967_v46 = vpop.permute.xlu0 %5966 }
 0x600   : > { %v9712_v21 = vadd.f32 %v5029_v62, %v4978_v43  ;;  %v5975_v7 = vpop.permute.xlu1 %5974  ;;  %v7172_v43 = vld [vmem:[%s9941_s2 + $0x48] sm:$0xf] }
 0x602   : > { %7159 = vmatmul.msk.bf16.vlgmr.msrb.gmra.mxu2 %vm2368_vm13, %v7154_v11  ;;  %v4851_v20 = vpop.f32.mrf.mxu3  ;;  %7163 = vmatmul.msk.bf16.vlgmr.msra.gmra.mxu1 %vm2368_vm13, %v7160_v28 }
 0x603   : > { %5802 = vmatpush.bf16.msrb.mxu2 %v5761_v52  ;;  %5901 = vmatpush.bf16.msra.mxu1 %v5880_v29 }
 0x605   : > { %v4948_v38 = vpop.f32.mrf.mxu2 }
 0x606   : > { %v4980_v16 = vadd.f32 %v4948_v38, %v9676_v37  ;;  %v4974_v47 = vpop.f32.mrf.mxu0  ;;  %v5870_v37 = vpop.permute.xlu2 %5869 }
 0x607   : > { %v4982_v35 = vadd.f32 %v4974_v47, %v4857_v51  ;;  %7161 = vmatmul.msk.bf16.vlgmr.msrb.gmra.mxu3 %vm2368_vm13, %v7160_v28  ;;  %v5031_v0 = vpop.f32.mrf.mxu1  ;;  %v5875_v58 = vsel %vm10063_vm11, %v5868_v12, %v5870_v37  ;;  %v5973_v1 = vpop.permute.xlu0 %5972  ;;  %vm10077_vm11 = vmmov %vm10075_vm8 }
 0x608   : > { %5815 = vmatpush.bf16.msrb.mxu3 %v5764_v36  ;;  %v5892_v26 = vsel %vm484_vm3, %v5875_v58, 0  ;;  %v5981_v55 = vsel %vm10067_vm0, %v5973_v1, %v5975_v7  ;;  %v6076_v23 = vpop.permute.xlu1 %6075 }
 0x609   : > { %7162 = vmatmul.msk.bf16.vlgmr.msra.gmra.mxu0 %vm2368_vm13, %v7160_v28  ;;  %v5996_v50 = vsel %vm484_vm3, %v5981_v55, 0 }
 0x60a   : > { %5828 = vmatpush.bf16.msra.mxu0 %v5767_v31  ;;  %v4961_v57 = vpop.f32.mrf.mxu3 }
 0x60b   : > { %v4981_v5 = vadd.f32 %v4961_v57, %v4856_v59  ;;  %v5978_v59 = vsel %vm10066_vm2, %v5967_v46, %v5969_v32  ;;  %vm10080_vm2 = vmmov %vm10075_vm8 }
 0x60c   : > { %v5987_v13 = vsel %vm484_vm3, %v5978_v59, 0  ;;  %vm10081_vm0 = vmmov %vm10080_vm2 }
 0x60d   : > { %v4950_v8 = vpop.f32.mrf.mxu2 }
 0x60e   : > { %v4976_v4 = vpop.f32.mrf.mxu0  ;;  %v5971_v63 = vpop.permute.xlu2 %5970 }
 0x60f   : > { %v5081_v40 = vpop.f32.mrf.mxu1  ;;  %v6074_v2 = vpop.permute.xlu0 %6073  ;;  %v5979_v22 = vsel %vm10068_vm10, %v5969_v32, %v5971_v63  ;;  %v5980_v39 = vsel %vm10069_vm12, %v5971_v63, %v5973_v1  ;;  %vm10082_vm10 = vmmov %vm10079_vm15 }
 0x610   : > { %v9730_v17 = vadd.f32 %v5081_v40, %v4982_v35  ;;  %v5993_v29 = vsel %vm484_vm3, %v5980_v39, 0  ;;  %v6082_v0 = vpop.permute.xlu1 %6081  ;;  %v6085_v37 = vsel %vm10072_vm5, %v6074_v2, %v6076_v23  ;;  %vm10083_vm12 = vmmov %vm10082_vm10  ;;  %vm10086_vm5 = vcmask 359424  }
 0x611   : > { %v6094_v40 = vsel %vm484_vm3, %v6085_v37, 0 }
 0x612   : > { %7164 = vmatmul.msk.bf16.vlgmr.msra.gmra.mxu2 %vm2368_vm13, %v7160_v28  ;;  %v4963_v33 = vpop.f32.mrf.mxu3  ;;  %7168 = vmatmul.msk.bf16.vlgmr.msrb.gmra.mxu1 %vm2368_vm13, %v7166_v60 }
 0x613   : > { %5914 = vmatpush.bf16.msra.mxu2 %v5883_v56  ;;  %5953 = vmatpush.bf16.msrb.mxu1 %v5892_v26 }
 0x615   : > { %v5042_v14 = vpop.f32.mrf.mxu2 }
 0x616   : > { %v5086_v11 = vadd.f32 %v5042_v14, %v9694_v44  ;;  %v5068_v54 = vpop.f32.mrf.mxu0  ;;  %v5977_v27 = vpop.permute.xlu2 %5976 }
 0x617   : > { %v5088_v61 = vadd.f32 %v5068_v54, %v4981_v5  ;;  %7165 = vmatmul.msk.bf16.vlgmr.msra.gmra.mxu3 %vm2368_vm13, %v7160_v28  ;;  %v5083_v10 = vpop.f32.mrf.mxu1  ;;  %v5990_v28 = vsel %vm484_vm3, %v5979_v22, 0  ;;  %v6080_v41 = vpop.permute.xlu0 %6079 }
 0x618   : > { %5927 = vmatpush.bf16.msra.mxu3 %v5886_v9  ;;  %v6183_v32 = vpop.permute.xlu1 %6182  ;;  %v6088_v49 = vsel %vm10074_vm7, %v6080_v41, %v6082_v0  ;;  %vm10088_vm7 = vmmov %vm10086_vm5 }
 0x619   : > { %7167 = vmatmul.msk.bf16.vlgmr.msrb.gmra.mxu0 %vm2368_vm13, %v7166_v60 }
 0x61a   : > { %5940 = vmatpush.bf16.msrb.mxu0 %v5889_v48  ;;  %v5055_v15 = vpop.f32.mrf.mxu3 }
 0x61b   : > { %v5087_v25 = vadd.f32 %v5055_v15, %v4980_v16  ;;  %v5982_v16 = vsel %vm10070_vm1, %v5975_v7, %v5977_v27  ;;  %vm10084_vm1 = vmmov %vm10082_vm10 }
 0x61c   : > { %v5999_v35 = vsel %vm484_vm3, %v5982_v16, 0 }
 0x61d   : > { %v5044_v44 = vpop.f32.mrf.mxu2 }
 0x61e   : > { %v5070_v19 = vpop.f32.mrf.mxu0  ;;  %v6078_v20 = vpop.permute.xlu2 %6077 }
 0x61f   : > { %v5175_v42 = vpop.f32.mrf.mxu1  ;;  %v6087_v47 = vsel %vm10071_vm4, %v6078_v20, %v6080_v41  ;;  %v6086_v46 = vsel %vm10073_vm6, %v6076_v23, %v6078_v20  ;;  %v6181_v4 = vpop.permute.xlu0 %6180  ;;  %vm10085_vm4 = vmmov %vm10084_vm1 }
 0x620   : > { %v9748_v53 = vadd.f32 %v5175_v42, %v5088_v61  ;;  %v6100_v31 = vsel %vm484_vm3, %v6087_v47, 0  ;;  %v6097_v26 = vsel %vm484_vm3, %v6086_v46, 0  ;;  %v6103_v61 = vsel %vm484_vm3, %v6088_v49, 0  ;;  %v6189_v7 = vpop.permute.xlu1 %6188  ;;  %vm10087_vm6 = vmmov %vm10086_vm5 }
 0x621   : > { %v6192_v19 = vsel %vm10077_vm11, %v6181_v4, %v6183_v32  ;;  %vm10091_vm11 = vcmask 293888  }
 0x622   : > { %7169 = vmatmul.msk.bf16.vlgmr.msrb.gmra.mxu2 %vm2368_vm13, %v7166_v60  ;;  %v5057_v51 = vpop.f32.mrf.mxu3  ;;  %7173 = vmatmul.msk.bf16.vlgmr.msra.gmra.mxu1 %vm2368_vm13, %v7172_v43 }
 0x623   : > { %6008 = vmatpush.bf16.msrb.mxu2 %v5987_v13  ;;  %6047 = vmatpush.bf16.msra.mxu1 %v5996_v50  ;;  %v6201_v50 = vsel %vm484_vm3, %v6192_v19, 0 }
 0x625   : > { %v5136_v45 = vpop.f32.mrf.mxu2 }
 0x626   : > { %v5192_v6 = vadd.f32 %v5136_v45, %v9712_v21  ;;  %v5162_v62 = vpop.f32.mrf.mxu0  ;;  %v6084_v8 = vpop.permute.xlu2 %6083 }
 0x627   : > { %v5194_v52 = vadd.f32 %v5162_v62, %v5087_v25  ;;  %7170 = vmatmul.msk.bf16.vlgmr.msrb.gmra.mxu3 %vm2368_vm13, %v7166_v60  ;;  %v5177_v30 = vpop.f32.mrf.mxu1  ;;  %v6187_v10 = vpop.permute.xlu0 %6186  ;;  %v6089_v44 = vsel %vm10076_vm9, %v6082_v0, %v6084_v8  ;;  %vm10090_vm9 = vmmov %vm10086_vm5 }
 0x628   : > { %6021 = vmatpush.bf16.msrb.mxu3 %v5990_v28  ;;  %v6106_v42 = vsel %vm484_vm3, %v6089_v44, 0  ;;  %v7184_v28 = vld [vmem:[%s9941_s2 + $0x50] sm:$0xf] }
 0x629   : > { %7171 = vmatmul.msk.bf16.vlgmr.msra.gmra.mxu0 %vm2368_vm13, %v7166_v60 }
 0x62a   : > { %6034 = vmatpush.bf16.msra.mxu0 %v5993_v29  ;;  %v5149_v38 = vpop.f32.mrf.mxu3 }
 0x62b   : > { %v5193_v24 = vadd.f32 %v5149_v38, %v5086_v11  ;;  %v7178_v11 = vld [vmem:[%s9941_s2 + $0x4c] sm:$0xf] }
 0x62d   : > { %v5138_v21 = vpop.f32.mrf.mxu2 }
 0x62e   : > { %v5164_v34 = vpop.f32.mrf.mxu0  ;;  %v6185_v63 = vpop.permute.xlu2 %6184  ;;  %v6195_v21 = vsel %vm10080_vm2, %v6187_v10, %v6189_v7  ;;  %vm10094_vm2 = vmmov %vm10091_vm11 }
 0x62f   : > { %v5269_v36 = vpop.f32.mrf.mxu1  ;;  %v6193_v54 = vsel %vm10075_vm8, %v6183_v32, %v6185_v63  ;;  %v6288_v2 = vpop.permute.xlu0 %6287  ;;  %v6194_v22 = vsel %vm10078_vm14, %v6185_v63, %v6187_v10  ;;  %vm10089_vm8 = vmmov %vm10086_vm5 }
 0x630   : > { %v9763_v12 = vadd.f32 %v5269_v36, %v5194_v52  ;;  %v6204_v48 = vsel %vm484_vm3, %v6193_v54, 0  ;;  %v6207_v52 = vsel %vm484_vm3, %v6194_v22, 0  ;;  %v6210_v36 = vsel %vm484_vm3, %v6195_v21, 0  ;;  %vm10092_vm14 = vmmov %vm10091_vm11 }
 0x632   : > { %7174 = vmatmul.msk.bf16.vlgmr.msra.gmra.mxu2 %vm2368_vm13, %v7172_v43  ;;  %v5151_v57 = vpop.f32.mrf.mxu3  ;;  %7177 = vmatmul.msk.bf16.vlgmr.msrb.gmra.mxu1 %vm2368_vm13, %v7172_v43 }
 0x633   : > { %6060 = vmatpush.bf16.msra.mxu2 %v5999_v35  ;;  %6141 = vmatpush.bf16.msrb.mxu1 %v6100_v31 }
 0x635   : > { %v5188_v5 = vpop.f32.mrf.mxu2 }
 0x636   : > { %v5196_v3 = vadd.f32 %v5188_v5, %v9730_v17  ;;  %v5256_v58 = vpop.f32.mrf.mxu0  ;;  %v6191_v13 = vpop.permute.xlu2 %6190 }
 0x637   : > { %v5300_v60 = vadd.f32 %v5256_v58, %v5193_v24  ;;  %7175 = vmatmul.msk.bf16.vlgmr.msra.gmra.mxu3 %vm2368_vm13, %v7172_v43  ;;  %v5271_v56 = vpop.f32.mrf.mxu1  ;;  %v6294_v41 = vpop.permute.xlu0 %6293  ;;  %v6196_v34 = vsel %vm10081_vm0, %v6189_v7, %v6191_v13  ;;  %vm10095_vm0 = vcmask 285696  }
 0x638   : > { %6115 = vmatpush.bf16.msra.mxu3 %v6094_v40  ;;  %v6213_v57 = vsel %vm484_vm3, %v6196_v34, 0 }
 0x639   : > { %7176 = vmatmul.msk.bf16.vlgmr.msrb.gmra.mxu0 %vm2368_vm13, %v7172_v43 }
 0x63a   : > { %6128 = vmatpush.bf16.msrb.mxu0 %v6097_v26  ;;  %v5243_v33 = vpop.f32.mrf.mxu3 }
 0x63b   : > { %v5299_v14 = vadd.f32 %v5243_v33, %v5192_v6  ;;  %v6290_v6 = vpop.permute.xlu1 %6289 }
 0x63c   : > { %v6299_v23 = vsel %vm10079_vm15, %v6288_v2, %v6290_v6  ;;  %vm10093_vm15 = vmmov %vm10091_vm11 }
 0x63d   : > { %v5190_v17 = vpop.f32.mrf.mxu2  ;;  %v6308_v20 = vsel %vm484_vm3, %v6299_v23, 0 }
 0x63e   : > { %v5258_v18 = vpop.f32.mrf.mxu0  ;;  %v6292_v29 = vpop.permute.xlu2 %6291 }
 0x63f   : > { %v5363_v9 = vpop.f32.mrf.mxu1  ;;  %v6395_v46 = vpop.permute.xlu0 %6394  ;;  %v6301_v49 = vsel %vm10084_vm1, %v6292_v29, %v6294_v41  ;;  %vm10098_vm1 = vmmov %vm10095_vm0 }
 0x640   : > { %v9781_v1 = vadd.f32 %v5363_v9, %v5300_v60  ;;  %v7190_v60 = vld [vmem:[%s9941_s2 + $0x54] sm:$0xf]  ;;  %v6314_v9 = vsel %vm484_vm3, %v6301_v49, 0 }
 0x642   : > { %7179 = vmatmul.msk.bf16.vlgmr.msrb.gmra.mxu2 %vm2368_vm13, %v7178_v11  ;;  %v5245_v15 = vpop.f32.mrf.mxu3  ;;  %7182 = vmatmul.msk.bf16.vlgmr.msra.gmra.mxu1 %vm2368_vm13, %v7178_v11 }
 0x643   : > { %6154 = vmatpush.bf16.msrb.mxu2 %v6103_v61  ;;  %6235 = vmatpush.bf16.msra.mxu1 %v6204_v48  ;;  %v6296_v31 = vpop.permute.xlu1 %6295 }
 0x644   : > { %v6302_v18 = vsel %vm10085_vm4, %v6294_v41, %v6296_v31  ;;  %vm10099_vm4 = vcmask 277504  }
 0x645   : > { %v5282_v25 = vpop.f32.mrf.mxu2  ;;  %v6317_v15 = vsel %vm484_vm3, %v6302_v18, 0 }
 0x646   : > { %v5302_v59 = vadd.f32 %v5282_v25, %v9748_v53  ;;  %v5350_v55 = vpop.f32.mrf.mxu0 }
 0x647   : > { %v5406_v43 = vadd.f32 %v5350_v55, %v5299_v14  ;;  %7180 = vmatmul.msk.bf16.vlgmr.msrb.gmra.mxu3 %vm2368_vm13, %v7178_v11  ;;  %v5365_v27 = vpop.f32.mrf.mxu1  ;;  %v6401_v48 = vpop.permute.xlu0 %6400 }
 0x648   : > { %6167 = vmatpush.bf16.msrb.mxu3 %v6106_v42 }
 0x649   : > { %7181 = vmatmul.msk.bf16.vlgmr.msra.gmra.mxu0 %vm2368_vm13, %v7178_v11 }
 0x64a   : > { %6222 = vmatpush.bf16.msra.mxu0 %v6201_v50  ;;  %v5295_v51 = vpop.f32.mrf.mxu3 }
 0x64b   : > { %v5303_v45 = vadd.f32 %v5295_v51, %v5196_v3  ;;  %v6300_v3 = vsel %vm10082_vm10, %v6290_v6, %v6292_v29  ;;  %v6397_v33 = vpop.permute.xlu1 %6396  ;;  %vm10096_vm10 = vmmov %vm10094_vm2 }
 0x64c   : > { %v6311_v56 = vsel %vm484_vm3, %v6300_v3, 0 }
 0x64d   : > { %v5284_v53 = vpop.f32.mrf.mxu2 }
 0x64e   : > { %v5352_v39 = vpop.f32.mrf.mxu0 }
 0x64f   : > { %v5457_v62 = vpop.f32.mrf.mxu1  ;;  %v6502_v51 = vpop.permute.xlu0 %6501 }
 0x650   : > { %v9799_v30 = vadd.f32 %v5457_v62, %v5406_v43  ;;  %v7196_v43 = vld [vmem:[%s9941_s2 + $0x58] sm:$0xf] }
 0x652   : > { %7183 = vmatmul.msk.bf16.vlgmr.msra.gmra.mxu2 %vm2368_vm13, %v7178_v11  ;;  %v5297_v38 = vpop.f32.mrf.mxu3  ;;  %7187 = vmatmul.msk.bf16.vlgmr.msrb.gmra.mxu1 %vm2368_vm13, %v7184_v28 }
 0x653   : > { %6248 = vmatpush.bf16.msra.mxu2 %v6207_v52  ;;  %6329 = vmatpush.bf16.msrb.mxu1 %v6308_v20  ;;  %v6403_v7 = vpop.permute.xlu1 %6402 }
 0x654   : > { %v6409_v55 = vsel %vm10087_vm6, %v6401_v48, %v6403_v7  ;;  %vm10101_vm6 = vmmov %vm10095_vm0 }
 0x655   : > { %v5376_v24 = vpop.f32.mrf.mxu2  ;;  %v6424_v2 = vsel %vm484_vm3, %v6409_v55, 0 }
 0x656   : > { %v5408_v16 = vadd.f32 %v5376_v24, %v9763_v12  ;;  %v5402_v47 = vpop.f32.mrf.mxu0  ;;  %v6298_v12 = vpop.permute.xlu2 %6297 }
 0x657   : > { %v5410_v35 = vadd.f32 %v5402_v47, %v5303_v45  ;;  %7185 = vmatmul.msk.bf16.vlgmr.msra.gmra.mxu3 %vm2368_vm13, %v7184_v28  ;;  %v5459_v0 = vpop.f32.mrf.mxu1  ;;  %v6303_v58 = vsel %vm10083_vm12, %v6296_v31, %v6298_v12  ;;  %v6508_v41 = vpop.permute.xlu0 %6507  ;;  %vm10097_vm12 = vmmov %vm10095_vm0 }
 0x658   : > { %6261 = vmatpush.bf16.msra.mxu3 %v6210_v36  ;;  %v6320_v32 = vsel %vm484_vm3, %v6303_v58, 0 }
 0x659   : > { %7186 = vmatmul.msk.bf16.vlgmr.msrb.gmra.mxu0 %vm2368_vm13, %v7184_v28 }
 0x65a   : > { %6274 = vmatpush.bf16.msrb.mxu0 %v6213_v57  ;;  %v5389_v5 = vpop.f32.mrf.mxu3 }
 0x65b   : > { %v5409_v8 = vadd.f32 %v5389_v5, %v5302_v59  ;;  %v6406_v59 = vsel %vm10086_vm5, %v6395_v46, %v6397_v33  ;;  %v6504_v23 = vpop.permute.xlu1 %6503  ;;  %vm10100_vm5 = vmmov %vm10095_vm0 }
 0x65c   : > { %v6415_v13 = vsel %vm484_vm3, %v6406_v59, 0  ;;  %v6513_v12 = vsel %vm10092_vm14, %v6502_v51, %v6504_v23 }
 0x65d   : > { %v5378_v37 = vpop.f32.mrf.mxu2  ;;  %v6522_v58 = vsel %vm484_vm3, %v6513_v12, 0 }
 0x65e   : > { %v5404_v4 = vpop.f32.mrf.mxu0  ;;  %v6399_v63 = vpop.permute.xlu2 %6398 }
 0x65f   : > { %v5509_v40 = vpop.f32.mrf.mxu1  ;;  %v6407_v22 = vsel %vm10088_vm7, %v6397_v33, %v6399_v63  ;;  %v6408_v39 = vsel %vm10089_vm8, %v6399_v63, %v6401_v48  ;;  %vm10102_vm7 = vmmov %vm10099_vm4 }
 0x660   : > { %v9817_v26 = vadd.f32 %v5509_v40, %v5410_v35  ;;  %v6421_v20 = vsel %vm484_vm3, %v6408_v39, 0  ;;  %vm10103_vm8 = vmmov %vm10099_vm4 }
 0x662   : > { %7188 = vmatmul.msk.bf16.vlgmr.msrb.gmra.mxu2 %vm2368_vm13, %v7184_v28  ;;  %v5391_v14 = vpop.f32.mrf.mxu3  ;;  %7192 = vmatmul.msk.bf16.vlgmr.msra.gmra.mxu1 %vm2368_vm13, %v7190_v60 }
 0x663   : > { %6342 = vmatpush.bf16.msrb.mxu2 %v6311_v56  ;;  %6381 = vmatpush.bf16.msra.mxu1 %v6320_v32  ;;  %v6510_v0 = vpop.permute.xlu1 %6509  ;;  %v6609_v56 = vpop.permute.xlu0 %6608 }
 0x664   : > { %v6516_v49 = vsel %vm10094_vm2, %v6508_v41, %v6510_v0 }
 0x665   : > { %v5470_v17 = vpop.f32.mrf.mxu2 }
 0x666   : > { %v5514_v11 = vadd.f32 %v5470_v17, %v9781_v1  ;;  %v5496_v54 = vpop.f32.mrf.mxu0  ;;  %v6405_v27 = vpop.permute.xlu2 %6404 }
 0x667   : > { %v5516_v61 = vadd.f32 %v5496_v54, %v5409_v8  ;;  %7189 = vmatmul.msk.bf16.vlgmr.msrb.gmra.mxu3 %vm2368_vm13, %v7184_v28  ;;  %v5511_v10 = vpop.f32.mrf.mxu1  ;;  %v6418_v28 = vsel %vm484_vm3, %v6407_v22, 0 }
 0x668   : > { %6355 = vmatpush.bf16.msrb.mxu3 %v6314_v9 }
 0x669   : > { %7191 = vmatmul.msk.bf16.vlgmr.msra.gmra.mxu0 %vm2368_vm13, %v7190_v60 }
 0x66a   : > { %6368 = vmatpush.bf16.msra.mxu0 %v6317_v15  ;;  %v5483_v25 = vpop.f32.mrf.mxu3 }
 0x66b   : > { %v5515_v44 = vadd.f32 %v5483_v25, %v5408_v16  ;;  %v6410_v16 = vsel %vm10090_vm9, %v6403_v7, %v6405_v27  ;;  %v6611_v33 = vpop.permute.xlu1 %6610  ;;  %v6615_v15 = vpop.permute.xlu0 %6614  ;;  %vm10104_vm9 = vmmov %vm10099_vm4 }
 0x66c   : > { %v6427_v35 = vsel %vm484_vm3, %v6410_v16, 0 }
 0x66d   : > { %v5472_v1 = vpop.f32.mrf.mxu2 }
 0x66e   : > { %v5498_v19 = vpop.f32.mrf.mxu0  ;;  %v6506_v38 = vpop.permute.xlu2 %6505 }
 0x66f   : > { %v5603_v42 = vpop.f32.mrf.mxu1  ;;  %v6515_v47 = vsel %vm10091_vm11, %v6506_v38, %v6508_v41  ;;  %v6514_v46 = vsel %vm10093_vm15, %v6504_v23, %v6506_v38  ;;  %v6620_v19 = vsel %vm10097_vm12, %v6609_v56, %v6611_v33  ;;  %vm10105_vm11 = vmmov %vm10099_vm4 }
 0x670   : > { %v9835_v50 = vadd.f32 %v5603_v42, %v5516_v61  ;;  %v6528_v57 = vsel %vm484_vm3, %v6515_v47, 0  ;;  %v6525_v32 = vsel %vm484_vm3, %v6514_v46, 0  ;;  %v6531_v61 = vsel %vm484_vm3, %v6516_v49, 0 }
 0x672   : > { %7193 = vmatmul.msk.bf16.vlgmr.msra.gmra.mxu2 %vm2368_vm13, %v7190_v60  ;;  %v5485_v45 = vpop.f32.mrf.mxu3  ;;  %7197 = vmatmul.msk.bf16.vlgmr.msrb.gmra.mxu1 %vm2368_vm13, %v7196_v43 }
 0x673   : > { %6436 = vmatpush.bf16.msra.mxu2 %v6415_v13  ;;  %6475 = vmatpush.bf16.msrb.mxu1 %v6424_v2  ;;  %v6617_v7 = vpop.permute.xlu1 %6616  ;;  %v6629_v13 = vsel %vm484_vm3, %v6620_v19, 0 }
 0x675   : > { %v5564_v53 = vpop.f32.mrf.mxu2 }
 0x676   : > { %v5620_v6 = vadd.f32 %v5564_v53, %v9799_v30  ;;  %v5590_v62 = vpop.f32.mrf.mxu0  ;;  %v6512_v37 = vpop.permute.xlu2 %6511 }
 0x677   : > { %v5622_v52 = vadd.f32 %v5590_v62, %v5515_v44  ;;  %7194 = vmatmul.msk.bf16.vlgmr.msra.gmra.mxu3 %vm2368_vm13, %v7190_v60  ;;  %v5605_v29 = vpop.f32.mrf.mxu1  ;;  %v6517_v1 = vsel %vm10096_vm10, %v6510_v0, %v6512_v37 }
 0x678   : > { %6449 = vmatpush.bf16.msra.mxu3 %v6418_v28  ;;  %v6534_v42 = vsel %vm484_vm3, %v6517_v1, 0  ;;  %v7208_v28 = vld [vmem:[%s9941_s2 + $0x60] sm:$0xf] }
 0x679   : > { %7195 = vmatmul.msk.bf16.vlgmr.msrb.gmra.mxu0 %vm2368_vm13, %v7190_v60 }
 0x67a   : > { %6462 = vmatpush.bf16.msrb.mxu0 %v6421_v20  ;;  %v5577_v24 = vpop.f32.mrf.mxu3 }
 0x67b   : > { %v5621_v21 = vadd.f32 %v5577_v24, %v5514_v11  ;;  %v7202_v11 = vld [vmem:[%s9941_s2 + $0x5c] sm:$0xf] }
 0x67d   : > { %v5566_v30 = vpop.f32.mrf.mxu2 }
 0x67e   : > { %v5592_v34 = vpop.f32.mrf.mxu0  ;;  %v6613_v63 = vpop.permute.xlu2 %6612  ;;  %v6623_v30 = vsel %vm10100_vm5, %v6615_v15, %v6617_v7 }
 0x67f   : > { %v5697_v36 = vpop.f32.mrf.mxu1  ;;  %v6621_v54 = vsel %vm10095_vm0, %v6611_v33, %v6613_v63  ;;  %v6622_v22 = vsel %vm10098_vm1, %v6613_v63, %v6615_v15  ;;  %v6638_v47 = vsel %vm484_vm3, %v6623_v30, 0 }
 0x680   : > { %v9850_v31 = vadd.f32 %v5697_v36, %v5622_v52  ;;  %v6632_v48 = vsel %vm484_vm3, %v6621_v54, 0  ;;  %v6635_v52 = vsel %vm484_vm3, %v6622_v22, 0 }
 0x682   : > { %7198 = vmatmul.msk.bf16.vlgmr.msrb.gmra.mxu2 %vm2368_vm13, %v7196_v43  ;;  %v5579_v5 = vpop.f32.mrf.mxu3  ;;  %7201 = vmatmul.msk.bf16.vlgmr.msra.gmra.mxu1 %vm2368_vm13, %v7196_v43 }
 0x683   : > { %6488 = vmatpush.bf16.msrb.mxu2 %v6427_v35  ;;  %6569 = vmatpush.bf16.msra.mxu1 %v6528_v57 }
 0x685   : > { %v5616_v8 = vpop.f32.mrf.mxu2 }
 0x686   : > { %v5624_v3 = vadd.f32 %v5616_v8, %v9817_v26  ;;  %v5684_v4 = vpop.f32.mrf.mxu0  ;;  %v6619_v2 = vpop.permute.xlu2 %6618 }
 0x687   : > { %v5728_v40 = vadd.f32 %v5684_v4, %v5621_v21  ;;  %7199 = vmatmul.msk.bf16.vlgmr.msrb.gmra.mxu3 %vm2368_vm13, %v7196_v43  ;;  %v5699_v60 = vpop.f32.mrf.mxu1  ;;  %v6624_v16 = vsel %vm10101_vm6, %v6617_v7, %v6619_v2 }
 0x688   : > { %6543 = vmatpush.bf16.msrb.mxu3 %v6522_v58  ;;  %v6641_v0 = vsel %vm484_vm3, %v6624_v16, 0  ;;  %v7214_v58 = vld [vmem:[%s9941_s2 + $0x64] sm:$0xf] }
 0x689   : > { %7200 = vmatmul.msk.bf16.vlgmr.msra.gmra.mxu0 %vm2368_vm13, %v7196_v43 }
 0x68a   : > { %6556 = vmatpush.bf16.msra.mxu0 %v6525_v32  ;;  %v5671_v14 = vpop.f32.mrf.mxu3 }
 0x68b   : > { %v5727_v17 = vadd.f32 %v5671_v14, %v5620_v6  ;;  %v6718_v6 = vpop.permute.xlu1 %6717 }
 0x68d   : > { %v5618_v26 = vpop.f32.mrf.mxu2 }
 0x68e   : > { %v5686_v18 = vpop.f32.mrf.mxu0  ;;  %v6720_v21 = vpop.permute.xlu2 %6719 }
 0x68f   : > { %v5791_v9 = vpop.f32.mrf.mxu1 }
 0x690   : > { %v9868_v10 = vadd.f32 %v5791_v9, %v5728_v40 }
 0x692   : > { %7203 = vmatmul.msk.bf16.vlgmr.msra.gmra.mxu2 %vm2368_vm13, %v7202_v11  ;;  %v5673_v25 = vpop.f32.mrf.mxu3  ;;  %7206 = vmatmul.msk.bf16.vlgmr.msrb.gmra.mxu1 %vm2368_vm13, %v7202_v11 }
 0x693   : > { %6582 = vmatpush.bf16.msra.mxu2 %v6531_v61  ;;  %6663 = vmatpush.bf16.msrb.mxu1 %v6632_v48  ;;  %v6724_v37 = vpop.permute.xlu1 %6723 }
 0x695   : > { %v5710_v44 = vpop.f32.mrf.mxu2 }
 0x696   : > { %v5730_v59 = vadd.f32 %v5710_v44, %v9835_v50  ;;  %v5778_v55 = vpop.f32.mrf.mxu0  ;;  %v6716_v50 = vpop.permute.xlu0 %6715  ;;  %v7220_v44 = vld [vmem:[%s9941_s2 + $0x68] sm:$0xf] }
 0x697   : > { %v5834_v43 = vadd.f32 %v5778_v55, %v5727_v17  ;;  %7204 = vmatmul.msk.bf16.vlgmr.msra.gmra.mxu3 %vm2368_vm13, %v7202_v11  ;;  %v5793_v27 = vpop.f32.mrf.mxu1  ;;  %v6727_v23 = vsel %vm10099_vm4, %v6716_v50, %v6718_v6  ;;  %v6726_v12 = vpop.permute.xlu2 %6725 }
 0x698   : > { %6595 = vmatpush.bf16.msra.mxu3 %v6534_v42  ;;  %v6736_v20 = vsel %vm484_vm3, %v6727_v23, 0  ;;  %v6731_v46 = vsel %vm10103_vm8, %v6724_v37, %v6726_v12 }
 0x699   : > { %7205 = vmatmul.msk.bf16.vlgmr.msrb.gmra.mxu0 %vm2368_vm13, %v7202_v11  ;;  %v6748_v32 = vsel %vm484_vm3, %v6731_v46, 0 }
 0x69a   : > { %6650 = vmatpush.bf16.msrb.mxu0 %v6629_v13  ;;  %v5723_v51 = vpop.f32.mrf.mxu3 }
 0x69b   : > { %v5731_v45 = vadd.f32 %v5723_v51, %v5624_v3 }
 0x69d   : > { %v5712_v53 = vpop.f32.mrf.mxu2 }
 0x69e   : > { %v5780_v39 = vpop.f32.mrf.mxu0  ;;  %v6722_v56 = vpop.permute.xlu0 %6721 }
 0x69f   : > { %v5903_v62 = vpop.f32.mrf.mxu1  ;;  %v6729_v17 = vsel %vm10104_vm9, %v6720_v21, %v6722_v56  ;;  %v6730_v49 = vsel %vm10105_vm11, %v6722_v56, %v6724_v37 }
 0x6a0   : > { %v9886_v29 = vadd.f32 %v5903_v62, %v5834_v43  ;;  %v6742_v63 = vsel %vm484_vm3, %v6729_v17, 0  ;;  %v6745_v9 = vsel %vm484_vm3, %v6730_v49, 0 }
 0x6a2   : > { %7207 = vmatmul.msk.bf16.vlgmr.msrb.gmra.mxu2 %vm2368_vm13, %v7202_v11  ;;  %v5725_v38 = vpop.f32.mrf.mxu3  ;;  %7211 = vmatmul.msk.bf16.vlgmr.msra.gmra.mxu1 %vm2368_vm13, %v7208_v28 }
 0x6a3   : > { %6676 = vmatpush.bf16.msrb.mxu2 %v6635_v52  ;;  %6757 = vmatpush.bf16.msra.mxu1 %v6736_v20 }
 0x6a5   : > { %v5804_v24 = vpop.f32.mrf.mxu2 }
 0x6a6   : > { %v5836_v41 = vadd.f32 %v5804_v24, %v9850_v31  ;;  %v5830_v34 = vpop.f32.mrf.mxu0  ;;  %v6728_v31 = vsel %vm10102_vm7, %v6718_v6, %v6720_v21 }
 0x6a7   : > { %v5838_v36 = vadd.f32 %v5830_v34, %v5731_v45  ;;  %7209 = vmatmul.msk.bf16.vlgmr.msrb.gmra.mxu3 %vm2368_vm13, %v7208_v28  ;;  %v5905_v35 = vpop.f32.mrf.mxu1  ;;  %v6739_v40 = vsel %vm484_vm3, %v6728_v31, 0  ;;  %vm6840_vm3 = vcmask 719872  }
 0x6a8   : > { %6689 = vmatpush.bf16.msrb.mxu3 %v6638_v47 }
 0x6a9   : > { %7210 = vmatmul.msk.bf16.vlgmr.msra.gmra.mxu0 %vm2368_vm13, %v7208_v28 }
 0x6aa   : > { %6702 = vmatpush.bf16.msra.mxu0 %v6641_v0  ;;  %v5817_v57 = vpop.f32.mrf.mxu3 }
 0x6ab   : > { %v5837_v5 = vadd.f32 %v5817_v57, %v5730_v59 }
 0x6ad   : > { %v5806_v8 = vpop.f32.mrf.mxu2 }
 0x6ae   : > { %v5832_v3 = vpop.f32.mrf.mxu0 }
 0x6af   : > { %v5955_v4 = vpop.f32.mrf.mxu1 }
 0x6b0   : > { %v5963_v60 = vadd.f32 %v5955_v4, %v5838_v36 }
 0x6b2   : > { %7212 = vmatmul.msk.bf16.vlgmr.msra.gmra.mxu2 %vm2368_vm13, %v7208_v28  ;;  %v5819_v33 = vpop.f32.mrf.mxu3  ;;  %7216 = vmatmul.msk.bf16.vlgmr.msrb.gmra.mxu1 %vm2368_vm13, %v7214_v58 }
 0x6b3   : > { %6770 = vmatpush.bf16.msra.mxu2 %v6739_v40  ;;  %6809 = vmatpush.bf16.msrb.mxu1 %v6748_v32 }
 0x6b5   : > { %v5916_v14 = vpop.f32.mrf.mxu2 }
 0x6b6   : > { %v5960_v26 = vadd.f32 %v5916_v14, %v9868_v10  ;;  %v5942_v11 = vpop.f32.mrf.mxu0 }
 0x6b7   : > { %v5962_v18 = vadd.f32 %v5942_v11, %v5837_v5  ;;  %7213 = vmatmul.msk.bf16.vlgmr.msra.gmra.mxu3 %vm2368_vm13, %v7208_v28  ;;  %v5957_v54 = vpop.f32.mrf.mxu1 }
 0x6b8   : > { %6783 = vmatpush.bf16.msra.mxu3 %v6742_v63 }
 0x6b9   : > { %7215 = vmatmul.msk.bf16.vlgmr.msrb.gmra.mxu0 %vm2368_vm13, %v7214_v58 }
 0x6ba   : > { %6796 = vmatpush.bf16.msrb.mxu0 %v6745_v9  ;;  %v5929_v61 = vpop.f32.mrf.mxu3 }
 0x6bb   : > { %v5961_v48 = vadd.f32 %v5929_v61, %v5836_v41 }
 0x6bd   : > { %v5918_v15 = vpop.f32.mrf.mxu2 }
 0x6be   : > { %v5944_v25 = vpop.f32.mrf.mxu0 }
 0x6bf   : > { %v6049_v10 = vpop.f32.mrf.mxu1 }
 0x6c0   : > { %v6069_v1 = vadd.f32 %v6049_v10, %v5962_v18 }
 0x6c2   : > { %7217 = vmatmul.msk.bf16.vlgmr.msrb.gmra.mxu2 %vm2368_vm13, %v7214_v58  ;;  %v5931_v7 = vpop.f32.mrf.mxu3  ;;  %7221 = vmatmul.msk.bf16.vlgmr.msra.gmra.mxu1 %vm2368_vm13, %v7220_v44 }
 0x6c5   : > { %v6010_v59 = vpop.f32.mrf.mxu2 }
 0x6c6   : > { %v6066_v19 = vadd.f32 %v6010_v59, %v9886_v29  ;;  %v6036_v55 = vpop.f32.mrf.mxu0 }
 0x6c7   : > { %v6068_v42 = vadd.f32 %v6036_v55, %v5961_v48  ;;  %7218 = vmatmul.msk.bf16.vlgmr.msrb.gmra.mxu3 %vm2368_vm13, %v7214_v58  ;;  %v6051_v43 = vpop.f32.mrf.mxu1 }
 0x6c9   : > { %7219 = vmatmul.msk.bf16.vlgmr.msra.gmra.mxu0 %vm2368_vm13, %v7214_v58 }
 0x6ca   : > { %v6023_v27 = vpop.f32.mrf.mxu3 }
 0x6cb   : > { %v6067_v13 = vadd.f32 %v6023_v27, %v5960_v26 }
 0x6cd   : > { %v6012_v2 = vpop.f32.mrf.mxu2 }
 0x6ce   : > { %v6038_v51 = vpop.f32.mrf.mxu0 }
 0x6cf   : > { %v6143_v45 = vpop.f32.mrf.mxu1 }
 0x6d0   : > { %v6175_v53 = vadd.f32 %v6143_v45, %v6068_v42 }
 0x6d2   : > { %7222 = vmatmul.msk.bf16.vlgmr.msra.gmra.mxu2 %vm2368_vm13, %v7220_v44  ;;  %v6025_v50 = vpop.f32.mrf.mxu3  ;;  %7225 = vmatmul.msk.bf16.vlgmr.msrb.gmra.mxu1 %vm2368_vm13, %v7220_v44 }
 0x6d5   : > { %v6062_v22 = vpop.f32.mrf.mxu2 }
 0x6d6   : > { %v6070_v6 = vadd.f32 %v6062_v22, %v5963_v60  ;;  %v6130_v39 = vpop.f32.mrf.mxu0 }
 0x6d7   : > { %v6174_v23 = vadd.f32 %v6130_v39, %v6067_v13  ;;  %7223 = vmatmul.msk.bf16.vlgmr.msra.gmra.mxu3 %vm2368_vm13, %v7220_v44  ;;  %v6145_v62 = vpop.f32.mrf.mxu1 }
 0x6d9   : > { %7224 = vmatmul.msk.bf16.vlgmr.msrb.gmra.mxu0 %vm2368_vm13, %v7220_v44 }
 0x6da   : > { %v6117_v28 = vpop.f32.mrf.mxu3 }
 0x6db   : > { %v6173_v52 = vadd.f32 %v6117_v28, %v6066_v19 }
 0x6dd   : > { %v6064_v29 = vpop.f32.mrf.mxu2 }
 0x6de   : > { %v6132_v20 = vpop.f32.mrf.mxu0 }
 0x6df   : > { %v6237_v38 = vpop.f32.mrf.mxu1 }
 0x6e0   : > { %v6281_v24 = vadd.f32 %v6237_v38, %v6174_v23 }
 0x6e2   : > { %v6119_v21 = vpop.f32.mrf.mxu3 }
 0x6e3   : > { %v6824_v21 = vpop.permute.xlu0 %6823 }
 0x6e5   : > { %v6156_v30 = vpop.f32.mrf.mxu2 }
 0x6e6   : > { %v6176_v41 = vadd.f32 %v6156_v30, %v6069_v1  ;;  %v6224_v16 = vpop.f32.mrf.mxu0 }
 0x6e7   : > { %v6280_v34 = vadd.f32 %v6224_v16, %v6173_v52  ;;  %v6239_v47 = vpop.f32.mrf.mxu1 }
 0x6ea   : > { %v6169_v36 = vpop.f32.mrf.mxu3 }
 0x6eb   : > { %v6177_v35 = vadd.f32 %v6169_v36, %v6070_v6 }
 0x6ed   : > { %v6158_v0 = vpop.f32.mrf.mxu2 }
 0x6ee   : > { %v6226_v57 = vpop.f32.mrf.mxu0 }
 0x6ef   : > { %v6331_v5 = vpop.f32.mrf.mxu1 }
 0x6f0   : > { %v6387_v8 = vadd.f32 %v6331_v5, %v6280_v34 }
 0x6f2   : > { %v6171_v37 = vpop.f32.mrf.mxu3 }
 0x6f5   : > { %v6250_v31 = vpop.f32.mrf.mxu2 }
 0x6f6   : > { %v6282_v12 = vadd.f32 %v6250_v31, %v6175_v53  ;;  %v6276_v3 = vpop.f32.mrf.mxu0 }
 0x6f7   : > { %v6284_v46 = vadd.f32 %v6276_v3, %v6177_v35  ;;  %v6333_v4 = vpop.f32.mrf.mxu1 }
 0x6fa   : > { %v6263_v58 = vpop.f32.mrf.mxu3 }
 0x6fb   : > { %v6283_v40 = vadd.f32 %v6263_v58, %v6176_v41 }
 0x6fd   : > { %v6252_v60 = vpop.f32.mrf.mxu2 }
 0x6fe   : > { %v6278_v56 = vpop.f32.mrf.mxu0 }
 0x6ff   : > { %v6383_v32 = vpop.f32.mrf.mxu1 }
 0x700   : > { %v6391_v33 = vadd.f32 %v6383_v32, %v6284_v46 }
 0x702   : > { %v6265_v14 = vpop.f32.mrf.mxu3 }
 0x705   : > { %v6344_v17 = vpop.f32.mrf.mxu2 }
 0x706   : > { %v6388_v26 = vadd.f32 %v6344_v17, %v6281_v24  ;;  %v6370_v49 = vpop.f32.mrf.mxu0 }
 0x707   : > { %v6390_v11 = vadd.f32 %v6370_v49, %v6283_v40  ;;  %v6385_v63 = vpop.f32.mrf.mxu1 }
 0x70a   : > { %v6357_v18 = vpop.f32.mrf.mxu3 }
 0x70b   : > { %v6389_v54 = vadd.f32 %v6357_v18, %v6282_v12 }
 0x70d   : > { %v6346_v9 = vpop.f32.mrf.mxu2 }
 0x70e   : > { %v6372_v61 = vpop.f32.mrf.mxu0 }
 0x70f   : > { %v6477_v48 = vpop.f32.mrf.mxu1 }
 0x710   : > { %v6497_v15 = vadd.f32 %v6477_v48, %v6390_v11 }
 0x712   : > { %v6359_v25 = vpop.f32.mrf.mxu3 }
 0x715   : > { %v6438_v10 = vpop.f32.mrf.mxu2 }
 0x716   : > { %v6464_v44 = vpop.f32.mrf.mxu0  ;;  %v6494_v23 = vadd.f32 %v6438_v10, %v6387_v8 }
 0x717   : > { %v6479_v1 = vpop.f32.mrf.mxu1 }
 0x71a   : > { %v6451_v7 = vpop.f32.mrf.mxu3 }
 0x71b   : > { %v6495_v8 = vadd.f32 %v6451_v7, %v6388_v26 }
 0x71d   : > { %v6440_v59 = vpop.f32.mrf.mxu2 }
 0x71e   : > { %v6466_v19 = vpop.f32.mrf.mxu0 }
 0x71f   : > { %v6571_v55 = vpop.f32.mrf.mxu1 }
 0x722   : > { %v6453_v42 = vpop.f32.mrf.mxu3 }
 0x725   : > { %v6490_v43 = vpop.f32.mrf.mxu2 }
 0x726   : > { %v6558_v27 = vpop.f32.mrf.mxu0  ;;  %v6498_v35 = vadd.f32 %v6490_v43, %v6391_v33  ;;  %v6496_v33 = vadd.f32 %v6464_v44, %v6389_v54 }
 0x727   : > { %v6573_v13 = vpop.f32.mrf.mxu1  ;;  %v6602_v3 = vadd.f32 %v6558_v27, %v6495_v8 }
 0x728   : > { %v6603_v11 = vadd.f32 %v6571_v55, %v6496_v33 }
 0x72a   : > { %v6545_v2 = vpop.f32.mrf.mxu3 }
 0x72b   : > { %v6601_v52 = vadd.f32 %v6545_v2, %v6494_v23 }
 0x72d   : > { %v6492_v51 = vpop.f32.mrf.mxu2 }
 0x72e   : > { %v6560_v45 = vpop.f32.mrf.mxu0 }
 0x72f   : > { %v6665_v53 = vpop.f32.mrf.mxu1 }
 0x730   : > { %v6709_v4 = vadd.f32 %v6665_v53, %v6602_v3 }
 0x732   : > { %v6547_v50 = vpop.f32.mrf.mxu3 }
 0x735   : > { %v6584_v22 = vpop.f32.mrf.mxu2 }
 0x736   : > { %v6652_v6 = vpop.f32.mrf.mxu0  ;;  %v6604_v60 = vadd.f32 %v6584_v22, %v6497_v15 }
 0x737   : > { %v6667_v39 = vpop.f32.mrf.mxu1  ;;  %v6708_v29 = vadd.f32 %v6652_v6, %v6601_v52 }
 0x73a   : > { %v6597_v62 = vpop.f32.mrf.mxu3 }
 0x73b   : > { %v6605_v5 = vadd.f32 %v6597_v62, %v6498_v35 }
 0x73d   : > { %v6586_v28 = vpop.f32.mrf.mxu2 }
 0x73e   : > { %v6654_v20 = vpop.f32.mrf.mxu0 }
 0x73f   : > { %v6759_v38 = vpop.f32.mrf.mxu1 }
 0x740   : > { %v6815_v24 = vadd.f32 %v6759_v38, %v6708_v29 }
 0x742   : > { %v6599_v30 = vpop.f32.mrf.mxu3  ;;  %v6826_v41 = vadd.f32 %v6824_v21, %v6815_v24 }
 0x744   : > { %v6831_v34 = vmax.f32 %v6826_v41, 0.0 }
 0x745   : > { %v6678_v16 = vpop.f32.mrf.mxu2 }
 0x746   : > { %v6704_v47 = vpop.f32.mrf.mxu0  ;;  %6836 = vst [vmem:[%s9929_s29] sm:$0xff] %v6831_v34  ;;  %v6710_v61 = vadd.f32 %v6678_v16, %v6603_v11 }
 0x747   : > { %v6761_v36 = vpop.f32.mrf.mxu1  ;;  %v6712_v37 = vadd.f32 %v6704_v47, %v6605_v5 }
 0x74a   : > { %v6691_v0 = vpop.f32.mrf.mxu3 }
 0x74b   : > { %v6711_v17 = vadd.f32 %v6691_v0, %v6604_v60 }
 0x74d   : > { %v6680_v57 = vpop.f32.mrf.mxu2 }
 0x74e   : > { %v6706_v31 = vpop.f32.mrf.mxu0 }
 0x74f   : > { %v6811_v12 = vpop.f32.mrf.mxu1 }
 0x750   : > { %v6819_v46 = vadd.f32 %v6811_v12, %v6712_v37 }
 0x752   : > { %v6693_v58 = vpop.f32.mrf.mxu3  ;;  %v6830_v40 = vadd.f32 %v6824_v21, %v6819_v46 }
 0x754   : > { %v6835_v14 = vmax.f32 %v6830_v40, 0.0 }
 0x755   : > { %v6772_v56 = vpop.f32.mrf.mxu2 }
 0x756   : > { %v6816_v32 = vadd.f32 %v6772_v56, %v6709_v4  ;;  %v6798_v26 = vpop.f32.mrf.mxu0  ;;  %6841 = vst.msk [vmem:[%s9929_s29 + $0x20] sm:$0xff] %vm6840_vm3, %v6835_v14 }
 0x757   : > { %v6818_v63 = vadd.f32 %v6798_v26, %v6711_v17  ;;  %v6813_v18 = vpop.f32.mrf.mxu1 }
 0x758   : > { %v6827_v49 = vadd.f32 %v6824_v21, %v6816_v32 }
 0x759   : > { %v6829_v48 = vadd.f32 %v6824_v21, %v6818_v63 }
 0x75a   : > { %v6832_v9 = vmax.f32 %v6827_v49, 0.0  ;;  %v6785_v15 = vpop.f32.mrf.mxu3 }
 0x75b   : > { %v6834_v25 = vmax.f32 %v6829_v48, 0.0  ;;  %v6817_v10 = vadd.f32 %v6785_v15, %v6710_v61 }
 0x75c   : > { %6837 = vst [vmem:[%s9929_s29 + $0x8] sm:$0xff] %v6832_v9 }
 0x75d   : > { %v6774_v1 = vpop.f32.mrf.mxu2  ;;  %6839 = vst [vmem:[%s9929_s29 + $0x18] sm:$0xff] %v6834_v25  ;;  %v6828_v7 = vadd.f32 %v6824_v21, %v6817_v10 }
 0x75e   : > { %v6800_v54 = vpop.f32.mrf.mxu0 }
 0x75f   : > { %v6833_v44 = vmax.f32 %v6828_v7, 0.0 }
 0x761   : > { %6838 = vst [vmem:[%s9929_s29 + $0x10] sm:$0xff] %v6833_v44 }
 0x762   : > { %v6787_v59 = vpop.f32.mrf.mxu3 }
 0x763 PF: > { %s16_s21 = sadd.s32 1, %s7273_s21  }
 0x764   : > { %p13_p4 = scmp.ge.s32.totalorder %s16_s21, 4  }
 0x766   :  { %15 = sbr.rel (!%p13_p4) target bundleno = 1 (0x1), region = 153 }

</bundles_post_ra>
